<compile_context>
chip_gen: v6e
topology: v6e:2x2x1
jax: 0.10.0
libtpu: 0.0.40
codegen_flags: <defaults>
</compile_context>

<pallas_src>
import functools
import math

import jax
import jax.numpy as jnp
from jax import lax
from jax.experimental import pallas as pl
from jax.experimental.pallas import tpu as pltpu


# ----------------------------------------------------------------------------
# Tiling helpers
# ----------------------------------------------------------------------------
def _row_block(h, max_rb=8):
    """Largest divisor of h that is <= max_rb (row chunk for depthwise/project)."""
    for rb in range(min(h, max_rb), 0, -1):
        if h % rb == 0:
            return rb
    return 1


def _expand_rows(h, w, cap=2048):
    """Largest divisor of h with rows*w <= cap (M rows fed to the expand matmul)."""
    for re in range(h, 0, -1):
        if h % re == 0 and re * w <= cap:
            return re
    return 1


# ----------------------------------------------------------------------------
# Fused branch kernel, stride 1 (optionally with residual add)
# ----------------------------------------------------------------------------
def _fused_s1_kernel(x_ref, w1_ref, b1_ref, w9_ref, b2_ref, w3_ref, b3_ref,
                     o_ref, hid_ref, *, H, W, RE, RB, add_res):
    Cin = x_ref.shape[-1]
    hid = w1_ref.shape[-1]
    oup = w3_ref.shape[-1]

    # --- zero only the 1-pixel halo (interior fully overwritten below) ------
    hid_ref[0:1, :, :] = jnp.zeros((1, W + 2, hid), jnp.float32)
    hid_ref[H + 1:H + 2, :, :] = jnp.zeros((1, W + 2, hid), jnp.float32)
    hid_ref[:, 0:1, :] = jnp.zeros((H + 2, 1, hid), jnp.float32)
    hid_ref[:, W + 1:W + 2, :] = jnp.zeros((H + 2, 1, hid), jnp.float32)

    # --- hoist loop-invariant weight / bias loads ----------------------------
    w1 = w1_ref[...]
    b1 = b1_ref[...]
    w3 = w3_ref[...]
    b2 = b2_ref[...]
    b3 = b3_ref[...]
    w9 = w9_ref[...]
    taps = [w9[t] for t in range(9)]          # (hid,) each; BN scale pre-folded

    # --- expand 1x1 (BN folded) + ReLU -> padded VMEM scratch ----------------
    def expand_body(c, carry):
        r0 = pl.multiple_of(c * RE, RE)
        xc = x_ref[0, pl.ds(r0, RE), :, :].reshape(RE * W, Cin)
        t = jnp.dot(xc, w1, preferred_element_type=jnp.float32)
        t = jnp.maximum(t + b1, 0.0)
        hid_ref[pl.ds(r0 + 1, RE), 1:W + 1, :] = t.reshape(RE, W, hid)
        return carry

    n_exp = H // RE
    lax.fori_loop(0, n_exp, expand_body, 0, unroll=n_exp <= 2)

    # --- depthwise 3x3 (BN folded) + ReLU, project 1x1 (+ residual) ----------
    def dw_body(c, carry):
        r0 = pl.multiple_of(c * RB, RB)
        acc = None
        for dy in range(3):
            for dx in range(3):
                win = hid_ref[pl.ds(r0 + dy, RB), dx:dx + W, :]
                term = win * taps[dy * 3 + dx]
                acc = term if acc is None else acc + term
        d = jnp.maximum(acc + b2, 0.0)                        # (RB, W, hid)
        y = jnp.dot(d.reshape(RB * W, hid), w3,
                    preferred_element_type=jnp.float32) + b3
        if add_res:
            res = x_ref[0, pl.ds(r0, RB), :, :].reshape(RB * W, oup)
            y = y + res.astype(jnp.float32)
        o_ref[0, pl.ds(r0, RB), :, :] = y.reshape(RB, W, oup).astype(o_ref.dtype)
        return carry

    n_dw = H // RB
    lax.fori_loop(0, n_dw, dw_body, 0, unroll=n_dw <= 2)


# ----------------------------------------------------------------------------
# Fused branch kernel, stride 2
# scr[y, p, k, c] == zero-padded hidden activation at padded column x = 2k + p,
# so every 3x3 tap at output stride 2 is a contiguous slice of the scratch.
# The input packs column pairs on the lane axis: x_ref[0, y, m, 0:Cin] is input
# column 2m, x_ref[0, y, m, Cin:2Cin] is column 2m+1 (free wrapper reshape);
# the two zero-padded expand weights pick one parity each, so no in-kernel
# lane slicing or strided loads are needed.
# ----------------------------------------------------------------------------
def _fused_s2_kernel(x_ref, w1e_ref, w1o_ref, b1_ref, w9_ref, b2_ref, w3_ref,
                     b3_ref, o_ref, scr_ref, *, H, W, RE, RB):
    Cin2 = x_ref.shape[-1]                    # = 2 * Cin
    hid = w1e_ref.shape[-1]
    oup = w3_ref.shape[-1]
    Wh = W // 2
    Ho, Wo = H // 2, W // 2

    # --- zero only the halo (top/bottom rows + left/right padded columns) ----
    scr_ref[0:1, :, :, :] = jnp.zeros((1, 2, Wh + 1, hid), jnp.float32)
    scr_ref[H + 1:H + 2, :, :, :] = jnp.zeros((1, 2, Wh + 1, hid), jnp.float32)
    scr_ref[:, 0, 0:1, :] = jnp.zeros((H + 2, 1, hid), jnp.float32)        # padded col 0
    scr_ref[:, 1, Wh:Wh + 1, :] = jnp.zeros((H + 2, 1, hid), jnp.float32)  # padded col W+1

    # --- hoist loop-invariant weight / bias loads ----------------------------
    w1e = w1e_ref[...]
    w1o = w1o_ref[...]
    b1 = b1_ref[...]
    w3 = w3_ref[...]
    b2 = b2_ref[...]
    b3 = b3_ref[...]
    w9 = w9_ref[...]
    taps = [w9[t] for t in range(9)]

    # --- expand 1x1 + ReLU, written parity-split into the padded scratch -----
    def expand_body(c, carry):
        r0 = pl.multiple_of(c * RE, RE)
        xc = x_ref[0, pl.ds(r0, RE), :, :].reshape(RE * Wh, Cin2)
        te = jnp.maximum(
            jnp.dot(xc, w1e, preferred_element_type=jnp.float32) + b1, 0.0)
        to = jnp.maximum(
            jnp.dot(xc, w1o, preferred_element_type=jnp.float32) + b1, 0.0)
        # even input col 2m   -> padded col 2m+1 -> parity 1, k = m
        scr_ref[pl.ds(r0 + 1, RE), 1, 0:Wh, :] = te.reshape(RE, Wh, hid)
        # odd  input col 2m+1 -> padded col 2m+2 -> parity 0, k = m+1
        scr_ref[pl.ds(r0 + 1, RE), 0, 1:Wh + 1, :] = to.reshape(RE, Wh, hid)
        return carry

    n_exp = H // RE
    lax.fori_loop(0, n_exp, expand_body, 0, unroll=n_exp <= 2)

    # --- depthwise 3x3 stride 2 + ReLU, projection with M = RB*Wo rows -------
    def dw_body(c, carry):
        yo0 = pl.multiple_of(c * RB, RB)
        rows = []
        for i in range(RB):                   # static unroll inside a chunk
            acc = None
            for dy in range(3):
                r = 2 * (yo0 + i) + dy
                for dx in range(3):
                    par = dx % 2              # dx=0 -> par0,k0=0; dx=1 -> par1,k0=0; dx=2 -> par0,k0=1
                    k0 = dx // 2
                    win = scr_ref[r, par, k0:k0 + Wo, :]
                    term = win * taps[dy * 3 + dx]
                    acc = term if acc is None else acc + term
            rows.append(jnp.maximum(acc + b2, 0.0))           # (Wo, hid)
        d = jnp.concatenate(rows, axis=0)                      # (RB*Wo, hid)
        y = jnp.dot(d, w3, preferred_element_type=jnp.float32) + b3
        o_ref[0, pl.ds(yo0, RB), :, :] = y.reshape(RB, Wo, oup).astype(o_ref.dtype)
        return carry

    n_dw = Ho // RB
    lax.fori_loop(0, n_dw, dw_body, 0, unroll=n_dw <= 2)


# ----------------------------------------------------------------------------
# Pallas wrappers
# ----------------------------------------------------------------------------
def _vmem_limit(scratch_bytes, io_bytes, w_bytes):
    est = scratch_bytes + 2 * io_bytes + w_bytes
    if est < 24 * 2 ** 20:
        return None                     # default scoped limit (32 MiB) is plenty
    # TODO(synk): for very large H*W*hid on v7x (64 MiB VMEM) add a row-block
    # grid axis instead of only raising the limit.
    return min(128 * 2 ** 20, int(est * 1.5))


def fused_branch(x_nhwc, p, *, stride, add_residual):
    """One InvertedResidual conv branch as a single pallas_call (NHWC)."""
    B, H, W, Cin = x_nhwc.shape
    hid = p["w1"].shape[1]
    oup = p["w3"].shape[1]
    assert stride in (1, 2)
    if add_residual:
        assert Cin == oup, "residual add requires matching channel counts"

    z2 = lambda b: (0, 0)
    itemsize = x_nhwc.dtype.itemsize

    if stride == 1:
        RB = _row_block(H)
        RE = _expand_rows(H, W)
        kernel = functools.partial(_fused_s1_kernel, H=H, W=W, RE=RE, RB=RB,
                                   add_res=add_residual)
        in_specs = [
            pl.BlockSpec((1, H, W, Cin), lambda b: (b, 0, 0, 0)),
            pl.BlockSpec((Cin, hid), z2),
            pl.BlockSpec((1, hid), z2),
            pl.BlockSpec((9, hid), z2),
            pl.BlockSpec((1, hid), z2),
            pl.BlockSpec((hid, oup), z2),
            pl.BlockSpec((1, oup), z2),
        ]
        scratch_bytes = (H + 2) * (W + 2) * hid * 4
        io_bytes = H * W * (Cin + oup) * itemsize
        w_bytes = 4 * (Cin * hid + 9 * hid + hid * oup + 2 * hid + oup)
        return pl.pallas_call(
            kernel,
            out_shape=jax.ShapeDtypeStruct((B, H, W, oup), x_nhwc.dtype),
            grid=(B,),
            in_specs=in_specs,
            out_specs=pl.BlockSpec((1, H, W, oup), lambda b: (b, 0, 0, 0)),
            scratch_shapes=[pltpu.VMEM((H + 2, W + 2, hid), jnp.float32)],
            compiler_params=pltpu.CompilerParams(
                dimension_semantics=("parallel",),
                vmem_limit_bytes=_vmem_limit(scratch_bytes, io_bytes, w_bytes)),
        )(x_nhwc, p["w1"], p["b1"], p["w9"], p["b2"], p["w3"], p["b3"])

    # ---- stride == 2 --------------------------------------------------------
    assert H % 2 == 0 and W % 2 == 0 and not add_residual
    Ho, Wo = H // 2, W // 2
    Wh = W // 2
    # Free, contiguous reshape (no extra HBM pass): pack column pairs on lanes.
    x_pairs = x_nhwc.reshape(B, H, Wh, 2 * Cin)
    zero = jnp.zeros_like(p["w1"])
    w1e = jnp.concatenate([p["w1"], zero], axis=0)   # picks even input columns
    w1o = jnp.concatenate([zero, p["w1"]], axis=0)   # picks odd input columns

    RB = _row_block(Ho)
    RE = _expand_rows(H, Wh)
    kernel = functools.partial(_fused_s2_kernel, H=H, W=W, RE=RE, RB=RB)
    in_specs = [
        pl.BlockSpec((1, H, Wh, 2 * Cin), lambda b: (b, 0, 0, 0)),
        pl.BlockSpec((2 * Cin, hid), z2),
        pl.BlockSpec((2 * Cin, hid), z2),
        pl.BlockSpec((1, hid), z2),
        pl.BlockSpec((9, hid), z2),
        pl.BlockSpec((1, hid), z2),
        pl.BlockSpec((hid, oup), z2),
        pl.BlockSpec((1, oup), z2),
    ]
    scratch_bytes = (H + 2) * 2 * (Wh + 1) * hid * 4
    io_bytes = (H * W * Cin + Ho * Wo * oup) * itemsize
    w_bytes = 4 * (4 * Cin * hid + 9 * hid + hid * oup + 2 * hid + oup)
    return pl.pallas_call(
        kernel,
        out_shape=jax.ShapeDtypeStruct((B, Ho, Wo, oup), x_nhwc.dtype),
        grid=(B,),
        in_specs=in_specs,
        out_specs=pl.BlockSpec((1, Ho, Wo, oup), lambda b: (b, 0, 0, 0)),
        scratch_shapes=[pltpu.VMEM((H + 2, 2, Wh + 1, hid), jnp.float32)],
        compiler_params=pltpu.CompilerParams(
            dimension_semantics=("parallel",),
            vmem_limit_bytes=_vmem_limit(scratch_bytes, io_bytes, w_bytes)),
    )(x_pairs, w1e, w1o, p["b1"], p["w9"], p["b2"], p["w3"], p["b3"])


# ----------------------------------------------------------------------------
# InvertedResidual forward (kernel-side params: BN scales folded into weights)
# ----------------------------------------------------------------------------
def inverted_residual_forward(x_nchw, kparams, stride, n):
    x = jnp.transpose(x_nchw, (0, 2, 3, 1))          # NCHW -> NHWC
    x = fused_branch(x, kparams["conv1"], stride=stride, add_residual=False)
    for _ in range(n):
        x = fused_branch(x, kparams["conv2"], stride=1, add_residual=True)
    return jnp.transpose(x, (0, 3, 1, 2))             # NHWC -> NCHW


# ----------------------------------------------------------------------------
# Parameter construction (inference BN) + one-time fold into conv weights
# ----------------------------------------------------------------------------
def _fold_bn(gamma, beta, mean, var, conv_bias=None, eps=1e-5):
    scale = gamma / jnp.sqrt(var + eps)
    bias = beta - mean * scale
    if conv_bias is not None:
        bias = bias + scale * conv_bias
    return scale.astype(jnp.float32), bias.astype(jnp.float32)


def _bn_raw(key, c):
    k1, k2, k3, k4 = jax.random.split(key, 4)
    gamma = jax.random.uniform(k1, (c,), minval=0.5, maxval=1.5)
    beta = jax.random.normal(k2, (c,)) * 0.1
    mean = jax.random.normal(k3, (c,)) * 0.1
    var = jax.random.uniform(k4, (c,), minval=0.5, maxval=1.5)
    return gamma, beta, mean, var


def make_branch_params(key, cin, hidden, oup, dw_has_bias):
    ks = jax.random.split(key, 7)
    w1 = (jax.random.normal(ks[0], (cin, hidden)) / math.sqrt(cin)).astype(jnp.float32)
    s1, b1 = _fold_bn(*_bn_raw(ks[1], hidden))
    w9 = (jax.random.normal(ks[2], (9, hidden)) * 0.2).astype(jnp.float32)
    dwb = (jax.random.normal(ks[3], (hidden,)) * 0.1).astype(jnp.float32) if dw_has_bias else None
    s2, b2 = _fold_bn(*_bn_raw(ks[4], hidden), conv_bias=dwb)
    w3 = (jax.random.normal(ks[5], (hidden, oup)) / math.sqrt(hidden)).astype(jnp.float32)
    s3, b3 = _fold_bn(*_bn_raw(ks[6], oup))
    return dict(w1=w1, s1=s1, b1=b1, w9=w9, s2=s2, b2=b2, w3=w3, s3=s3, b3=b3)


def fold_branch_params(p):
    """Fold BN scales into the conv weights (one-time weight transform)."""
    return dict(
        w1=(p["w1"] * p["s1"][None, :]).astype(jnp.float32),
        b1=p["b1"].reshape(1, -1).astype(jnp.float32),
        w9=(p["w9"] * p["s2"][None, :]).astype(jnp.float32),
        b2=p["b2"].reshape(1, -1).astype(jnp.float32),
        w3=(p["w3"] * p["s3"][None, :]).astype(jnp.float32),
        b3=p["b3"].reshape(1, -1).astype(jnp.float32),
    )


# ----------------------------------------------------------------------------
# Pure-JAX reference (lax convs, unfolded params) for the correctness check
# ----------------------------------------------------------------------------
def _ref_branch(x, p, stride):
    t = jnp.einsum("bhwc,cd->bhwd", x, p["w1"]) * p["s1"] + p["b1"]
    t = jnp.maximum(t, 0.0)
    dw = p["w9"].reshape(3, 3, 1, -1)
    t = jax.lax.conv_general_dilated(
        t, dw, (stride, stride), ((1, 1), (1, 1)),
        dimension_numbers=("NHWC", "HWIO", "NHWC"),
        feature_group_count=t.shape[-1])
    t = jnp.maximum(t * p["s2"] + p["b2"], 0.0)
    return jnp.einsum("bhwc,cd->bhwd", t, p["w3"]) * p["s3"] + p["b3"]


def ref_forward(x_nchw, params, stride, n):
    x = jnp.transpose(x_nchw, (0, 2, 3, 1))
    x = _ref_branch(x, params["conv1"], stride)
    for _ in range(n):
        x = x + _ref_branch(x, params["conv2"], 1)
    return jnp.transpose(x, (0, 3, 1, 2))


# ----------------------------------------------------------------------------
if __name__ == "__main__":
    # Module config: InvertedResidual(inp=8, oup=16, stride=2, expand_ratio=4, n=2)
    inp, oup, stride, expand_ratio, n = 8, 16, 2, 4, 2
    hidden = round(inp * expand_ratio)

    key = jax.random.PRNGKey(0)
    kx, k1, k2 = jax.random.split(key, 3)

    x = jax.random.normal(kx, (2, inp, 16, 16), dtype=jnp.float32)  # NCHW
    raw_params = {
        "conv1": make_branch_params(k1, inp, hidden, oup, dw_has_bias=True),
        "conv2": make_branch_params(k2, oup, hidden, oup, dw_has_bias=False),
    }
    kparams = {name: fold_branch_params(p) for name, p in raw_params.items()}

    fwd = jax.jit(functools.partial(inverted_residual_forward, stride=stride, n=n))
    out = jax.block_until_ready(fwd(x, kparams))

    ref = jax.block_until_ready(ref_forward(x, raw_params, stride, n))
    assert out.shape == (2, oup, 8, 8), out.shape
    err = float(jnp.max(jnp.abs(out - ref)))
    assert jnp.allclose(out, ref, atol=1e-3, rtol=1e-3), err

    print("KERNEL_OK")
</pallas_src>

<mosaic_0001>
module attributes {stable_mosaic.version = 11 : i64} {
  func.func @_fused_s1_kernel(%arg0: i32, %arg1: memref<1x8x8x16xf32, #tpu.memory_space<vmem>>, %arg2: memref<16x32xf32, #tpu.memory_space<vmem>>, %arg3: memref<1x32xf32, #tpu.memory_space<vmem>>, %arg4: memref<9x32xf32, #tpu.memory_space<vmem>>, %arg5: memref<1x32xf32, #tpu.memory_space<vmem>>, %arg6: memref<32x16xf32, #tpu.memory_space<vmem>>, %arg7: memref<1x16xf32, #tpu.memory_space<vmem>>, %arg8: memref<1x8x8x16xf32, #tpu.memory_space<vmem>>, %arg9: memref<10x10x32xf32, #tpu.memory_space<vmem>>) attributes {dimension_semantics = [#tpu.dimension_semantics<parallel>], iteration_bounds = array<i64: 2>, scalar_prefetch = 0 : i64, scratch_operands = 1 : i64, tpu.core_type = #tpu.core_type<tc>, window_params = [{transform_indices = @transform_0, window_bounds = array<i64: 1, 8, 8, 16>}, {pipeline_mode = #tpu.pipeline_mode<synchronous>, transform_indices = @transform_1, window_bounds = array<i64: 16, 32>}, {pipeline_mode = #tpu.pipeline_mode<synchronous>, transform_indices = @transform_2, window_bounds = array<i64: 1, 32>}, {pipeline_mode = #tpu.pipeline_mode<synchronous>, transform_indices = @transform_3, window_bounds = array<i64: 9, 32>}, {pipeline_mode = #tpu.pipeline_mode<synchronous>, transform_indices = @transform_4, window_bounds = array<i64: 1, 32>}, {pipeline_mode = #tpu.pipeline_mode<synchronous>, transform_indices = @transform_5, window_bounds = array<i64: 32, 16>}, {pipeline_mode = #tpu.pipeline_mode<synchronous>, transform_indices = @transform_6, window_bounds = array<i64: 1, 16>}, {transform_indices = @transform_7, window_bounds = array<i64: 1, 8, 8, 16>}]} {
    %cst = arith.constant 0.000000e+00 : f32
    %0 = vector.broadcast %cst : f32 to vector<1x10x32xf32>
    %c0 = arith.constant 0 : index
    %c0_0 = arith.constant 0 : index
    %c0_1 = arith.constant 0 : index
    %1 = vector.load %arg9[%c0, %c0_0, %c0_1] : memref<10x10x32xf32, #tpu.memory_space<vmem>>, vector<1x10x32xf32>
    tpu.vector_store %arg9[%c0, %c0_0, %c0_1], %0 {strides = array<i32>} : memref<10x10x32xf32, #tpu.memory_space<vmem>>, vector<1x10x32xf32>,
    %cst_2 = arith.constant 0.000000e+00 : f32
    %2 = vector.broadcast %cst_2 : f32 to vector<1x10x32xf32>
    %c9 = arith.constant 9 : index
    %c0_3 = arith.constant 0 : index
    %c0_4 = arith.constant 0 : index
    %3 = vector.load %arg9[%c9, %c0_3, %c0_4] : memref<10x10x32xf32, #tpu.memory_space<vmem>>, vector<1x10x32xf32>
    tpu.vector_store %arg9[%c9, %c0_3, %c0_4], %2 {strides = array<i32>} : memref<10x10x32xf32, #tpu.memory_space<vmem>>, vector<1x10x32xf32>,
    %cst_5 = arith.constant 0.000000e+00 : f32
    %4 = vector.broadcast %cst_5 : f32 to vector<10x1x32xf32>
    %c0_6 = arith.constant 0 : index
    %c0_7 = arith.constant 0 : index
    %c0_8 = arith.constant 0 : index
    %5 = vector.load %arg9[%c0_6, %c0_7, %c0_8] : memref<10x10x32xf32, #tpu.memory_space<vmem>>, vector<10x1x32xf32>
    tpu.vector_store %arg9[%c0_6, %c0_7, %c0_8], %4 {strides = array<i32>} : memref<10x10x32xf32, #tpu.memory_space<vmem>>, vector<10x1x32xf32>,
    %cst_9 = arith.constant 0.000000e+00 : f32
    %6 = vector.broadcast %cst_9 : f32 to vector<10x1x32xf32>
    %c0_10 = arith.constant 0 : index
    %c9_11 = arith.constant 9 : index
    %c0_12 = arith.constant 0 : index
    %7 = vector.load %arg9[%c0_10, %c9_11, %c0_12] : memref<10x10x32xf32, #tpu.memory_space<vmem>>, vector<10x1x32xf32>
    tpu.vector_store %arg9[%c0_10, %c9_11, %c0_12], %6 {strides = array<i32>} : memref<10x10x32xf32, #tpu.memory_space<vmem>>, vector<10x1x32xf32>,
    %c0_13 = arith.constant 0 : index
    %c0_14 = arith.constant 0 : index
    %8 = vector.load %arg2[%c0_13, %c0_14] : memref<16x32xf32, #tpu.memory_space<vmem>>, vector<16x32xf32>
    %c0_15 = arith.constant 0 : index
    %c0_16 = arith.constant 0 : index
    %9 = vector.load %arg3[%c0_15, %c0_16] : memref<1x32xf32, #tpu.memory_space<vmem>>, vector<1x32xf32>
    %c0_17 = arith.constant 0 : index
    %c0_18 = arith.constant 0 : index
    %10 = vector.load %arg6[%c0_17, %c0_18] : memref<32x16xf32, #tpu.memory_space<vmem>>, vector<32x16xf32>
    %c0_19 = arith.constant 0 : index
    %c0_20 = arith.constant 0 : index
    %11 = vector.load %arg5[%c0_19, %c0_20] : memref<1x32xf32, #tpu.memory_space<vmem>>, vector<1x32xf32>
    %c0_21 = arith.constant 0 : index
    %c0_22 = arith.constant 0 : index
    %12 = vector.load %arg7[%c0_21, %c0_22] : memref<1x16xf32, #tpu.memory_space<vmem>>, vector<1x16xf32>
    %c0_23 = arith.constant 0 : index
    %c0_24 = arith.constant 0 : index
    %13 = vector.load %arg4[%c0_23, %c0_24] : memref<9x32xf32, #tpu.memory_space<vmem>>, vector<9x32xf32>
    %14 = vector.extract_strided_slice %13 {offsets = [0, 0], sizes = [1, 32], strides = [1, 1]} : vector<9x32xf32> to vector<1x32xf32>
    %15 = vector.shape_cast %14 : vector<1x32xf32> to vector<32xf32>
    %16 = vector.extract_strided_slice %13 {offsets = [1, 0], sizes = [1, 32], strides = [1, 1]} : vector<9x32xf32> to vector<1x32xf32>
    %17 = vector.shape_cast %16 : vector<1x32xf32> to vector<32xf32>
    %18 = vector.extract_strided_slice %13 {offsets = [2, 0], sizes = [1, 32], strides = [1, 1]} : vector<9x32xf32> to vector<1x32xf32>
    %19 = vector.shape_cast %18 : vector<1x32xf32> to vector<32xf32>
    %20 = vector.extract_strided_slice %13 {offsets = [3, 0], sizes = [1, 32], strides = [1, 1]} : vector<9x32xf32> to vector<1x32xf32>
    %21 = vector.shape_cast %20 : vector<1x32xf32> to vector<32xf32>
    %22 = vector.extract_strided_slice %13 {offsets = [4, 0], sizes = [1, 32], strides = [1, 1]} : vector<9x32xf32> to vector<1x32xf32>
    %23 = vector.shape_cast %22 : vector<1x32xf32> to vector<32xf32>
    %24 = vector.extract_strided_slice %13 {offsets = [5, 0], sizes = [1, 32], strides = [1, 1]} : vector<9x32xf32> to vector<1x32xf32>
    %25 = vector.shape_cast %24 : vector<1x32xf32> to vector<32xf32>
    %26 = vector.extract_strided_slice %13 {offsets = [6, 0], sizes = [1, 32], strides = [1, 1]} : vector<9x32xf32> to vector<1x32xf32>
    %27 = vector.shape_cast %26 : vector<1x32xf32> to vector<32xf32>
    %28 = vector.extract_strided_slice %13 {offsets = [7, 0], sizes = [1, 32], strides = [1, 1]} : vector<9x32xf32> to vector<1x32xf32>
    %29 = vector.shape_cast %28 : vector<1x32xf32> to vector<32xf32>
    %30 = vector.extract_strided_slice %13 {offsets = [8, 0], sizes = [1, 32], strides = [1, 1]} : vector<9x32xf32> to vector<1x32xf32>
    %31 = vector.shape_cast %30 : vector<1x32xf32> to vector<32xf32>
    %c0_i32 = arith.constant 0 : i32
    %c8_i32 = arith.constant 8 : i32
    %32 = arith.muli %c0_i32, %c8_i32 : i32
    %33 = tpu.assume_multiple %32, 8 : i32
    %c0_25 = arith.constant 0 : index
    %34 = arith.index_cast %33 : i32 to index
    %c0_26 = arith.constant 0 : index
    %c0_27 = arith.constant 0 : index
    %35 = vector.load %arg1[%c0_25, %34, %c0_26, %c0_27] : memref<1x8x8x16xf32, #tpu.memory_space<vmem>>, vector<1x8x8x16xf32>
    %36 = vector.shape_cast %35 : vector<1x8x8x16xf32> to vector<8x8x16xf32>
    %37 = vector.shape_cast %36 : vector<8x8x16xf32> to vector<64x16xf32>
    %cst_28 = arith.constant dense<0.000000e+00> : vector<64x32xf32>
    %38 = tpu.matmul %37, %8, %cst_28 {dimension_numbers = #tpu.dot_dimension_numbers<[1], [0], [0], [1], [0, 0, 1, 1], [], []>} : vector<64x16xf32>, vector<16x32xf32>, vector<64x32xf32> -> vector<64x32xf32>
    %39 = vector.broadcast %9 : vector<1x32xf32> to vector<64x32xf32>
    %40 = arith.addf %38, %39 : vector<64x32xf32>
    %cst_29 = arith.constant 0.000000e+00 : f32
    %41 = vector.broadcast %cst_29 : f32 to vector<64x32xf32>
    %42 = arith.maximumf %40, %41 : vector<64x32xf32>
    %43 = vector.shape_cast %42 : vector<64x32xf32> to vector<8x8x32xf32>
    %c1_i32 = arith.constant 1 : i32
    %44 = arith.addi %33, %c1_i32 : i32
    %45 = arith.index_cast %44 : i32 to index
    %c1 = arith.constant 1 : index
    %c0_30 = arith.constant 0 : index
    %46 = vector.load %arg9[%45, %c1, %c0_30] : memref<10x10x32xf32, #tpu.memory_space<vmem>>, vector<8x8x32xf32>
    tpu.vector_store %arg9[%45, %c1, %c0_30], %43 {strides = array<i32>} : memref<10x10x32xf32, #tpu.memory_space<vmem>>, vector<8x8x32xf32>,
    %c1_i32_31 = arith.constant 1 : i32
    %c0_i32_32 = arith.constant 0 : i32
    %c8_i32_33 = arith.constant 8 : i32
    %47 = arith.muli %c0_i32_32, %c8_i32_33 : i32
    %48 = tpu.assume_multiple %47, 8 : i32
    %c0_i32_34 = arith.constant 0 : i32
    %49 = arith.addi %48, %c0_i32_34 : i32
    %50 = arith.index_cast %49 : i32 to index
    %c0_35 = arith.constant 0 : index
    %c0_36 = arith.constant 0 : index
    %51 = vector.load %arg9[%50, %c0_35, %c0_36] : memref<10x10x32xf32, #tpu.memory_space<vmem>>, vector<8x8x32xf32>
    %52 = vector.shape_cast %15 : vector<32xf32> to vector<1x1x32xf32>
    %53 = vector.broadcast %52 : vector<1x1x32xf32> to vector<8x8x32xf32>
    %54 = arith.mulf %51, %53 : vector<8x8x32xf32>
    %c0_i32_37 = arith.constant 0 : i32
    %55 = arith.addi %48, %c0_i32_37 : i32
    %56 = arith.index_cast %55 : i32 to index
    %c1_38 = arith.constant 1 : index
    %c0_39 = arith.constant 0 : index
    %57 = vector.load %arg9[%56, %c1_38, %c0_39] : memref<10x10x32xf32, #tpu.memory_space<vmem>>, vector<8x8x32xf32>
    %58 = vector.shape_cast %17 : vector<32xf32> to vector<1x1x32xf32>
    %59 = vector.broadcast %58 : vector<1x1x32xf32> to vector<8x8x32xf32>
    %60 = arith.mulf %57, %59 : vector<8x8x32xf32>
    %61 = arith.addf %54, %60 : vector<8x8x32xf32>
    %c0_i32_40 = arith.constant 0 : i32
    %62 = arith.addi %48, %c0_i32_40 : i32
    %63 = arith.index_cast %62 : i32 to index
    %c2 = arith.constant 2 : index
    %c0_41 = arith.constant 0 : index
    %64 = vector.load %arg9[%63, %c2, %c0_41] : memref<10x10x32xf32, #tpu.memory_space<vmem>>, vector<8x8x32xf32>
    %65 = vector.shape_cast %19 : vector<32xf32> to vector<1x1x32xf32>
    %66 = vector.broadcast %65 : vector<1x1x32xf32> to vector<8x8x32xf32>
    %67 = arith.mulf %64, %66 : vector<8x8x32xf32>
    %68 = arith.addf %61, %67 : vector<8x8x32xf32>
    %c1_i32_42 = arith.constant 1 : i32
    %69 = arith.addi %48, %c1_i32_42 : i32
    %70 = arith.index_cast %69 : i32 to index
    %c0_43 = arith.constant 0 : index
    %c0_44 = arith.constant 0 : index
    %71 = vector.load %arg9[%70, %c0_43, %c0_44] : memref<10x10x32xf32, #tpu.memory_space<vmem>>, vector<8x8x32xf32>
    %72 = vector.shape_cast %21 : vector<32xf32> to vector<1x1x32xf32>
    %73 = vector.broadcast %72 : vector<1x1x32xf32> to vector<8x8x32xf32>
    %74 = arith.mulf %71, %73 : vector<8x8x32xf32>
    %75 = arith.addf %68, %74 : vector<8x8x32xf32>
    %c1_i32_45 = arith.constant 1 : i32
    %76 = arith.addi %48, %c1_i32_45 : i32
    %77 = arith.index_cast %76 : i32 to index
    %c1_46 = arith.constant 1 : index
    %c0_47 = arith.constant 0 : index
    %78 = vector.load %arg9[%77, %c1_46, %c0_47] : memref<10x10x32xf32, #tpu.memory_space<vmem>>, vector<8x8x32xf32>
    %79 = vector.shape_cast %23 : vector<32xf32> to vector<1x1x32xf32>
    %80 = vector.broadcast %79 : vector<1x1x32xf32> to vector<8x8x32xf32>
    %81 = arith.mulf %78, %80 : vector<8x8x32xf32>
    %82 = arith.addf %75, %81 : vector<8x8x32xf32>
    %c1_i32_48 = arith.constant 1 : i32
    %83 = arith.addi %48, %c1_i32_48 : i32
    %84 = arith.index_cast %83 : i32 to index
    %c2_49 = arith.constant 2 : index
    %c0_50 = arith.constant 0 : index
    %85 = vector.load %arg9[%84, %c2_49, %c0_50] : memref<10x10x32xf32, #tpu.memory_space<vmem>>, vector<8x8x32xf32>
    %86 = vector.shape_cast %25 : vector<32xf32> to vector<1x1x32xf32>
    %87 = vector.broadcast %86 : vector<1x1x32xf32> to vector<8x8x32xf32>
    %88 = arith.mulf %85, %87 : vector<8x8x32xf32>
    %89 = arith.addf %82, %88 : vector<8x8x32xf32>
    %c2_i32 = arith.constant 2 : i32
    %90 = arith.addi %48, %c2_i32 : i32
    %91 = arith.index_cast %90 : i32 to index
    %c0_51 = arith.constant 0 : index
    %c0_52 = arith.constant 0 : index
    %92 = vector.load %arg9[%91, %c0_51, %c0_52] : memref<10x10x32xf32, #tpu.memory_space<vmem>>, vector<8x8x32xf32>
    %93 = vector.shape_cast %27 : vector<32xf32> to vector<1x1x32xf32>
    %94 = vector.broadcast %93 : vector<1x1x32xf32> to vector<8x8x32xf32>
    %95 = arith.mulf %92, %94 : vector<8x8x32xf32>
    %96 = arith.addf %89, %95 : vector<8x8x32xf32>
    %c2_i32_53 = arith.constant 2 : i32
    %97 = arith.addi %48, %c2_i32_53 : i32
    %98 = arith.index_cast %97 : i32 to index
    %c1_54 = arith.constant 1 : index
    %c0_55 = arith.constant 0 : index
    %99 = vector.load %arg9[%98, %c1_54, %c0_55] : memref<10x10x32xf32, #tpu.memory_space<vmem>>, vector<8x8x32xf32>
    %100 = vector.shape_cast %29 : vector<32xf32> to vector<1x1x32xf32>
    %101 = vector.broadcast %100 : vector<1x1x32xf32> to vector<8x8x32xf32>
    %102 = arith.mulf %99, %101 : vector<8x8x32xf32>
    %103 = arith.addf %96, %102 : vector<8x8x32xf32>
    %c2_i32_56 = arith.constant 2 : i32
    %104 = arith.addi %48, %c2_i32_56 : i32
    %105 = arith.index_cast %104 : i32 to index
    %c2_57 = arith.constant 2 : index
    %c0_58 = arith.constant 0 : index
    %106 = vector.load %arg9[%105, %c2_57, %c0_58] : memref<10x10x32xf32, #tpu.memory_space<vmem>>, vector<8x8x32xf32>
    %107 = vector.shape_cast %31 : vector<32xf32> to vector<1x1x32xf32>
    %108 = vector.broadcast %107 : vector<1x1x32xf32> to vector<8x8x32xf32>
    %109 = arith.mulf %106, %108 : vector<8x8x32xf32>
    %110 = arith.addf %103, %109 : vector<8x8x32xf32>
    %111 = vector.shape_cast %11 : vector<1x32xf32> to vector<1x1x32xf32>
    %112 = vector.broadcast %111 : vector<1x1x32xf32> to vector<8x8x32xf32>
    %113 = arith.addf %110, %112 : vector<8x8x32xf32>
    %cst_59 = arith.constant 0.000000e+00 : f32
    %114 = vector.broadcast %cst_59 : f32 to vector<8x8x32xf32>
    %115 = arith.maximumf %113, %114 : vector<8x8x32xf32>
    %116 = vector.shape_cast %115 : vector<8x8x32xf32> to vector<64x32xf32>
    %cst_60 = arith.constant dense<0.000000e+00> : vector<64x16xf32>
    %117 = tpu.matmul %116, %10, %cst_60 {dimension_numbers = #tpu.dot_dimension_numbers<[1], [0], [0], [1], [0, 0, 1, 1], [], []>} : vector<64x32xf32>, vector<32x16xf32>, vector<64x16xf32> -> vector<64x16xf32>
    %118 = vector.broadcast %12 : vector<1x16xf32> to vector<64x16xf32>
    %119 = arith.addf %117, %118 : vector<64x16xf32>
    %c0_61 = arith.constant 0 : index
    %120 = arith.index_cast %48 : i32 to index
    %c0_62 = arith.constant 0 : index
    %c0_63 = arith.constant 0 : index
    %121 = vector.load %arg1[%c0_61, %120, %c0_62, %c0_63] : memref<1x8x8x16xf32, #tpu.memory_space<vmem>>, vector<1x8x8x16xf32>
    %122 = vector.shape_cast %121 : vector<1x8x8x16xf32> to vector<8x8x16xf32>
    %123 = vector.shape_cast %122 : vector<8x8x16xf32> to vector<64x16xf32>
    %124 = arith.addf %119, %123 : vector<64x16xf32>
    %125 = vector.shape_cast %124 : vector<64x16xf32> to vector<8x8x16xf32>
    %c0_64 = arith.constant 0 : index
    %126 = arith.index_cast %48 : i32 to index
    %c0_65 = arith.constant 0 : index
    %c0_66 = arith.constant 0 : index
    %127 = vector.load %arg8[%c0_64, %126, %c0_65, %c0_66] : memref<1x8x8x16xf32, #tpu.memory_space<vmem>>, vector<1x8x8x16xf32>
    %128 = vector.shape_cast %127 : vector<1x8x8x16xf32> to vector<8x8x16xf32>
    %129 = vector.shape_cast %125 : vector<8x8x16xf32> to vector<1x8x8x16xf32>
    tpu.vector_store %arg8[%c0_64, %126, %c0_65, %c0_66], %129 {strides = array<i32>} : memref<1x8x8x16xf32, #tpu.memory_space<vmem>>, vector<1x8x8x16xf32>,
    %c1_i32_67 = arith.constant 1 : i32
    return
  }
  func.func @transform_0(%arg0: i32) -> (i32, i32, i32, i32) {
    %c0_i32 = arith.constant 0 : i32
    %c0_i32_0 = arith.constant 0 : i32
    %c0_i32_1 = arith.constant 0 : i32
    %c0_i32_2 = arith.constant 0 : i32
    return %arg0, %c0_i32, %c0_i32_0, %c0_i32_1 : i32, i32, i32, i32
  }
  func.func @transform_1(%arg0: i32) -> (i32, i32) {
    %c0_i32 = arith.constant 0 : i32
    %c0_i32_0 = arith.constant 0 : i32
    %c0_i32_1 = arith.constant 0 : i32
    return %c0_i32, %c0_i32_0 : i32, i32
  }
  func.func @transform_2(%arg0: i32) -> (i32, i32) {
    %c0_i32 = arith.constant 0 : i32
    %c0_i32_0 = arith.constant 0 : i32
    %c0_i32_1 = arith.constant 0 : i32
    return %c0_i32, %c0_i32_0 : i32, i32
  }
  func.func @transform_3(%arg0: i32) -> (i32, i32) {
    %c0_i32 = arith.constant 0 : i32
    %c0_i32_0 = arith.constant 0 : i32
    %c0_i32_1 = arith.constant 0 : i32
    return %c0_i32, %c0_i32_0 : i32, i32
  }
  func.func @transform_4(%arg0: i32) -> (i32, i32) {
    %c0_i32 = arith.constant 0 : i32
    %c0_i32_0 = arith.constant 0 : i32
    %c0_i32_1 = arith.constant 0 : i32
    return %c0_i32, %c0_i32_0 : i32, i32
  }
  func.func @transform_5(%arg0: i32) -> (i32, i32) {
    %c0_i32 = arith.constant 0 : i32
    %c0_i32_0 = arith.constant 0 : i32
    %c0_i32_1 = arith.constant 0 : i32
    return %c0_i32, %c0_i32_0 : i32, i32
  }
  func.func @transform_6(%arg0: i32) -> (i32, i32) {
    %c0_i32 = arith.constant 0 : i32
    %c0_i32_0 = arith.constant 0 : i32
    %c0_i32_1 = arith.constant 0 : i32
    return %c0_i32, %c0_i32_0 : i32, i32
  }
  func.func @transform_7(%arg0: i32) -> (i32, i32, i32, i32) {
    %c0_i32 = arith.constant 0 : i32
    %c0_i32_0 = arith.constant 0 : i32
    %c0_i32_1 = arith.constant 0 : i32
    %c0_i32_2 = arith.constant 0 : i32
    return %arg0, %c0_i32, %c0_i32_0, %c0_i32_1 : i32, i32, i32, i32
  }
}

module attributes {stable_mosaic.version = 11 : i64} {
  func.func @_fused_s1_kernel(%arg0: i32, %arg1: memref<1x8x8x16xf32, #tpu.memory_space<vmem>>, %arg2: memref<16x32xf32, #tpu.memory_space<vmem>>, %arg3: memref<1x32xf32, #tpu.memory_space<vmem>>, %arg4: memref<9x32xf32, #tpu.memory_space<vmem>>, %arg5: memref<1x32xf32, #tpu.memory_space<vmem>>, %arg6: memref<32x16xf32, #tpu.memory_space<vmem>>, %arg7: memref<1x16xf32, #tpu.memory_space<vmem>>, %arg8: memref<1x8x8x16xf32, #tpu.memory_space<vmem>>, %arg9: memref<10x10x32xf32, #tpu.memory_space<vmem>>) attributes {dimension_semantics = [#tpu.dimension_semantics<parallel>], iteration_bounds = array<i64: 2>, scalar_prefetch = 0 : i64, scratch_operands = 1 : i64, tpu.core_type = #tpu.core_type<tc>, window_params = [{transform_indices = @transform_0, window_bounds = array<i64: 1, 8, 8, 16>}, {pipeline_mode = #tpu.pipeline_mode<synchronous>, transform_indices = @transform_1, window_bounds = array<i64: 16, 32>}, {pipeline_mode = #tpu.pipeline_mode<synchronous>, transform_indices = @transform_2, window_bounds = array<i64: 1, 32>}, {pipeline_mode = #tpu.pipeline_mode<synchronous>, transform_indices = @transform_3, window_bounds = array<i64: 9, 32>}, {pipeline_mode = #tpu.pipeline_mode<synchronous>, transform_indices = @transform_4, window_bounds = array<i64: 1, 32>}, {pipeline_mode = #tpu.pipeline_mode<synchronous>, transform_indices = @transform_5, window_bounds = array<i64: 32, 16>}, {pipeline_mode = #tpu.pipeline_mode<synchronous>, transform_indices = @transform_6, window_bounds = array<i64: 1, 16>}, {transform_indices = @transform_7, window_bounds = array<i64: 1, 8, 8, 16>}]} {
    %cst = arith.constant 0.000000e+00 : f32
    %0 = vector.broadcast %cst : f32 to vector<1x10x32xf32>
    %c0 = arith.constant 0 : index
    %c0_0 = arith.constant 0 : index
    %c0_1 = arith.constant 0 : index
    %1 = vector.load %arg9[%c0, %c0_0, %c0_1] : memref<10x10x32xf32, #tpu.memory_space<vmem>>, vector<1x10x32xf32>
    tpu.vector_store %arg9[%c0, %c0_0, %c0_1], %0 {strides = array<i32>} : memref<10x10x32xf32, #tpu.memory_space<vmem>>, vector<1x10x32xf32>,
    %cst_2 = arith.constant 0.000000e+00 : f32
    %2 = vector.broadcast %cst_2 : f32 to vector<1x10x32xf32>
    %c9 = arith.constant 9 : index
    %c0_3 = arith.constant 0 : index
    %c0_4 = arith.constant 0 : index
    %3 = vector.load %arg9[%c9, %c0_3, %c0_4] : memref<10x10x32xf32, #tpu.memory_space<vmem>>, vector<1x10x32xf32>
    tpu.vector_store %arg9[%c9, %c0_3, %c0_4], %2 {strides = array<i32>} : memref<10x10x32xf32, #tpu.memory_space<vmem>>, vector<1x10x32xf32>,
    %cst_5 = arith.constant 0.000000e+00 : f32
    %4 = vector.broadcast %cst_5 : f32 to vector<10x1x32xf32>
    %c0_6 = arith.constant 0 : index
    %c0_7 = arith.constant 0 : index
    %c0_8 = arith.constant 0 : index
    %5 = vector.load %arg9[%c0_6, %c0_7, %c0_8] : memref<10x10x32xf32, #tpu.memory_space<vmem>>, vector<10x1x32xf32>
    tpu.vector_store %arg9[%c0_6, %c0_7, %c0_8], %4 {strides = array<i32>} : memref<10x10x32xf32, #tpu.memory_space<vmem>>, vector<10x1x32xf32>,
    %cst_9 = arith.constant 0.000000e+00 : f32
    %6 = vector.broadcast %cst_9 : f32 to vector<10x1x32xf32>
    %c0_10 = arith.constant 0 : index
    %c9_11 = arith.constant 9 : index
    %c0_12 = arith.constant 0 : index
    %7 = vector.load %arg9[%c0_10, %c9_11, %c0_12] : memref<10x10x32xf32, #tpu.memory_space<vmem>>, vector<10x1x32xf32>
    tpu.vector_store %arg9[%c0_10, %c9_11, %c0_12], %6 {strides = array<i32>} : memref<10x10x32xf32, #tpu.memory_space<vmem>>, vector<10x1x32xf32>,
    %c0_13 = arith.constant 0 : index
    %c0_14 = arith.constant 0 : index
    %8 = vector.load %arg2[%c0_13, %c0_14] : memref<16x32xf32, #tpu.memory_space<vmem>>, vector<16x32xf32>
    %c0_15 = arith.constant 0 : index
    %c0_16 = arith.constant 0 : index
    %9 = vector.load %arg3[%c0_15, %c0_16] : memref<1x32xf32, #tpu.memory_space<vmem>>, vector<1x32xf32>
    %c0_17 = arith.constant 0 : index
    %c0_18 = arith.constant 0 : index
    %10 = vector.load %arg6[%c0_17, %c0_18] : memref<32x16xf32, #tpu.memory_space<vmem>>, vector<32x16xf32>
    %c0_19 = arith.constant 0 : index
    %c0_20 = arith.constant 0 : index
    %11 = vector.load %arg5[%c0_19, %c0_20] : memref<1x32xf32, #tpu.memory_space<vmem>>, vector<1x32xf32>
    %c0_21 = arith.constant 0 : index
    %c0_22 = arith.constant 0 : index
    %12 = vector.load %arg7[%c0_21, %c0_22] : memref<1x16xf32, #tpu.memory_space<vmem>>, vector<1x16xf32>
    %c0_23 = arith.constant 0 : index
    %c0_24 = arith.constant 0 : index
    %13 = vector.load %arg4[%c0_23, %c0_24] : memref<9x32xf32, #tpu.memory_space<vmem>>, vector<9x32xf32>
    %14 = vector.extract_strided_slice %13 {offsets = [0, 0], sizes = [1, 32], strides = [1, 1]} : vector<9x32xf32> to vector<1x32xf32>
    %15 = vector.shape_cast %14 : vector<1x32xf32> to vector<32xf32>
    %16 = vector.extract_strided_slice %13 {offsets = [1, 0], sizes = [1, 32], strides = [1, 1]} : vector<9x32xf32> to vector<1x32xf32>
    %17 = vector.shape_cast %16 : vector<1x32xf32> to vector<32xf32>
    %18 = vector.extract_strided_slice %13 {offsets = [2, 0], sizes = [1, 32], strides = [1, 1]} : vector<9x32xf32> to vector<1x32xf32>
    %19 = vector.shape_cast %18 : vector<1x32xf32> to vector<32xf32>
    %20 = vector.extract_strided_slice %13 {offsets = [3, 0], sizes = [1, 32], strides = [1, 1]} : vector<9x32xf32> to vector<1x32xf32>
    %21 = vector.shape_cast %20 : vector<1x32xf32> to vector<32xf32>
    %22 = vector.extract_strided_slice %13 {offsets = [4, 0], sizes = [1, 32], strides = [1, 1]} : vector<9x32xf32> to vector<1x32xf32>
    %23 = vector.shape_cast %22 : vector<1x32xf32> to vector<32xf32>
    %24 = vector.extract_strided_slice %13 {offsets = [5, 0], sizes = [1, 32], strides = [1, 1]} : vector<9x32xf32> to vector<1x32xf32>
    %25 = vector.shape_cast %24 : vector<1x32xf32> to vector<32xf32>
    %26 = vector.extract_strided_slice %13 {offsets = [6, 0], sizes = [1, 32], strides = [1, 1]} : vector<9x32xf32> to vector<1x32xf32>
    %27 = vector.shape_cast %26 : vector<1x32xf32> to vector<32xf32>
    %28 = vector.extract_strided_slice %13 {offsets = [7, 0], sizes = [1, 32], strides = [1, 1]} : vector<9x32xf32> to vector<1x32xf32>
    %29 = vector.shape_cast %28 : vector<1x32xf32> to vector<32xf32>
    %30 = vector.extract_strided_slice %13 {offsets = [8, 0], sizes = [1, 32], strides = [1, 1]} : vector<9x32xf32> to vector<1x32xf32>
    %31 = vector.shape_cast %30 : vector<1x32xf32> to vector<32xf32>
    %c0_i32 = arith.constant 0 : i32
    %c8_i32 = arith.constant 8 : i32
    %32 = arith.muli %c0_i32, %c8_i32 : i32
    %33 = tpu.assume_multiple %32, 8 : i32
    %c0_25 = arith.constant 0 : index
    %34 = arith.index_cast %33 : i32 to index
    %c0_26 = arith.constant 0 : index
    %c0_27 = arith.constant 0 : index
    %35 = vector.load %arg1[%c0_25, %34, %c0_26, %c0_27] : memref<1x8x8x16xf32, #tpu.memory_space<vmem>>, vector<1x8x8x16xf32>
    %36 = vector.shape_cast %35 : vector<1x8x8x16xf32> to vector<8x8x16xf32>
    %37 = vector.shape_cast %36 : vector<8x8x16xf32> to vector<64x16xf32>
    %cst_28 = arith.constant dense<0.000000e+00> : vector<64x32xf32>
    %38 = tpu.matmul %37, %8, %cst_28 {dimension_numbers = #tpu.dot_dimension_numbers<[1], [0], [0], [1], [0, 0, 1, 1], [], []>} : vector<64x16xf32>, vector<16x32xf32>, vector<64x32xf32> -> vector<64x32xf32>
    %39 = vector.broadcast %9 : vector<1x32xf32> to vector<64x32xf32>
    %40 = arith.addf %38, %39 : vector<64x32xf32>
    %cst_29 = arith.constant 0.000000e+00 : f32
    %41 = vector.broadcast %cst_29 : f32 to vector<64x32xf32>
    %42 = arith.maximumf %40, %41 : vector<64x32xf32>
    %43 = vector.shape_cast %42 : vector<64x32xf32> to vector<8x8x32xf32>
    %c1_i32 = arith.constant 1 : i32
    %44 = arith.addi %33, %c1_i32 : i32
    %45 = arith.index_cast %44 : i32 to index
    %c1 = arith.constant 1 : index
    %c0_30 = arith.constant 0 : index
    %46 = vector.load %arg9[%45, %c1, %c0_30] : memref<10x10x32xf32, #tpu.memory_space<vmem>>, vector<8x8x32xf32>
    tpu.vector_store %arg9[%45, %c1, %c0_30], %43 {strides = array<i32>} : memref<10x10x32xf32, #tpu.memory_space<vmem>>, vector<8x8x32xf32>,
    %c1_i32_31 = arith.constant 1 : i32
    %c0_i32_32 = arith.constant 0 : i32
    %c8_i32_33 = arith.constant 8 : i32
    %47 = arith.muli %c0_i32_32, %c8_i32_33 : i32
    %48 = tpu.assume_multiple %47, 8 : i32
    %c0_i32_34 = arith.constant 0 : i32
    %49 = arith.addi %48, %c0_i32_34 : i32
    %50 = arith.index_cast %49 : i32 to index
    %c0_35 = arith.constant 0 : index
    %c0_36 = arith.constant 0 : index
    %51 = vector.load %arg9[%50, %c0_35, %c0_36] : memref<10x10x32xf32, #tpu.memory_space<vmem>>, vector<8x8x32xf32>
    %52 = vector.shape_cast %15 : vector<32xf32> to vector<1x1x32xf32>
    %53 = vector.broadcast %52 : vector<1x1x32xf32> to vector<8x8x32xf32>
    %54 = arith.mulf %51, %53 : vector<8x8x32xf32>
    %c0_i32_37 = arith.constant 0 : i32
    %55 = arith.addi %48, %c0_i32_37 : i32
    %56 = arith.index_cast %55 : i32 to index
    %c1_38 = arith.constant 1 : index
    %c0_39 = arith.constant 0 : index
    %57 = vector.load %arg9[%56, %c1_38, %c0_39] : memref<10x10x32xf32, #tpu.memory_space<vmem>>, vector<8x8x32xf32>
    %58 = vector.shape_cast %17 : vector<32xf32> to vector<1x1x32xf32>
    %59 = vector.broadcast %58 : vector<1x1x32xf32> to vector<8x8x32xf32>
    %60 = arith.mulf %57, %59 : vector<8x8x32xf32>
    %61 = arith.addf %54, %60 : vector<8x8x32xf32>
    %c0_i32_40 = arith.constant 0 : i32
    %62 = arith.addi %48, %c0_i32_40 : i32
    %63 = arith.index_cast %62 : i32 to index
    %c2 = arith.constant 2 : index
    %c0_41 = arith.constant 0 : index
    %64 = vector.load %arg9[%63, %c2, %c0_41] : memref<10x10x32xf32, #tpu.memory_space<vmem>>, vector<8x8x32xf32>
    %65 = vector.shape_cast %19 : vector<32xf32> to vector<1x1x32xf32>
    %66 = vector.broadcast %65 : vector<1x1x32xf32> to vector<8x8x32xf32>
    %67 = arith.mulf %64, %66 : vector<8x8x32xf32>
    %68 = arith.addf %61, %67 : vector<8x8x32xf32>
    %c1_i32_42 = arith.constant 1 : i32
    %69 = arith.addi %48, %c1_i32_42 : i32
    %70 = arith.index_cast %69 : i32 to index
    %c0_43 = arith.constant 0 : index
    %c0_44 = arith.constant 0 : index
    %71 = vector.load %arg9[%70, %c0_43, %c0_44] : memref<10x10x32xf32, #tpu.memory_space<vmem>>, vector<8x8x32xf32>
    %72 = vector.shape_cast %21 : vector<32xf32> to vector<1x1x32xf32>
    %73 = vector.broadcast %72 : vector<1x1x32xf32> to vector<8x8x32xf32>
    %74 = arith.mulf %71, %73 : vector<8x8x32xf32>
    %75 = arith.addf %68, %74 : vector<8x8x32xf32>
    %c1_i32_45 = arith.constant 1 : i32
    %76 = arith.addi %48, %c1_i32_45 : i32
    %77 = arith.index_cast %76 : i32 to index
    %c1_46 = arith.constant 1 : index
    %c0_47 = arith.constant 0 : index
    %78 = vector.load %arg9[%77, %c1_46, %c0_47] : memref<10x10x32xf32, #tpu.memory_space<vmem>>, vector<8x8x32xf32>
    %79 = vector.shape_cast %23 : vector<32xf32> to vector<1x1x32xf32>
    %80 = vector.broadcast %79 : vector<1x1x32xf32> to vector<8x8x32xf32>
    %81 = arith.mulf %78, %80 : vector<8x8x32xf32>
    %82 = arith.addf %75, %81 : vector<8x8x32xf32>
    %c1_i32_48 = arith.constant 1 : i32
    %83 = arith.addi %48, %c1_i32_48 : i32
    %84 = arith.index_cast %83 : i32 to index
    %c2_49 = arith.constant 2 : index
    %c0_50 = arith.constant 0 : index
    %85 = vector.load %arg9[%84, %c2_49, %c0_50] : memref<10x10x32xf32, #tpu.memory_space<vmem>>, vector<8x8x32xf32>
    %86 = vector.shape_cast %25 : vector<32xf32> to vector<1x1x32xf32>
    %87 = vector.broadcast %86 : vector<1x1x32xf32> to vector<8x8x32xf32>
    %88 = arith.mulf %85, %87 : vector<8x8x32xf32>
    %89 = arith.addf %82, %88 : vector<8x8x32xf32>
    %c2_i32 = arith.constant 2 : i32
    %90 = arith.addi %48, %c2_i32 : i32
    %91 = arith.index_cast %90 : i32 to index
    %c0_51 = arith.constant 0 : index
    %c0_52 = arith.constant 0 : index
    %92 = vector.load %arg9[%91, %c0_51, %c0_52] : memref<10x10x32xf32, #tpu.memory_space<vmem>>, vector<8x8x32xf32>
    %93 = vector.shape_cast %27 : vector<32xf32> to vector<1x1x32xf32>
    %94 = vector.broadcast %93 : vector<1x1x32xf32> to vector<8x8x32xf32>
    %95 = arith.mulf %92, %94 : vector<8x8x32xf32>
    %96 = arith.addf %89, %95 : vector<8x8x32xf32>
    %c2_i32_53 = arith.constant 2 : i32
    %97 = arith.addi %48, %c2_i32_53 : i32
    %98 = arith.index_cast %97 : i32 to index
    %c1_54 = arith.constant 1 : index
    %c0_55 = arith.constant 0 : index
    %99 = vector.load %arg9[%98, %c1_54, %c0_55] : memref<10x10x32xf32, #tpu.memory_space<vmem>>, vector<8x8x32xf32>
    %100 = vector.shape_cast %29 : vector<32xf32> to vector<1x1x32xf32>
    %101 = vector.broadcast %100 : vector<1x1x32xf32> to vector<8x8x32xf32>
    %102 = arith.mulf %99, %101 : vector<8x8x32xf32>
    %103 = arith.addf %96, %102 : vector<8x8x32xf32>
    %c2_i32_56 = arith.constant 2 : i32
    %104 = arith.addi %48, %c2_i32_56 : i32
    %105 = arith.index_cast %104 : i32 to index
    %c2_57 = arith.constant 2 : index
    %c0_58 = arith.constant 0 : index
    %106 = vector.load %arg9[%105, %c2_57, %c0_58] : memref<10x10x32xf32, #tpu.memory_space<vmem>>, vector<8x8x32xf32>
    %107 = vector.shape_cast %31 : vector<32xf32> to vector<1x1x32xf32>
    %108 = vector.broadcast %107 : vector<1x1x32xf32> to vector<8x8x32xf32>
    %109 = arith.mulf %106, %108 : vector<8x8x32xf32>
    %110 = arith.addf %103, %109 : vector<8x8x32xf32>
    %111 = vector.shape_cast %11 : vector<1x32xf32> to vector<1x1x32xf32>
    %112 = vector.broadcast %111 : vector<1x1x32xf32> to vector<8x8x32xf32>
    %113 = arith.addf %110, %112 : vector<8x8x32xf32>
    %cst_59 = arith.constant 0.000000e+00 : f32
    %114 = vector.broadcast %cst_59 : f32 to vector<8x8x32xf32>
    %115 = arith.maximumf %113, %114 : vector<8x8x32xf32>
    %116 = vector.shape_cast %115 : vector<8x8x32xf32> to vector<64x32xf32>
    %cst_60 = arith.constant dense<0.000000e+00> : vector<64x16xf32>
    %117 = tpu.matmul %116, %10, %cst_60 {dimension_numbers = #tpu.dot_dimension_numbers<[1], [0], [0], [1], [0, 0, 1, 1], [], []>} : vector<64x32xf32>, vector<32x16xf32>, vector<64x16xf32> -> vector<64x16xf32>
    %118 = vector.broadcast %12 : vector<1x16xf32> to vector<64x16xf32>
    %119 = arith.addf %117, %118 : vector<64x16xf32>
    %c0_61 = arith.constant 0 : index
    %120 = arith.index_cast %48 : i32 to index
    %c0_62 = arith.constant 0 : index
    %c0_63 = arith.constant 0 : index
    %121 = vector.load %arg1[%c0_61, %120, %c0_62, %c0_63] : memref<1x8x8x16xf32, #tpu.memory_space<vmem>>, vector<1x8x8x16xf32>
    %122 = vector.shape_cast %121 : vector<1x8x8x16xf32> to vector<8x8x16xf32>
    %123 = vector.shape_cast %122 : vector<8x8x16xf32> to vector<64x16xf32>
    %124 = arith.addf %119, %123 : vector<64x16xf32>
    %125 = vector.shape_cast %124 : vector<64x16xf32> to vector<8x8x16xf32>
    %c0_64 = arith.constant 0 : index
    %126 = arith.index_cast %48 : i32 to index
    %c0_65 = arith.constant 0 : index
    %c0_66 = arith.constant 0 : index
    %127 = vector.load %arg8[%c0_64, %126, %c0_65, %c0_66] : memref<1x8x8x16xf32, #tpu.memory_space<vmem>>, vector<1x8x8x16xf32>
    %128 = vector.shape_cast %127 : vector<1x8x8x16xf32> to vector<8x8x16xf32>
    %129 = vector.shape_cast %125 : vector<8x8x16xf32> to vector<1x8x8x16xf32>
    tpu.vector_store %arg8[%c0_64, %126, %c0_65, %c0_66], %129 {strides = array<i32>} : memref<1x8x8x16xf32, #tpu.memory_space<vmem>>, vector<1x8x8x16xf32>,
    %c1_i32_67 = arith.constant 1 : i32
    return
  }
  func.func @transform_0(%arg0: i32) -> (i32, i32, i32, i32) {
    %c0_i32 = arith.constant 0 : i32
    %c0_i32_0 = arith.constant 0 : i32
    %c0_i32_1 = arith.constant 0 : i32
    %c0_i32_2 = arith.constant 0 : i32
    return %arg0, %c0_i32, %c0_i32_0, %c0_i32_1 : i32, i32, i32, i32
  }
  func.func @transform_1(%arg0: i32) -> (i32, i32) {
    %c0_i32 = arith.constant 0 : i32
    %c0_i32_0 = arith.constant 0 : i32
    %c0_i32_1 = arith.constant 0 : i32
    return %c0_i32, %c0_i32_0 : i32, i32
  }
  func.func @transform_2(%arg0: i32) -> (i32, i32) {
    %c0_i32 = arith.constant 0 : i32
    %c0_i32_0 = arith.constant 0 : i32
    %c0_i32_1 = arith.constant 0 : i32
    return %c0_i32, %c0_i32_0 : i32, i32
  }
  func.func @transform_3(%arg0: i32) -> (i32, i32) {
    %c0_i32 = arith.constant 0 : i32
    %c0_i32_0 = arith.constant 0 : i32
    %c0_i32_1 = arith.constant 0 : i32
    return %c0_i32, %c0_i32_0 : i32, i32
  }
  func.func @transform_4(%arg0: i32) -> (i32, i32) {
    %c0_i32 = arith.constant 0 : i32
    %c0_i32_0 = arith.constant 0 : i32
    %c0_i32_1 = arith.constant 0 : i32
    return %c0_i32, %c0_i32_0 : i32, i32
  }
  func.func @transform_5(%arg0: i32) -> (i32, i32) {
    %c0_i32 = arith.constant 0 : i32
    %c0_i32_0 = arith.constant 0 : i32
    %c0_i32_1 = arith.constant 0 : i32
    return %c0_i32, %c0_i32_0 : i32, i32
  }
  func.func @transform_6(%arg0: i32) -> (i32, i32) {
    %c0_i32 = arith.constant 0 : i32
    %c0_i32_0 = arith.constant 0 : i32
    %c0_i32_1 = arith.constant 0 : i32
    return %c0_i32, %c0_i32_0 : i32, i32
  }
  func.func @transform_7(%arg0: i32) -> (i32, i32, i32, i32) {
    %c0_i32 = arith.constant 0 : i32
    %c0_i32_0 = arith.constant 0 : i32
    %c0_i32_1 = arith.constant 0 : i32
    %c0_i32_2 = arith.constant 0 : i32
    return %arg0, %c0_i32, %c0_i32_0, %c0_i32_1 : i32, i32, i32, i32
  }
}

module attributes {stable_mosaic.version = 11 : i64} {
  func.func @_fused_s2_kernel(%arg0: i32, %arg1: memref<1x16x8x16xf32, #tpu.memory_space<vmem>>, %arg2: memref<16x32xf32, #tpu.memory_space<vmem>>, %arg3: memref<16x32xf32, #tpu.memory_space<vmem>>, %arg4: memref<1x32xf32, #tpu.memory_space<vmem>>, %arg5: memref<9x32xf32, #tpu.memory_space<vmem>>, %arg6: memref<1x32xf32, #tpu.memory_space<vmem>>, %arg7: memref<32x16xf32, #tpu.memory_space<vmem>>, %arg8: memref<1x16xf32, #tpu.memory_space<vmem>>, %arg9: memref<1x8x8x16xf32, #tpu.memory_space<vmem>>, %arg10: memref<18x2x9x32xf32, #tpu.memory_space<vmem>>) attributes {dimension_semantics = [#tpu.dimension_semantics<parallel>], iteration_bounds = array<i64: 2>, scalar_prefetch = 0 : i64, scratch_operands = 1 : i64, tpu.core_type = #tpu.core_type<tc>, window_params = [{transform_indices = @transform_0, window_bounds = array<i64: 1, 16, 8, 16>}, {pipeline_mode = #tpu.pipeline_mode<synchronous>, transform_indices = @transform_1, window_bounds = array<i64: 16, 32>}, {pipeline_mode = #tpu.pipeline_mode<synchronous>, transform_indices = @transform_2, window_bounds = array<i64: 16, 32>}, {pipeline_mode = #tpu.pipeline_mode<synchronous>, transform_indices = @transform_3, window_bounds = array<i64: 1, 32>}, {pipeline_mode = #tpu.pipeline_mode<synchronous>, transform_indices = @transform_4, window_bounds = array<i64: 9, 32>}, {pipeline_mode = #tpu.pipeline_mode<synchronous>, transform_indices = @transform_5, window_bounds = array<i64: 1, 32>}, {pipeline_mode = #tpu.pipeline_mode<synchronous>, transform_indices = @transform_6, window_bounds = array<i64: 32, 16>}, {pipeline_mode = #tpu.pipeline_mode<synchronous>, transform_indices = @transform_7, window_bounds = array<i64: 1, 16>}, {transform_indices = @transform_8, window_bounds = array<i64: 1, 8, 8, 16>}]} {
    %cst = arith.constant 0.000000e+00 : f32
    %0 = vector.broadcast %cst : f32 to vector<1x2x9x32xf32>
    %c0 = arith.constant 0 : index
    %c0_0 = arith.constant 0 : index
    %c0_1 = arith.constant 0 : index
    %c0_2 = arith.constant 0 : index
    %1 = vector.load %arg10[%c0, %c0_0, %c0_1, %c0_2] : memref<18x2x9x32xf32, #tpu.memory_space<vmem>>, vector<1x2x9x32xf32>
    tpu.vector_store %arg10[%c0, %c0_0, %c0_1, %c0_2], %0 {strides = array<i32>} : memref<18x2x9x32xf32, #tpu.memory_space<vmem>>, vector<1x2x9x32xf32>,
    %cst_3 = arith.constant 0.000000e+00 : f32
    %2 = vector.broadcast %cst_3 : f32 to vector<1x2x9x32xf32>
    %c17 = arith.constant 17 : index
    %c0_4 = arith.constant 0 : index
    %c0_5 = arith.constant 0 : index
    %c0_6 = arith.constant 0 : index
    %3 = vector.load %arg10[%c17, %c0_4, %c0_5, %c0_6] : memref<18x2x9x32xf32, #tpu.memory_space<vmem>>, vector<1x2x9x32xf32>
    tpu.vector_store %arg10[%c17, %c0_4, %c0_5, %c0_6], %2 {strides = array<i32>} : memref<18x2x9x32xf32, #tpu.memory_space<vmem>>, vector<1x2x9x32xf32>,
    %cst_7 = arith.constant 0.000000e+00 : f32
    %4 = vector.broadcast %cst_7 : f32 to vector<18x1x32xf32>
    %c0_8 = arith.constant 0 : index
    %c0_9 = arith.constant 0 : index
    %c0_10 = arith.constant 0 : index
    %c0_11 = arith.constant 0 : index
    %5 = vector.load %arg10[%c0_8, %c0_9, %c0_10, %c0_11] : memref<18x2x9x32xf32, #tpu.memory_space<vmem>>, vector<18x1x1x32xf32>
    %6 = vector.shape_cast %5 : vector<18x1x1x32xf32> to vector<18x1x32xf32>
    %7 = vector.shape_cast %4 : vector<18x1x32xf32> to vector<18x1x1x32xf32>
    tpu.vector_store %arg10[%c0_8, %c0_9, %c0_10, %c0_11], %7 {strides = array<i32>} : memref<18x2x9x32xf32, #tpu.memory_space<vmem>>, vector<18x1x1x32xf32>,
    %cst_12 = arith.constant 0.000000e+00 : f32
    %8 = vector.broadcast %cst_12 : f32 to vector<18x1x32xf32>
    %c0_13 = arith.constant 0 : index
    %c1 = arith.constant 1 : index
    %c8 = arith.constant 8 : index
    %c0_14 = arith.constant 0 : index
    %9 = vector.load %arg10[%c0_13, %c1, %c8, %c0_14] : memref<18x2x9x32xf32, #tpu.memory_space<vmem>>, vector<18x1x1x32xf32>
    %10 = vector.shape_cast %9 : vector<18x1x1x32xf32> to vector<18x1x32xf32>
    %11 = vector.shape_cast %8 : vector<18x1x32xf32> to vector<18x1x1x32xf32>
    tpu.vector_store %arg10[%c0_13, %c1, %c8, %c0_14], %11 {strides = array<i32>} : memref<18x2x9x32xf32, #tpu.memory_space<vmem>>, vector<18x1x1x32xf32>,
    %c0_15 = arith.constant 0 : index
    %c0_16 = arith.constant 0 : index
    %12 = vector.load %arg2[%c0_15, %c0_16] : memref<16x32xf32, #tpu.memory_space<vmem>>, vector<16x32xf32>
    %c0_17 = arith.constant 0 : index
    %c0_18 = arith.constant 0 : index
    %13 = vector.load %arg3[%c0_17, %c0_18] : memref<16x32xf32, #tpu.memory_space<vmem>>, vector<16x32xf32>
    %c0_19 = arith.constant 0 : index
    %c0_20 = arith.constant 0 : index
    %14 = vector.load %arg4[%c0_19, %c0_20] : memref<1x32xf32, #tpu.memory_space<vmem>>, vector<1x32xf32>
    %c0_21 = arith.constant 0 : index
    %c0_22 = arith.constant 0 : index
    %15 = vector.load %arg7[%c0_21, %c0_22] : memref<32x16xf32, #tpu.memory_space<vmem>>, vector<32x16xf32>
    %c0_23 = arith.constant 0 : index
    %c0_24 = arith.constant 0 : index
    %16 = vector.load %arg6[%c0_23, %c0_24] : memref<1x32xf32, #tpu.memory_space<vmem>>, vector<1x32xf32>
    %c0_25 = arith.constant 0 : index
    %c0_26 = arith.constant 0 : index
    %17 = vector.load %arg8[%c0_25, %c0_26] : memref<1x16xf32, #tpu.memory_space<vmem>>, vector<1x16xf32>
    %c0_27 = arith.constant 0 : index
    %c0_28 = arith.constant 0 : index
    %18 = vector.load %arg5[%c0_27, %c0_28] : memref<9x32xf32, #tpu.memory_space<vmem>>, vector<9x32xf32>
    %19 = vector.extract_strided_slice %18 {offsets = [0, 0], sizes = [1, 32], strides = [1, 1]} : vector<9x32xf32> to vector<1x32xf32>
    %20 = vector.shape_cast %19 : vector<1x32xf32> to vector<32xf32>
    %21 = vector.extract_strided_slice %18 {offsets = [1, 0], sizes = [1, 32], strides = [1, 1]} : vector<9x32xf32> to vector<1x32xf32>
    %22 = vector.shape_cast %21 : vector<1x32xf32> to vector<32xf32>
    %23 = vector.extract_strided_slice %18 {offsets = [2, 0], sizes = [1, 32], strides = [1, 1]} : vector<9x32xf32> to vector<1x32xf32>
    %24 = vector.shape_cast %23 : vector<1x32xf32> to vector<32xf32>
    %25 = vector.extract_strided_slice %18 {offsets = [3, 0], sizes = [1, 32], strides = [1, 1]} : vector<9x32xf32> to vector<1x32xf32>
    %26 = vector.shape_cast %25 : vector<1x32xf32> to vector<32xf32>
    %27 = vector.extract_strided_slice %18 {offsets = [4, 0], sizes = [1, 32], strides = [1, 1]} : vector<9x32xf32> to vector<1x32xf32>
    %28 = vector.shape_cast %27 : vector<1x32xf32> to vector<32xf32>
    %29 = vector.extract_strided_slice %18 {offsets = [5, 0], sizes = [1, 32], strides = [1, 1]} : vector<9x32xf32> to vector<1x32xf32>
    %30 = vector.shape_cast %29 : vector<1x32xf32> to vector<32xf32>
    %31 = vector.extract_strided_slice %18 {offsets = [6, 0], sizes = [1, 32], strides = [1, 1]} : vector<9x32xf32> to vector<1x32xf32>
    %32 = vector.shape_cast %31 : vector<1x32xf32> to vector<32xf32>
    %33 = vector.extract_strided_slice %18 {offsets = [7, 0], sizes = [1, 32], strides = [1, 1]} : vector<9x32xf32> to vector<1x32xf32>
    %34 = vector.shape_cast %33 : vector<1x32xf32> to vector<32xf32>
    %35 = vector.extract_strided_slice %18 {offsets = [8, 0], sizes = [1, 32], strides = [1, 1]} : vector<9x32xf32> to vector<1x32xf32>
    %36 = vector.shape_cast %35 : vector<1x32xf32> to vector<32xf32>
    %c0_i32 = arith.constant 0 : i32
    %c16_i32 = arith.constant 16 : i32
    %37 = arith.muli %c0_i32, %c16_i32 : i32
    %38 = tpu.assume_multiple %37, 16 : i32
    %c0_29 = arith.constant 0 : index
    %39 = arith.index_cast %38 : i32 to index
    %c0_30 = arith.constant 0 : index
    %c0_31 = arith.constant 0 : index
    %40 = vector.load %arg1[%c0_29, %39, %c0_30, %c0_31] : memref<1x16x8x16xf32, #tpu.memory_space<vmem>>, vector<1x16x8x16xf32>
    %41 = vector.shape_cast %40 : vector<1x16x8x16xf32> to vector<16x8x16xf32>
    %42 = vector.shape_cast %41 : vector<16x8x16xf32> to vector<128x16xf32>
    %cst_32 = arith.constant dense<0.000000e+00> : vector<128x32xf32>
    %43 = tpu.matmul %42, %12, %cst_32 {dimension_numbers = #tpu.dot_dimension_numbers<[1], [0], [0], [1], [0, 0, 1, 1], [], []>} : vector<128x16xf32>, vector<16x32xf32>, vector<128x32xf32> -> vector<128x32xf32>
    %44 = vector.broadcast %14 : vector<1x32xf32> to vector<128x32xf32>
    %45 = arith.addf %43, %44 : vector<128x32xf32>
    %cst_33 = arith.constant 0.000000e+00 : f32
    %46 = vector.broadcast %cst_33 : f32 to vector<128x32xf32>
    %47 = arith.maximumf %45, %46 : vector<128x32xf32>
    %cst_34 = arith.constant dense<0.000000e+00> : vector<128x32xf32>
    %48 = tpu.matmul %42, %13, %cst_34 {dimension_numbers = #tpu.dot_dimension_numbers<[1], [0], [0], [1], [0, 0, 1, 1], [], []>} : vector<128x16xf32>, vector<16x32xf32>, vector<128x32xf32> -> vector<128x32xf32>
    %49 = vector.broadcast %14 : vector<1x32xf32> to vector<128x32xf32>
    %50 = arith.addf %48, %49 : vector<128x32xf32>
    %cst_35 = arith.constant 0.000000e+00 : f32
    %51 = vector.broadcast %cst_35 : f32 to vector<128x32xf32>
    %52 = arith.maximumf %50, %51 : vector<128x32xf32>
    %53 = vector.shape_cast %47 : vector<128x32xf32> to vector<16x8x32xf32>
    %c1_i32 = arith.constant 1 : i32
    %54 = arith.addi %38, %c1_i32 : i32
    %55 = arith.index_cast %54 : i32 to index
    %c1_36 = arith.constant 1 : index
    %c0_37 = arith.constant 0 : index
    %c0_38 = arith.constant 0 : index
    %56 = vector.load %arg10[%55, %c1_36, %c0_37, %c0_38] : memref<18x2x9x32xf32, #tpu.memory_space<vmem>>, vector<16x1x8x32xf32>
    %57 = vector.shape_cast %56 : vector<16x1x8x32xf32> to vector<16x8x32xf32>
    %58 = vector.shape_cast %53 : vector<16x8x32xf32> to vector<16x1x8x32xf32>
    tpu.vector_store %arg10[%55, %c1_36, %c0_37, %c0_38], %58 {strides = array<i32>} : memref<18x2x9x32xf32, #tpu.memory_space<vmem>>, vector<16x1x8x32xf32>,
    %59 = vector.shape_cast %52 : vector<128x32xf32> to vector<16x8x32xf32>
    %c1_i32_39 = arith.constant 1 : i32
    %60 = arith.addi %38, %c1_i32_39 : i32
    %61 = arith.index_cast %60 : i32 to index
    %c0_40 = arith.constant 0 : index
    %c1_41 = arith.constant 1 : index
    %c0_42 = arith.constant 0 : index
    %62 = vector.load %arg10[%61, %c0_40, %c1_41, %c0_42] : memref<18x2x9x32xf32, #tpu.memory_space<vmem>>, vector<16x1x8x32xf32>
    %63 = vector.shape_cast %62 : vector<16x1x8x32xf32> to vector<16x8x32xf32>
    %64 = vector.shape_cast %59 : vector<16x8x32xf32> to vector<16x1x8x32xf32>
    tpu.vector_store %arg10[%61, %c0_40, %c1_41, %c0_42], %64 {strides = array<i32>} : memref<18x2x9x32xf32, #tpu.memory_space<vmem>>, vector<16x1x8x32xf32>,
    %c1_i32_43 = arith.constant 1 : i32
    %c0_i32_44 = arith.constant 0 : i32
    %c8_i32 = arith.constant 8 : i32
    %65 = arith.muli %c0_i32_44, %c8_i32 : i32
    %66 = tpu.assume_multiple %65, 8 : i32
    %c0_i32_45 = arith.constant 0 : i32
    %67 = arith.addi %66, %c0_i32_45 : i32
    %c2_i32 = arith.constant 2 : i32
    %68 = arith.muli %c2_i32, %67 : i32
    %c0_i32_46 = arith.constant 0 : i32
    %69 = arith.addi %68, %c0_i32_46 : i32
    %70 = arith.index_cast %69 : i32 to index
    %c0_47 = arith.constant 0 : index
    %c0_48 = arith.constant 0 : index
    %c0_49 = arith.constant 0 : index
    %71 = vector.load %arg10[%70, %c0_47, %c0_48, %c0_49] : memref<18x2x9x32xf32, #tpu.memory_space<vmem>>, vector<1x1x8x32xf32>
    %72 = vector.shape_cast %71 : vector<1x1x8x32xf32> to vector<8x32xf32>
    %73 = vector.shape_cast %20 : vector<32xf32> to vector<1x32xf32>
    %74 = vector.broadcast %73 : vector<1x32xf32> to vector<8x32xf32>
    %75 = arith.mulf %72, %74 : vector<8x32xf32>
    %76 = arith.index_cast %69 : i32 to index
    %c1_50 = arith.constant 1 : index
    %c0_51 = arith.constant 0 : index
    %c0_52 = arith.constant 0 : index
    %77 = vector.load %arg10[%76, %c1_50, %c0_51, %c0_52] : memref<18x2x9x32xf32, #tpu.memory_space<vmem>>, vector<1x1x8x32xf32>
    %78 = vector.shape_cast %77 : vector<1x1x8x32xf32> to vector<8x32xf32>
    %79 = vector.shape_cast %22 : vector<32xf32> to vector<1x32xf32>
    %80 = vector.broadcast %79 : vector<1x32xf32> to vector<8x32xf32>
    %81 = arith.mulf %78, %80 : vector<8x32xf32>
    %82 = arith.addf %75, %81 : vector<8x32xf32>
    %83 = arith.index_cast %69 : i32 to index
    %c0_53 = arith.constant 0 : index
    %c1_54 = arith.constant 1 : index
    %c0_55 = arith.constant 0 : index
    %84 = vector.load %arg10[%83, %c0_53, %c1_54, %c0_55] : memref<18x2x9x32xf32, #tpu.memory_space<vmem>>, vector<1x1x8x32xf32>
    %85 = vector.shape_cast %84 : vector<1x1x8x32xf32> to vector<8x32xf32>
    %86 = vector.shape_cast %24 : vector<32xf32> to vector<1x32xf32>
    %87 = vector.broadcast %86 : vector<1x32xf32> to vector<8x32xf32>
    %88 = arith.mulf %85, %87 : vector<8x32xf32>
    %89 = arith.addf %82, %88 : vector<8x32xf32>
    %c0_i32_56 = arith.constant 0 : i32
    %90 = arith.addi %66, %c0_i32_56 : i32
    %c2_i32_57 = arith.constant 2 : i32
    %91 = arith.muli %c2_i32_57, %90 : i32
    %c1_i32_58 = arith.constant 1 : i32
    %92 = arith.addi %91, %c1_i32_58 : i32
    %93 = arith.index_cast %92 : i32 to index
    %c0_59 = arith.constant 0 : index
    %c0_60 = arith.constant 0 : index
    %c0_61 = arith.constant 0 : index
    %94 = vector.load %arg10[%93, %c0_59, %c0_60, %c0_61] : memref<18x2x9x32xf32, #tpu.memory_space<vmem>>, vector<1x1x8x32xf32>
    %95 = vector.shape_cast %94 : vector<1x1x8x32xf32> to vector<8x32xf32>
    %96 = vector.shape_cast %26 : vector<32xf32> to vector<1x32xf32>
    %97 = vector.broadcast %96 : vector<1x32xf32> to vector<8x32xf32>
    %98 = arith.mulf %95, %97 : vector<8x32xf32>
    %99 = arith.addf %89, %98 : vector<8x32xf32>
    %100 = arith.index_cast %92 : i32 to index
    %c1_62 = arith.constant 1 : index
    %c0_63 = arith.constant 0 : index
    %c0_64 = arith.constant 0 : index
    %101 = vector.load %arg10[%100, %c1_62, %c0_63, %c0_64] : memref<18x2x9x32xf32, #tpu.memory_space<vmem>>, vector<1x1x8x32xf32>
    %102 = vector.shape_cast %101 : vector<1x1x8x32xf32> to vector<8x32xf32>
    %103 = vector.shape_cast %28 : vector<32xf32> to vector<1x32xf32>
    %104 = vector.broadcast %103 : vector<1x32xf32> to vector<8x32xf32>
    %105 = arith.mulf %102, %104 : vector<8x32xf32>
    %106 = arith.addf %99, %105 : vector<8x32xf32>
    %107 = arith.index_cast %92 : i32 to index
    %c0_65 = arith.constant 0 : index
    %c1_66 = arith.constant 1 : index
    %c0_67 = arith.constant 0 : index
    %108 = vector.load %arg10[%107, %c0_65, %c1_66, %c0_67] : memref<18x2x9x32xf32, #tpu.memory_space<vmem>>, vector<1x1x8x32xf32>
    %109 = vector.shape_cast %108 : vector<1x1x8x32xf32> to vector<8x32xf32>
    %110 = vector.shape_cast %30 : vector<32xf32> to vector<1x32xf32>
    %111 = vector.broadcast %110 : vector<1x32xf32> to vector<8x32xf32>
    %112 = arith.mulf %109, %111 : vector<8x32xf32>
    %113 = arith.addf %106, %112 : vector<8x32xf32>
    %c0_i32_68 = arith.constant 0 : i32
    %114 = arith.addi %66, %c0_i32_68 : i32
    %c2_i32_69 = arith.constant 2 : i32
    %115 = arith.muli %c2_i32_69, %114 : i32
    %c2_i32_70 = arith.constant 2 : i32
    %116 = arith.addi %115, %c2_i32_70 : i32
    %117 = arith.index_cast %116 : i32 to index
    %c0_71 = arith.constant 0 : index
    %c0_72 = arith.constant 0 : index
    %c0_73 = arith.constant 0 : index
    %118 = vector.load %arg10[%117, %c0_71, %c0_72, %c0_73] : memref<18x2x9x32xf32, #tpu.memory_space<vmem>>, vector<1x1x8x32xf32>
    %119 = vector.shape_cast %118 : vector<1x1x8x32xf32> to vector<8x32xf32>
    %120 = vector.shape_cast %32 : vector<32xf32> to vector<1x32xf32>
    %121 = vector.broadcast %120 : vector<1x32xf32> to vector<8x32xf32>
    %122 = arith.mulf %119, %121 : vector<8x32xf32>
    %123 = arith.addf %113, %122 : vector<8x32xf32>
    %124 = arith.index_cast %116 : i32 to index
    %c1_74 = arith.constant 1 : index
    %c0_75 = arith.constant 0 : index
    %c0_76 = arith.constant 0 : index
    %125 = vector.load %arg10[%124, %c1_74, %c0_75, %c0_76] : memref<18x2x9x32xf32, #tpu.memory_space<vmem>>, vector<1x1x8x32xf32>
    %126 = vector.shape_cast %125 : vector<1x1x8x32xf32> to vector<8x32xf32>
    %127 = vector.shape_cast %34 : vector<32xf32> to vector<1x32xf32>
    %128 = vector.broadcast %127 : vector<1x32xf32> to vector<8x32xf32>
    %129 = arith.mulf %126, %128 : vector<8x32xf32>
    %130 = arith.addf %123, %129 : vector<8x32xf32>
    %131 = arith.index_cast %116 : i32 to index
    %c0_77 = arith.constant 0 : index
    %c1_78 = arith.constant 1 : index
    %c0_79 = arith.constant 0 : index
    %132 = vector.load %arg10[%131, %c0_77, %c1_78, %c0_79] : memref<18x2x9x32xf32, #tpu.memory_space<vmem>>, vector<1x1x8x32xf32>
    %133 = vector.shape_cast %132 : vector<1x1x8x32xf32> to vector<8x32xf32>
    %134 = vector.shape_cast %36 : vector<32xf32> to vector<1x32xf32>
    %135 = vector.broadcast %134 : vector<1x32xf32> to vector<8x32xf32>
    %136 = arith.mulf %133, %135 : vector<8x32xf32>
    %137 = arith.addf %130, %136 : vector<8x32xf32>
    %138 = vector.broadcast %16 : vector<1x32xf32> to vector<8x32xf32>
    %139 = arith.addf %137, %138 : vector<8x32xf32>
    %cst_80 = arith.constant 0.000000e+00 : f32
    %140 = vector.broadcast %cst_80 : f32 to vector<8x32xf32>
    %141 = arith.maximumf %139, %140 : vector<8x32xf32>
    %c1_i32_81 = arith.constant 1 : i32
    %142 = arith.addi %66, %c1_i32_81 : i32
    %c2_i32_82 = arith.constant 2 : i32
    %143 = arith.muli %c2_i32_82, %142 : i32
    %c0_i32_83 = arith.constant 0 : i32
    %144 = arith.addi %143, %c0_i32_83 : i32
    %145 = arith.index_cast %144 : i32 to index
    %c0_84 = arith.constant 0 : index
    %c0_85 = arith.constant 0 : index
    %c0_86 = arith.constant 0 : index
    %146 = vector.load %arg10[%145, %c0_84, %c0_85, %c0_86] : memref<18x2x9x32xf32, #tpu.memory_space<vmem>>, vector<1x1x8x32xf32>
    %147 = vector.shape_cast %146 : vector<1x1x8x32xf32> to vector<8x32xf32>
    %148 = vector.shape_cast %20 : vector<32xf32> to vector<1x32xf32>
    %149 = vector.broadcast %148 : vector<1x32xf32> to vector<8x32xf32>
    %150 = arith.mulf %147, %149 : vector<8x32xf32>
    %151 = arith.index_cast %144 : i32 to index
    %c1_87 = arith.constant 1 : index
    %c0_88 = arith.constant 0 : index
    %c0_89 = arith.constant 0 : index
    %152 = vector.load %arg10[%151, %c1_87, %c0_88, %c0_89] : memref<18x2x9x32xf32, #tpu.memory_space<vmem>>, vector<1x1x8x32xf32>
    %153 = vector.shape_cast %152 : vector<1x1x8x32xf32> to vector<8x32xf32>
    %154 = vector.shape_cast %22 : vector<32xf32> to vector<1x32xf32>
    %155 = vector.broadcast %154 : vector<1x32xf32> to vector<8x32xf32>
    %156 = arith.mulf %153, %155 : vector<8x32xf32>
    %157 = arith.addf %150, %156 : vector<8x32xf32>
    %158 = arith.index_cast %144 : i32 to index
    %c0_90 = arith.constant 0 : index
    %c1_91 = arith.constant 1 : index
    %c0_92 = arith.constant 0 : index
    %159 = vector.load %arg10[%158, %c0_90, %c1_91, %c0_92] : memref<18x2x9x32xf32, #tpu.memory_space<vmem>>, vector<1x1x8x32xf32>
    %160 = vector.shape_cast %159 : vector<1x1x8x32xf32> to vector<8x32xf32>
    %161 = vector.shape_cast %24 : vector<32xf32> to vector<1x32xf32>
    %162 = vector.broadcast %161 : vector<1x32xf32> to vector<8x32xf32>
    %163 = arith.mulf %160, %162 : vector<8x32xf32>
    %164 = arith.addf %157, %163 : vector<8x32xf32>
    %c1_i32_93 = arith.constant 1 : i32
    %165 = arith.addi %66, %c1_i32_93 : i32
    %c2_i32_94 = arith.constant 2 : i32
    %166 = arith.muli %c2_i32_94, %165 : i32
    %c1_i32_95 = arith.constant 1 : i32
    %167 = arith.addi %166, %c1_i32_95 : i32
    %168 = arith.index_cast %167 : i32 to index
    %c0_96 = arith.constant 0 : index
    %c0_97 = arith.constant 0 : index
    %c0_98 = arith.constant 0 : index
    %169 = vector.load %arg10[%168, %c0_96, %c0_97, %c0_98] : memref<18x2x9x32xf32, #tpu.memory_space<vmem>>, vector<1x1x8x32xf32>
    %170 = vector.shape_cast %169 : vector<1x1x8x32xf32> to vector<8x32xf32>
    %171 = vector.shape_cast %26 : vector<32xf32> to vector<1x32xf32>
    %172 = vector.broadcast %171 : vector<1x32xf32> to vector<8x32xf32>
    %173 = arith.mulf %170, %172 : vector<8x32xf32>
    %174 = arith.addf %164, %173 : vector<8x32xf32>
    %175 = arith.index_cast %167 : i32 to index
    %c1_99 = arith.constant 1 : index
    %c0_100 = arith.constant 0 : index
    %c0_101 = arith.constant 0 : index
    %176 = vector.load %arg10[%175, %c1_99, %c0_100, %c0_101] : memref<18x2x9x32xf32, #tpu.memory_space<vmem>>, vector<1x1x8x32xf32>
    %177 = vector.shape_cast %176 : vector<1x1x8x32xf32> to vector<8x32xf32>
    %178 = vector.shape_cast %28 : vector<32xf32> to vector<1x32xf32>
    %179 = vector.broadcast %178 : vector<1x32xf32> to vector<8x32xf32>
    %180 = arith.mulf %177, %179 : vector<8x32xf32>
    %181 = arith.addf %174, %180 : vector<8x32xf32>
    %182 = arith.index_cast %167 : i32 to index
    %c0_102 = arith.constant 0 : index
    %c1_103 = arith.constant 1 : index
    %c0_104 = arith.constant 0 : index
    %183 = vector.load %arg10[%182, %c0_102, %c1_103, %c0_104] : memref<18x2x9x32xf32, #tpu.memory_space<vmem>>, vector<1x1x8x32xf32>
    %184 = vector.shape_cast %183 : vector<1x1x8x32xf32> to vector<8x32xf32>
    %185 = vector.shape_cast %30 : vector<32xf32> to vector<1x32xf32>
    %186 = vector.broadcast %185 : vector<1x32xf32> to vector<8x32xf32>
    %187 = arith.mulf %184, %186 : vector<8x32xf32>
    %188 = arith.addf %181, %187 : vector<8x32xf32>
    %c1_i32_105 = arith.constant 1 : i32
    %189 = arith.addi %66, %c1_i32_105 : i32
    %c2_i32_106 = arith.constant 2 : i32
    %190 = arith.muli %c2_i32_106, %189 : i32
    %c2_i32_107 = arith.constant 2 : i32
    %191 = arith.addi %190, %c2_i32_107 : i32
    %192 = arith.index_cast %191 : i32 to index
    %c0_108 = arith.constant 0 : index
    %c0_109 = arith.constant 0 : index
    %c0_110 = arith.constant 0 : index
    %193 = vector.load %arg10[%192, %c0_108, %c0_109, %c0_110] : memref<18x2x9x32xf32, #tpu.memory_space<vmem>>, vector<1x1x8x32xf32>
    %194 = vector.shape_cast %193 : vector<1x1x8x32xf32> to vector<8x32xf32>
    %195 = vector.shape_cast %32 : vector<32xf32> to vector<1x32xf32>
    %196 = vector.broadcast %195 : vector<1x32xf32> to vector<8x32xf32>
    %197 = arith.mulf %194, %196 : vector<8x32xf32>
    %198 = arith.addf %188, %197 : vector<8x32xf32>
    %199 = arith.index_cast %191 : i32 to index
    %c1_111 = arith.constant 1 : index
    %c0_112 = arith.constant 0 : index
    %c0_113 = arith.constant 0 : index
    %200 = vector.load %arg10[%199, %c1_111, %c0_112, %c0_113] : memref<18x2x9x32xf32, #tpu.memory_space<vmem>>, vector<1x1x8x32xf32>
    %201 = vector.shape_cast %200 : vector<1x1x8x32xf32> to vector<8x32xf32>
    %202 = vector.shape_cast %34 : vector<32xf32> to vector<1x32xf32>
    %203 = vector.broadcast %202 : vector<1x32xf32> to vector<8x32xf32>
    %204 = arith.mulf %201, %203 : vector<8x32xf32>
    %205 = arith.addf %198, %204 : vector<8x32xf32>
    %206 = arith.index_cast %191 : i32 to index
    %c0_114 = arith.constant 0 : index
    %c1_115 = arith.constant 1 : index
    %c0_116 = arith.constant 0 : index
    %207 = vector.load %arg10[%206, %c0_114, %c1_115, %c0_116] : memref<18x2x9x32xf32, #tpu.memory_space<vmem>>, vector<1x1x8x32xf32>
    %208 = vector.shape_cast %207 : vector<1x1x8x32xf32> to vector<8x32xf32>
    %209 = vector.shape_cast %36 : vector<32xf32> to vector<1x32xf32>
    %210 = vector.broadcast %209 : vector<1x32xf32> to vector<8x32xf32>
    %211 = arith.mulf %208, %210 : vector<8x32xf32>
    %212 = arith.addf %205, %211 : vector<8x32xf32>
    %213 = vector.broadcast %16 : vector<1x32xf32> to vector<8x32xf32>
    %214 = arith.addf %212, %213 : vector<8x32xf32>
    %cst_117 = arith.constant 0.000000e+00 : f32
    %215 = vector.broadcast %cst_117 : f32 to vector<8x32xf32>
    %216 = arith.maximumf %214, %215 : vector<8x32xf32>
    %c2_i32_118 = arith.constant 2 : i32
    %217 = arith.addi %66, %c2_i32_118 : i32
    %c2_i32_119 = arith.constant 2 : i32
    %218 = arith.muli %c2_i32_119, %217 : i32
    %c0_i32_120 = arith.constant 0 : i32
    %219 = arith.addi %218, %c0_i32_120 : i32
    %220 = arith.index_cast %219 : i32 to index
    %c0_121 = arith.constant 0 : index
    %c0_122 = arith.constant 0 : index
    %c0_123 = arith.constant 0 : index
    %221 = vector.load %arg10[%220, %c0_121, %c0_122, %c0_123] : memref<18x2x9x32xf32, #tpu.memory_space<vmem>>, vector<1x1x8x32xf32>
    %222 = vector.shape_cast %221 : vector<1x1x8x32xf32> to vector<8x32xf32>
    %223 = vector.shape_cast %20 : vector<32xf32> to vector<1x32xf32>
    %224 = vector.broadcast %223 : vector<1x32xf32> to vector<8x32xf32>
    %225 = arith.mulf %222, %224 : vector<8x32xf32>
    %226 = arith.index_cast %219 : i32 to index
    %c1_124 = arith.constant 1 : index
    %c0_125 = arith.constant 0 : index
    %c0_126 = arith.constant 0 : index
    %227 = vector.load %arg10[%226, %c1_124, %c0_125, %c0_126] : memref<18x2x9x32xf32, #tpu.memory_space<vmem>>, vector<1x1x8x32xf32>
    %228 = vector.shape_cast %227 : vector<1x1x8x32xf32> to vector<8x32xf32>
    %229 = vector.shape_cast %22 : vector<32xf32> to vector<1x32xf32>
    %230 = vector.broadcast %229 : vector<1x32xf32> to vector<8x32xf32>
    %231 = arith.mulf %228, %230 : vector<8x32xf32>
    %232 = arith.addf %225, %231 : vector<8x32xf32>
    %233 = arith.index_cast %219 : i32 to index
    %c0_127 = arith.constant 0 : index
    %c1_128 = arith.constant 1 : index
    %c0_129 = arith.constant 0 : index
    %234 = vector.load %arg10[%233, %c0_127, %c1_128, %c0_129] : memref<18x2x9x32xf32, #tpu.memory_space<vmem>>, vector<1x1x8x32xf32>
    %235 = vector.shape_cast %234 : vector<1x1x8x32xf32> to vector<8x32xf32>
    %236 = vector.shape_cast %24 : vector<32xf32> to vector<1x32xf32>
    %237 = vector.broadcast %236 : vector<1x32xf32> to vector<8x32xf32>
    %238 = arith.mulf %235, %237 : vector<8x32xf32>
    %239 = arith.addf %232, %238 : vector<8x32xf32>
    %c2_i32_130 = arith.constant 2 : i32
    %240 = arith.addi %66, %c2_i32_130 : i32
    %c2_i32_131 = arith.constant 2 : i32
    %241 = arith.muli %c2_i32_131, %240 : i32
    %c1_i32_132 = arith.constant 1 : i32
    %242 = arith.addi %241, %c1_i32_132 : i32
    %243 = arith.index_cast %242 : i32 to index
    %c0_133 = arith.constant 0 : index
    %c0_134 = arith.constant 0 : index
    %c0_135 = arith.constant 0 : index
    %244 = vector.load %arg10[%243, %c0_133, %c0_134, %c0_135] : memref<18x2x9x32xf32, #tpu.memory_space<vmem>>, vector<1x1x8x32xf32>
    %245 = vector.shape_cast %244 : vector<1x1x8x32xf32> to vector<8x32xf32>
    %246 = vector.shape_cast %26 : vector<32xf32> to vector<1x32xf32>
    %247 = vector.broadcast %246 : vector<1x32xf32> to vector<8x32xf32>
    %248 = arith.mulf %245, %247 : vector<8x32xf32>
    %249 = arith.addf %239, %248 : vector<8x32xf32>
    %250 = arith.index_cast %242 : i32 to index
    %c1_136 = arith.constant 1 : index
    %c0_137 = arith.constant 0 : index
    %c0_138 = arith.constant 0 : index
    %251 = vector.load %arg10[%250, %c1_136, %c0_137, %c0_138] : memref<18x2x9x32xf32, #tpu.memory_space<vmem>>, vector<1x1x8x32xf32>
    %252 = vector.shape_cast %251 : vector<1x1x8x32xf32> to vector<8x32xf32>
    %253 = vector.shape_cast %28 : vector<32xf32> to vector<1x32xf32>
    %254 = vector.broadcast %253 : vector<1x32xf32> to vector<8x32xf32>
    %255 = arith.mulf %252, %254 : vector<8x32xf32>
    %256 = arith.addf %249, %255 : vector<8x32xf32>
    %257 = arith.index_cast %242 : i32 to index
    %c0_139 = arith.constant 0 : index
    %c1_140 = arith.constant 1 : index
    %c0_141 = arith.constant 0 : index
    %258 = vector.load %arg10[%257, %c0_139, %c1_140, %c0_141] : memref<18x2x9x32xf32, #tpu.memory_space<vmem>>, vector<1x1x8x32xf32>
    %259 = vector.shape_cast %258 : vector<1x1x8x32xf32> to vector<8x32xf32>
    %260 = vector.shape_cast %30 : vector<32xf32> to vector<1x32xf32>
    %261 = vector.broadcast %260 : vector<1x32xf32> to vector<8x32xf32>
    %262 = arith.mulf %259, %261 : vector<8x32xf32>
    %263 = arith.addf %256, %262 : vector<8x32xf32>
    %c2_i32_142 = arith.constant 2 : i32
    %264 = arith.addi %66, %c2_i32_142 : i32
    %c2_i32_143 = arith.constant 2 : i32
    %265 = arith.muli %c2_i32_143, %264 : i32
    %c2_i32_144 = arith.constant 2 : i32
    %266 = arith.addi %265, %c2_i32_144 : i32
    %267 = arith.index_cast %266 : i32 to index
    %c0_145 = arith.constant 0 : index
    %c0_146 = arith.constant 0 : index
    %c0_147 = arith.constant 0 : index
    %268 = vector.load %arg10[%267, %c0_145, %c0_146, %c0_147] : memref<18x2x9x32xf32, #tpu.memory_space<vmem>>, vector<1x1x8x32xf32>
    %269 = vector.shape_cast %268 : vector<1x1x8x32xf32> to vector<8x32xf32>
    %270 = vector.shape_cast %32 : vector<32xf32> to vector<1x32xf32>
    %271 = vector.broadcast %270 : vector<1x32xf32> to vector<8x32xf32>
    %272 = arith.mulf %269, %271 : vector<8x32xf32>
    %273 = arith.addf %263, %272 : vector<8x32xf32>
    %274 = arith.index_cast %266 : i32 to index
    %c1_148 = arith.constant 1 : index
    %c0_149 = arith.constant 0 : index
    %c0_150 = arith.constant 0 : index
    %275 = vector.load %arg10[%274, %c1_148, %c0_149, %c0_150] : memref<18x2x9x32xf32, #tpu.memory_space<vmem>>, vector<1x1x8x32xf32>
    %276 = vector.shape_cast %275 : vector<1x1x8x32xf32> to vector<8x32xf32>
    %277 = vector.shape_cast %34 : vector<32xf32> to vector<1x32xf32>
    %278 = vector.broadcast %277 : vector<1x32xf32> to vector<8x32xf32>
    %279 = arith.mulf %276, %278 : vector<8x32xf32>
    %280 = arith.addf %273, %279 : vector<8x32xf32>
    %281 = arith.index_cast %266 : i32 to index
    %c0_151 = arith.constant 0 : index
    %c1_152 = arith.constant 1 : index
    %c0_153 = arith.constant 0 : index
    %282 = vector.load %arg10[%281, %c0_151, %c1_152, %c0_153] : memref<18x2x9x32xf32, #tpu.memory_space<vmem>>, vector<1x1x8x32xf32>
    %283 = vector.shape_cast %282 : vector<1x1x8x32xf32> to vector<8x32xf32>
    %284 = vector.shape_cast %36 : vector<32xf32> to vector<1x32xf32>
    %285 = vector.broadcast %284 : vector<1x32xf32> to vector<8x32xf32>
    %286 = arith.mulf %283, %285 : vector<8x32xf32>
    %287 = arith.addf %280, %286 : vector<8x32xf32>
    %288 = vector.broadcast %16 : vector<1x32xf32> to vector<8x32xf32>
    %289 = arith.addf %287, %288 : vector<8x32xf32>
    %cst_154 = arith.constant 0.000000e+00 : f32
    %290 = vector.broadcast %cst_154 : f32 to vector<8x32xf32>
    %291 = arith.maximumf %289, %290 : vector<8x32xf32>
    %c3_i32 = arith.constant 3 : i32
    %292 = arith.addi %66, %c3_i32 : i32
    %c2_i32_155 = arith.constant 2 : i32
    %293 = arith.muli %c2_i32_155, %292 : i32
    %c0_i32_156 = arith.constant 0 : i32
    %294 = arith.addi %293, %c0_i32_156 : i32
    %295 = arith.index_cast %294 : i32 to index
    %c0_157 = arith.constant 0 : index
    %c0_158 = arith.constant 0 : index
    %c0_159 = arith.constant 0 : index
    %296 = vector.load %arg10[%295, %c0_157, %c0_158, %c0_159] : memref<18x2x9x32xf32, #tpu.memory_space<vmem>>, vector<1x1x8x32xf32>
    %297 = vector.shape_cast %296 : vector<1x1x8x32xf32> to vector<8x32xf32>
    %298 = vector.shape_cast %20 : vector<32xf32> to vector<1x32xf32>
    %299 = vector.broadcast %298 : vector<1x32xf32> to vector<8x32xf32>
    %300 = arith.mulf %297, %299 : vector<8x32xf32>
    %301 = arith.index_cast %294 : i32 to index
    %c1_160 = arith.constant 1 : index
    %c0_161 = arith.constant 0 : index
    %c0_162 = arith.constant 0 : index
    %302 = vector.load %arg10[%301, %c1_160, %c0_161, %c0_162] : memref<18x2x9x32xf32, #tpu.memory_space<vmem>>, vector<1x1x8x32xf32>
    %303 = vector.shape_cast %302 : vector<1x1x8x32xf32> to vector<8x32xf32>
    %304 = vector.shape_cast %22 : vector<32xf32> to vector<1x32xf32>
    %305 = vector.broadcast %304 : vector<1x32xf32> to vector<8x32xf32>
    %306 = arith.mulf %303, %305 : vector<8x32xf32>
    %307 = arith.addf %300, %306 : vector<8x32xf32>
    %308 = arith.index_cast %294 : i32 to index
    %c0_163 = arith.constant 0 : index
    %c1_164 = arith.constant 1 : index
    %c0_165 = arith.constant 0 : index
    %309 = vector.load %arg10[%308, %c0_163, %c1_164, %c0_165] : memref<18x2x9x32xf32, #tpu.memory_space<vmem>>, vector<1x1x8x32xf32>
    %310 = vector.shape_cast %309 : vector<1x1x8x32xf32> to vector<8x32xf32>
    %311 = vector.shape_cast %24 : vector<32xf32> to vector<1x32xf32>
    %312 = vector.broadcast %311 : vector<1x32xf32> to vector<8x32xf32>
    %313 = arith.mulf %310, %312 : vector<8x32xf32>
    %314 = arith.addf %307, %313 : vector<8x32xf32>
    %c3_i32_166 = arith.constant 3 : i32
    %315 = arith.addi %66, %c3_i32_166 : i32
    %c2_i32_167 = arith.constant 2 : i32
    %316 = arith.muli %c2_i32_167, %315 : i32
    %c1_i32_168 = arith.constant 1 : i32
    %317 = arith.addi %316, %c1_i32_168 : i32
    %318 = arith.index_cast %317 : i32 to index
    %c0_169 = arith.constant 0 : index
    %c0_170 = arith.constant 0 : index
    %c0_171 = arith.constant 0 : index
    %319 = vector.load %arg10[%318, %c0_169, %c0_170, %c0_171] : memref<18x2x9x32xf32, #tpu.memory_space<vmem>>, vector<1x1x8x32xf32>
    %320 = vector.shape_cast %319 : vector<1x1x8x32xf32> to vector<8x32xf32>
    %321 = vector.shape_cast %26 : vector<32xf32> to vector<1x32xf32>
    %322 = vector.broadcast %321 : vector<1x32xf32> to vector<8x32xf32>
    %323 = arith.mulf %320, %322 : vector<8x32xf32>
    %324 = arith.addf %314, %323 : vector<8x32xf32>
    %325 = arith.index_cast %317 : i32 to index
    %c1_172 = arith.constant 1 : index
    %c0_173 = arith.constant 0 : index
    %c0_174 = arith.constant 0 : index
    %326 = vector.load %arg10[%325, %c1_172, %c0_173, %c0_174] : memref<18x2x9x32xf32, #tpu.memory_space<vmem>>, vector<1x1x8x32xf32>
    %327 = vector.shape_cast %326 : vector<1x1x8x32xf32> to vector<8x32xf32>
    %328 = vector.shape_cast %28 : vector<32xf32> to vector<1x32xf32>
    %329 = vector.broadcast %328 : vector<1x32xf32> to vector<8x32xf32>
    %330 = arith.mulf %327, %329 : vector<8x32xf32>
    %331 = arith.addf %324, %330 : vector<8x32xf32>
    %332 = arith.index_cast %317 : i32 to index
    %c0_175 = arith.constant 0 : index
    %c1_176 = arith.constant 1 : index
    %c0_177 = arith.constant 0 : index
    %333 = vector.load %arg10[%332, %c0_175, %c1_176, %c0_177] : memref<18x2x9x32xf32, #tpu.memory_space<vmem>>, vector<1x1x8x32xf32>
    %334 = vector.shape_cast %333 : vector<1x1x8x32xf32> to vector<8x32xf32>
    %335 = vector.shape_cast %30 : vector<32xf32> to vector<1x32xf32>
    %336 = vector.broadcast %335 : vector<1x32xf32> to vector<8x32xf32>
    %337 = arith.mulf %334, %336 : vector<8x32xf32>
    %338 = arith.addf %331, %337 : vector<8x32xf32>
    %c3_i32_178 = arith.constant 3 : i32
    %339 = arith.addi %66, %c3_i32_178 : i32
    %c2_i32_179 = arith.constant 2 : i32
    %340 = arith.muli %c2_i32_179, %339 : i32
    %c2_i32_180 = arith.constant 2 : i32
    %341 = arith.addi %340, %c2_i32_180 : i32
    %342 = arith.index_cast %341 : i32 to index
    %c0_181 = arith.constant 0 : index
    %c0_182 = arith.constant 0 : index
    %c0_183 = arith.constant 0 : index
    %343 = vector.load %arg10[%342, %c0_181, %c0_182, %c0_183] : memref<18x2x9x32xf32, #tpu.memory_space<vmem>>, vector<1x1x8x32xf32>
    %344 = vector.shape_cast %343 : vector<1x1x8x32xf32> to vector<8x32xf32>
    %345 = vector.shape_cast %32 : vector<32xf32> to vector<1x32xf32>
    %346 = vector.broadcast %345 : vector<1x32xf32> to vector<8x32xf32>
    %347 = arith.mulf %344, %346 : vector<8x32xf32>
    %348 = arith.addf %338, %347 : vector<8x32xf32>
    %349 = arith.index_cast %341 : i32 to index
    %c1_184 = arith.constant 1 : index
    %c0_185 = arith.constant 0 : index
    %c0_186 = arith.constant 0 : index
    %350 = vector.load %arg10[%349, %c1_184, %c0_185, %c0_186] : memref<18x2x9x32xf32, #tpu.memory_space<vmem>>, vector<1x1x8x32xf32>
    %351 = vector.shape_cast %350 : vector<1x1x8x32xf32> to vector<8x32xf32>
    %352 = vector.shape_cast %34 : vector<32xf32> to vector<1x32xf32>
    %353 = vector.broadcast %352 : vector<1x32xf32> to vector<8x32xf32>
    %354 = arith.mulf %351, %353 : vector<8x32xf32>
    %355 = arith.addf %348, %354 : vector<8x32xf32>
    %356 = arith.index_cast %341 : i32 to index
    %c0_187 = arith.constant 0 : index
    %c1_188 = arith.constant 1 : index
    %c0_189 = arith.constant 0 : index
    %357 = vector.load %arg10[%356, %c0_187, %c1_188, %c0_189] : memref<18x2x9x32xf32, #tpu.memory_space<vmem>>, vector<1x1x8x32xf32>
    %358 = vector.shape_cast %357 : vector<1x1x8x32xf32> to vector<8x32xf32>
    %359 = vector.shape_cast %36 : vector<32xf32> to vector<1x32xf32>
    %360 = vector.broadcast %359 : vector<1x32xf32> to vector<8x32xf32>
    %361 = arith.mulf %358, %360 : vector<8x32xf32>
    %362 = arith.addf %355, %361 : vector<8x32xf32>
    %363 = vector.broadcast %16 : vector<1x32xf32> to vector<8x32xf32>
    %364 = arith.addf %362, %363 : vector<8x32xf32>
    %cst_190 = arith.constant 0.000000e+00 : f32
    %365 = vector.broadcast %cst_190 : f32 to vector<8x32xf32>
    %366 = arith.maximumf %364, %365 : vector<8x32xf32>
    %c4_i32 = arith.constant 4 : i32
    %367 = arith.addi %66, %c4_i32 : i32
    %c2_i32_191 = arith.constant 2 : i32
    %368 = arith.muli %c2_i32_191, %367 : i32
    %c0_i32_192 = arith.constant 0 : i32
    %369 = arith.addi %368, %c0_i32_192 : i32
    %370 = arith.index_cast %369 : i32 to index
    %c0_193 = arith.constant 0 : index
    %c0_194 = arith.constant 0 : index
    %c0_195 = arith.constant 0 : index
    %371 = vector.load %arg10[%370, %c0_193, %c0_194, %c0_195] : memref<18x2x9x32xf32, #tpu.memory_space<vmem>>, vector<1x1x8x32xf32>
    %372 = vector.shape_cast %371 : vector<1x1x8x32xf32> to vector<8x32xf32>
    %373 = vector.shape_cast %20 : vector<32xf32> to vector<1x32xf32>
    %374 = vector.broadcast %373 : vector<1x32xf32> to vector<8x32xf32>
    %375 = arith.mulf %372, %374 : vector<8x32xf32>
    %376 = arith.index_cast %369 : i32 to index
    %c1_196 = arith.constant 1 : index
    %c0_197 = arith.constant 0 : index
    %c0_198 = arith.constant 0 : index
    %377 = vector.load %arg10[%376, %c1_196, %c0_197, %c0_198] : memref<18x2x9x32xf32, #tpu.memory_space<vmem>>, vector<1x1x8x32xf32>
    %378 = vector.shape_cast %377 : vector<1x1x8x32xf32> to vector<8x32xf32>
    %379 = vector.shape_cast %22 : vector<32xf32> to vector<1x32xf32>
    %380 = vector.broadcast %379 : vector<1x32xf32> to vector<8x32xf32>
    %381 = arith.mulf %378, %380 : vector<8x32xf32>
    %382 = arith.addf %375, %381 : vector<8x32xf32>
    %383 = arith.index_cast %369 : i32 to index
    %c0_199 = arith.constant 0 : index
    %c1_200 = arith.constant 1 : index
    %c0_201 = arith.constant 0 : index
    %384 = vector.load %arg10[%383, %c0_199, %c1_200, %c0_201] : memref<18x2x9x32xf32, #tpu.memory_space<vmem>>, vector<1x1x8x32xf32>
    %385 = vector.shape_cast %384 : vector<1x1x8x32xf32> to vector<8x32xf32>
    %386 = vector.shape_cast %24 : vector<32xf32> to vector<1x32xf32>
    %387 = vector.broadcast %386 : vector<1x32xf32> to vector<8x32xf32>
    %388 = arith.mulf %385, %387 : vector<8x32xf32>
    %389 = arith.addf %382, %388 : vector<8x32xf32>
    %c4_i32_202 = arith.constant 4 : i32
    %390 = arith.addi %66, %c4_i32_202 : i32
    %c2_i32_203 = arith.constant 2 : i32
    %391 = arith.muli %c2_i32_203, %390 : i32
    %c1_i32_204 = arith.constant 1 : i32
    %392 = arith.addi %391, %c1_i32_204 : i32
    %393 = arith.index_cast %392 : i32 to index
    %c0_205 = arith.constant 0 : index
    %c0_206 = arith.constant 0 : index
    %c0_207 = arith.constant 0 : index
    %394 = vector.load %arg10[%393, %c0_205, %c0_206, %c0_207] : memref<18x2x9x32xf32, #tpu.memory_space<vmem>>, vector<1x1x8x32xf32>
    %395 = vector.shape_cast %394 : vector<1x1x8x32xf32> to vector<8x32xf32>
    %396 = vector.shape_cast %26 : vector<32xf32> to vector<1x32xf32>
    %397 = vector.broadcast %396 : vector<1x32xf32> to vector<8x32xf32>
    %398 = arith.mulf %395, %397 : vector<8x32xf32>
    %399 = arith.addf %389, %398 : vector<8x32xf32>
    %400 = arith.index_cast %392 : i32 to index
    %c1_208 = arith.constant 1 : index
    %c0_209 = arith.constant 0 : index
    %c0_210 = arith.constant 0 : index
    %401 = vector.load %arg10[%400, %c1_208, %c0_209, %c0_210] : memref<18x2x9x32xf32, #tpu.memory_space<vmem>>, vector<1x1x8x32xf32>
    %402 = vector.shape_cast %401 : vector<1x1x8x32xf32> to vector<8x32xf32>
    %403 = vector.shape_cast %28 : vector<32xf32> to vector<1x32xf32>
    %404 = vector.broadcast %403 : vector<1x32xf32> to vector<8x32xf32>
    %405 = arith.mulf %402, %404 : vector<8x32xf32>
    %406 = arith.addf %399, %405 : vector<8x32xf32>
    %407 = arith.index_cast %392 : i32 to index
    %c0_211 = arith.constant 0 : index
    %c1_212 = arith.constant 1 : index
    %c0_213 = arith.constant 0 : index
    %408 = vector.load %arg10[%407, %c0_211, %c1_212, %c0_213] : memref<18x2x9x32xf32, #tpu.memory_space<vmem>>, vector<1x1x8x32xf32>
    %409 = vector.shape_cast %408 : vector<1x1x8x32xf32> to vector<8x32xf32>
    %410 = vector.shape_cast %30 : vector<32xf32> to vector<1x32xf32>
    %411 = vector.broadcast %410 : vector<1x32xf32> to vector<8x32xf32>
    %412 = arith.mulf %409, %411 : vector<8x32xf32>
    %413 = arith.addf %406, %412 : vector<8x32xf32>
    %c4_i32_214 = arith.constant 4 : i32
    %414 = arith.addi %66, %c4_i32_214 : i32
    %c2_i32_215 = arith.constant 2 : i32
    %415 = arith.muli %c2_i32_215, %414 : i32
    %c2_i32_216 = arith.constant 2 : i32
    %416 = arith.addi %415, %c2_i32_216 : i32
    %417 = arith.index_cast %416 : i32 to index
    %c0_217 = arith.constant 0 : index
    %c0_218 = arith.constant 0 : index
    %c0_219 = arith.constant 0 : index
    %418 = vector.load %arg10[%417, %c0_217, %c0_218, %c0_219] : memref<18x2x9x32xf32, #tpu.memory_space<vmem>>, vector<1x1x8x32xf32>
    %419 = vector.shape_cast %418 : vector<1x1x8x32xf32> to vector<8x32xf32>
    %420 = vector.shape_cast %32 : vector<32xf32> to vector<1x32xf32>
    %421 = vector.broadcast %420 : vector<1x32xf32> to vector<8x32xf32>
    %422 = arith.mulf %419, %421 : vector<8x32xf32>
    %423 = arith.addf %413, %422 : vector<8x32xf32>
    %424 = arith.index_cast %416 : i32 to index
    %c1_220 = arith.constant 1 : index
    %c0_221 = arith.constant 0 : index
    %c0_222 = arith.constant 0 : index
    %425 = vector.load %arg10[%424, %c1_220, %c0_221, %c0_222] : memref<18x2x9x32xf32, #tpu.memory_space<vmem>>, vector<1x1x8x32xf32>
    %426 = vector.shape_cast %425 : vector<1x1x8x32xf32> to vector<8x32xf32>
    %427 = vector.shape_cast %34 : vector<32xf32> to vector<1x32xf32>
    %428 = vector.broadcast %427 : vector<1x32xf32> to vector<8x32xf32>
    %429 = arith.mulf %426, %428 : vector<8x32xf32>
    %430 = arith.addf %423, %429 : vector<8x32xf32>
    %431 = arith.index_cast %416 : i32 to index
    %c0_223 = arith.constant 0 : index
    %c1_224 = arith.constant 1 : index
    %c0_225 = arith.constant 0 : index
    %432 = vector.load %arg10[%431, %c0_223, %c1_224, %c0_225] : memref<18x2x9x32xf32, #tpu.memory_space<vmem>>, vector<1x1x8x32xf32>
    %433 = vector.shape_cast %432 : vector<1x1x8x32xf32> to vector<8x32xf32>
    %434 = vector.shape_cast %36 : vector<32xf32> to vector<1x32xf32>
    %435 = vector.broadcast %434 : vector<1x32xf32> to vector<8x32xf32>
    %436 = arith.mulf %433, %435 : vector<8x32xf32>
    %437 = arith.addf %430, %436 : vector<8x32xf32>
    %438 = vector.broadcast %16 : vector<1x32xf32> to vector<8x32xf32>
    %439 = arith.addf %437, %438 : vector<8x32xf32>
    %cst_226 = arith.constant 0.000000e+00 : f32
    %440 = vector.broadcast %cst_226 : f32 to vector<8x32xf32>
    %441 = arith.maximumf %439, %440 : vector<8x32xf32>
    %c5_i32 = arith.constant 5 : i32
    %442 = arith.addi %66, %c5_i32 : i32
    %c2_i32_227 = arith.constant 2 : i32
    %443 = arith.muli %c2_i32_227, %442 : i32
    %c0_i32_228 = arith.constant 0 : i32
    %444 = arith.addi %443, %c0_i32_228 : i32
    %445 = arith.index_cast %444 : i32 to index
    %c0_229 = arith.constant 0 : index
    %c0_230 = arith.constant 0 : index
    %c0_231 = arith.constant 0 : index
    %446 = vector.load %arg10[%445, %c0_229, %c0_230, %c0_231] : memref<18x2x9x32xf32, #tpu.memory_space<vmem>>, vector<1x1x8x32xf32>
    %447 = vector.shape_cast %446 : vector<1x1x8x32xf32> to vector<8x32xf32>
    %448 = vector.shape_cast %20 : vector<32xf32> to vector<1x32xf32>
    %449 = vector.broadcast %448 : vector<1x32xf32> to vector<8x32xf32>
    %450 = arith.mulf %447, %449 : vector<8x32xf32>
    %451 = arith.index_cast %444 : i32 to index
    %c1_232 = arith.constant 1 : index
    %c0_233 = arith.constant 0 : index
    %c0_234 = arith.constant 0 : index
    %452 = vector.load %arg10[%451, %c1_232, %c0_233, %c0_234] : memref<18x2x9x32xf32, #tpu.memory_space<vmem>>, vector<1x1x8x32xf32>
    %453 = vector.shape_cast %452 : vector<1x1x8x32xf32> to vector<8x32xf32>
    %454 = vector.shape_cast %22 : vector<32xf32> to vector<1x32xf32>
    %455 = vector.broadcast %454 : vector<1x32xf32> to vector<8x32xf32>
    %456 = arith.mulf %453, %455 : vector<8x32xf32>
    %457 = arith.addf %450, %456 : vector<8x32xf32>
    %458 = arith.index_cast %444 : i32 to index
    %c0_235 = arith.constant 0 : index
    %c1_236 = arith.constant 1 : index
    %c0_237 = arith.constant 0 : index
    %459 = vector.load %arg10[%458, %c0_235, %c1_236, %c0_237] : memref<18x2x9x32xf32, #tpu.memory_space<vmem>>, vector<1x1x8x32xf32>
    %460 = vector.shape_cast %459 : vector<1x1x8x32xf32> to vector<8x32xf32>
    %461 = vector.shape_cast %24 : vector<32xf32> to vector<1x32xf32>
    %462 = vector.broadcast %461 : vector<1x32xf32> to vector<8x32xf32>
    %463 = arith.mulf %460, %462 : vector<8x32xf32>
    %464 = arith.addf %457, %463 : vector<8x32xf32>
    %c5_i32_238 = arith.constant 5 : i32
    %465 = arith.addi %66, %c5_i32_238 : i32
    %c2_i32_239 = arith.constant 2 : i32
    %466 = arith.muli %c2_i32_239, %465 : i32
    %c1_i32_240 = arith.constant 1 : i32
    %467 = arith.addi %466, %c1_i32_240 : i32
    %468 = arith.index_cast %467 : i32 to index
    %c0_241 = arith.constant 0 : index
    %c0_242 = arith.constant 0 : index
    %c0_243 = arith.constant 0 : index
    %469 = vector.load %arg10[%468, %c0_241, %c0_242, %c0_243] : memref<18x2x9x32xf32, #tpu.memory_space<vmem>>, vector<1x1x8x32xf32>
    %470 = vector.shape_cast %469 : vector<1x1x8x32xf32> to vector<8x32xf32>
    %471 = vector.shape_cast %26 : vector<32xf32> to vector<1x32xf32>
    %472 = vector.broadcast %471 : vector<1x32xf32> to vector<8x32xf32>
    %473 = arith.mulf %470, %472 : vector<8x32xf32>
    %474 = arith.addf %464, %473 : vector<8x32xf32>
    %475 = arith.index_cast %467 : i32 to index
    %c1_244 = arith.constant 1 : index
    %c0_245 = arith.constant 0 : index
    %c0_246 = arith.constant 0 : index
    %476 = vector.load %arg10[%475, %c1_244, %c0_245, %c0_246] : memref<18x2x9x32xf32, #tpu.memory_space<vmem>>, vector<1x1x8x32xf32>
    %477 = vector.shape_cast %476 : vector<1x1x8x32xf32> to vector<8x32xf32>
    %478 = vector.shape_cast %28 : vector<32xf32> to vector<1x32xf32>
    %479 = vector.broadcast %478 : vector<1x32xf32> to vector<8x32xf32>
    %480 = arith.mulf %477, %479 : vector<8x32xf32>
    %481 = arith.addf %474, %480 : vector<8x32xf32>
    %482 = arith.index_cast %467 : i32 to index
    %c0_247 = arith.constant 0 : index
    %c1_248 = arith.constant 1 : index
    %c0_249 = arith.constant 0 : index
    %483 = vector.load %arg10[%482, %c0_247, %c1_248, %c0_249] : memref<18x2x9x32xf32, #tpu.memory_space<vmem>>, vector<1x1x8x32xf32>
    %484 = vector.shape_cast %483 : vector<1x1x8x32xf32> to vector<8x32xf32>
    %485 = vector.shape_cast %30 : vector<32xf32> to vector<1x32xf32>
    %486 = vector.broadcast %485 : vector<1x32xf32> to vector<8x32xf32>
    %487 = arith.mulf %484, %486 : vector<8x32xf32>
    %488 = arith.addf %481, %487 : vector<8x32xf32>
    %c5_i32_250 = arith.constant 5 : i32
    %489 = arith.addi %66, %c5_i32_250 : i32
    %c2_i32_251 = arith.constant 2 : i32
    %490 = arith.muli %c2_i32_251, %489 : i32
    %c2_i32_252 = arith.constant 2 : i32
    %491 = arith.addi %490, %c2_i32_252 : i32
    %492 = arith.index_cast %491 : i32 to index
    %c0_253 = arith.constant 0 : index
    %c0_254 = arith.constant 0 : index
    %c0_255 = arith.constant 0 : index
    %493 = vector.load %arg10[%492, %c0_253, %c0_254, %c0_255] : memref<18x2x9x32xf32, #tpu.memory_space<vmem>>, vector<1x1x8x32xf32>
    %494 = vector.shape_cast %493 : vector<1x1x8x32xf32> to vector<8x32xf32>
    %495 = vector.shape_cast %32 : vector<32xf32> to vector<1x32xf32>
    %496 = vector.broadcast %495 : vector<1x32xf32> to vector<8x32xf32>
    %497 = arith.mulf %494, %496 : vector<8x32xf32>
    %498 = arith.addf %488, %497 : vector<8x32xf32>
    %499 = arith.index_cast %491 : i32 to index
    %c1_256 = arith.constant 1 : index
    %c0_257 = arith.constant 0 : index
    %c0_258 = arith.constant 0 : index
    %500 = vector.load %arg10[%499, %c1_256, %c0_257, %c0_258] : memref<18x2x9x32xf32, #tpu.memory_space<vmem>>, vector<1x1x8x32xf32>
    %501 = vector.shape_cast %500 : vector<1x1x8x32xf32> to vector<8x32xf32>
    %502 = vector.shape_cast %34 : vector<32xf32> to vector<1x32xf32>
    %503 = vector.broadcast %502 : vector<1x32xf32> to vector<8x32xf32>
    %504 = arith.mulf %501, %503 : vector<8x32xf32>
    %505 = arith.addf %498, %504 : vector<8x32xf32>
    %506 = arith.index_cast %491 : i32 to index
    %c0_259 = arith.constant 0 : index
    %c1_260 = arith.constant 1 : index
    %c0_261 = arith.constant 0 : index
    %507 = vector.load %arg10[%506, %c0_259, %c1_260, %c0_261] : memref<18x2x9x32xf32, #tpu.memory_space<vmem>>, vector<1x1x8x32xf32>
    %508 = vector.shape_cast %507 : vector<1x1x8x32xf32> to vector<8x32xf32>
    %509 = vector.shape_cast %36 : vector<32xf32> to vector<1x32xf32>
    %510 = vector.broadcast %509 : vector<1x32xf32> to vector<8x32xf32>
    %511 = arith.mulf %508, %510 : vector<8x32xf32>
    %512 = arith.addf %505, %511 : vector<8x32xf32>
    %513 = vector.broadcast %16 : vector<1x32xf32> to vector<8x32xf32>
    %514 = arith.addf %512, %513 : vector<8x32xf32>
    %cst_262 = arith.constant 0.000000e+00 : f32
    %515 = vector.broadcast %cst_262 : f32 to vector<8x32xf32>
    %516 = arith.maximumf %514, %515 : vector<8x32xf32>
    %c6_i32 = arith.constant 6 : i32
    %517 = arith.addi %66, %c6_i32 : i32
    %c2_i32_263 = arith.constant 2 : i32
    %518 = arith.muli %c2_i32_263, %517 : i32
    %c0_i32_264 = arith.constant 0 : i32
    %519 = arith.addi %518, %c0_i32_264 : i32
    %520 = arith.index_cast %519 : i32 to index
    %c0_265 = arith.constant 0 : index
    %c0_266 = arith.constant 0 : index
    %c0_267 = arith.constant 0 : index
    %521 = vector.load %arg10[%520, %c0_265, %c0_266, %c0_267] : memref<18x2x9x32xf32, #tpu.memory_space<vmem>>, vector<1x1x8x32xf32>
    %522 = vector.shape_cast %521 : vector<1x1x8x32xf32> to vector<8x32xf32>
    %523 = vector.shape_cast %20 : vector<32xf32> to vector<1x32xf32>
    %524 = vector.broadcast %523 : vector<1x32xf32> to vector<8x32xf32>
    %525 = arith.mulf %522, %524 : vector<8x32xf32>
    %526 = arith.index_cast %519 : i32 to index
    %c1_268 = arith.constant 1 : index
    %c0_269 = arith.constant 0 : index
    %c0_270 = arith.constant 0 : index
    %527 = vector.load %arg10[%526, %c1_268, %c0_269, %c0_270] : memref<18x2x9x32xf32, #tpu.memory_space<vmem>>, vector<1x1x8x32xf32>
    %528 = vector.shape_cast %527 : vector<1x1x8x32xf32> to vector<8x32xf32>
    %529 = vector.shape_cast %22 : vector<32xf32> to vector<1x32xf32>
    %530 = vector.broadcast %529 : vector<1x32xf32> to vector<8x32xf32>
    %531 = arith.mulf %528, %530 : vector<8x32xf32>
    %532 = arith.addf %525, %531 : vector<8x32xf32>
    %533 = arith.index_cast %519 : i32 to index
    %c0_271 = arith.constant 0 : index
    %c1_272 = arith.constant 1 : index
    %c0_273 = arith.constant 0 : index
    %534 = vector.load %arg10[%533, %c0_271, %c1_272, %c0_273] : memref<18x2x9x32xf32, #tpu.memory_space<vmem>>, vector<1x1x8x32xf32>
    %535 = vector.shape_cast %534 : vector<1x1x8x32xf32> to vector<8x32xf32>
    %536 = vector.shape_cast %24 : vector<32xf32> to vector<1x32xf32>
    %537 = vector.broadcast %536 : vector<1x32xf32> to vector<8x32xf32>
    %538 = arith.mulf %535, %537 : vector<8x32xf32>
    %539 = arith.addf %532, %538 : vector<8x32xf32>
    %c6_i32_274 = arith.constant 6 : i32
    %540 = arith.addi %66, %c6_i32_274 : i32
    %c2_i32_275 = arith.constant 2 : i32
    %541 = arith.muli %c2_i32_275, %540 : i32
    %c1_i32_276 = arith.constant 1 : i32
    %542 = arith.addi %541, %c1_i32_276 : i32
    %543 = arith.index_cast %542 : i32 to index
    %c0_277 = arith.constant 0 : index
    %c0_278 = arith.constant 0 : index
    %c0_279 = arith.constant 0 : index
    %544 = vector.load %arg10[%543, %c0_277, %c0_278, %c0_279] : memref<18x2x9x32xf32, #tpu.memory_space<vmem>>, vector<1x1x8x32xf32>
    %545 = vector.shape_cast %544 : vector<1x1x8x32xf32> to vector<8x32xf32>
    %546 = vector.shape_cast %26 : vector<32xf32> to vector<1x32xf32>
    %547 = vector.broadcast %546 : vector<1x32xf32> to vector<8x32xf32>
    %548 = arith.mulf %545, %547 : vector<8x32xf32>
    %549 = arith.addf %539, %548 : vector<8x32xf32>
    %550 = arith.index_cast %542 : i32 to index
    %c1_280 = arith.constant 1 : index
    %c0_281 = arith.constant 0 : index
    %c0_282 = arith.constant 0 : index
    %551 = vector.load %arg10[%550, %c1_280, %c0_281, %c0_282] : memref<18x2x9x32xf32, #tpu.memory_space<vmem>>, vector<1x1x8x32xf32>
    %552 = vector.shape_cast %551 : vector<1x1x8x32xf32> to vector<8x32xf32>
    %553 = vector.shape_cast %28 : vector<32xf32> to vector<1x32xf32>
    %554 = vector.broadcast %553 : vector<1x32xf32> to vector<8x32xf32>
    %555 = arith.mulf %552, %554 : vector<8x32xf32>
    %556 = arith.addf %549, %555 : vector<8x32xf32>
    %557 = arith.index_cast %542 : i32 to index
    %c0_283 = arith.constant 0 : index
    %c1_284 = arith.constant 1 : index
    %c0_285 = arith.constant 0 : index
    %558 = vector.load %arg10[%557, %c0_283, %c1_284, %c0_285] : memref<18x2x9x32xf32, #tpu.memory_space<vmem>>, vector<1x1x8x32xf32>
    %559 = vector.shape_cast %558 : vector<1x1x8x32xf32> to vector<8x32xf32>
    %560 = vector.shape_cast %30 : vector<32xf32> to vector<1x32xf32>
    %561 = vector.broadcast %560 : vector<1x32xf32> to vector<8x32xf32>
    %562 = arith.mulf %559, %561 : vector<8x32xf32>
    %563 = arith.addf %556, %562 : vector<8x32xf32>
    %c6_i32_286 = arith.constant 6 : i32
    %564 = arith.addi %66, %c6_i32_286 : i32
    %c2_i32_287 = arith.constant 2 : i32
    %565 = arith.muli %c2_i32_287, %564 : i32
    %c2_i32_288 = arith.constant 2 : i32
    %566 = arith.addi %565, %c2_i32_288 : i32
    %567 = arith.index_cast %566 : i32 to index
    %c0_289 = arith.constant 0 : index
    %c0_290 = arith.constant 0 : index
    %c0_291 = arith.constant 0 : index
    %568 = vector.load %arg10[%567, %c0_289, %c0_290, %c0_291] : memref<18x2x9x32xf32, #tpu.memory_space<vmem>>, vector<1x1x8x32xf32>
    %569 = vector.shape_cast %568 : vector<1x1x8x32xf32> to vector<8x32xf32>
    %570 = vector.shape_cast %32 : vector<32xf32> to vector<1x32xf32>
    %571 = vector.broadcast %570 : vector<1x32xf32> to vector<8x32xf32>
    %572 = arith.mulf %569, %571 : vector<8x32xf32>
    %573 = arith.addf %563, %572 : vector<8x32xf32>
    %574 = arith.index_cast %566 : i32 to index
    %c1_292 = arith.constant 1 : index
    %c0_293 = arith.constant 0 : index
    %c0_294 = arith.constant 0 : index
    %575 = vector.load %arg10[%574, %c1_292, %c0_293, %c0_294] : memref<18x2x9x32xf32, #tpu.memory_space<vmem>>, vector<1x1x8x32xf32>
    %576 = vector.shape_cast %575 : vector<1x1x8x32xf32> to vector<8x32xf32>
    %577 = vector.shape_cast %34 : vector<32xf32> to vector<1x32xf32>
    %578 = vector.broadcast %577 : vector<1x32xf32> to vector<8x32xf32>
    %579 = arith.mulf %576, %578 : vector<8x32xf32>
    %580 = arith.addf %573, %579 : vector<8x32xf32>
    %581 = arith.index_cast %566 : i32 to index
    %c0_295 = arith.constant 0 : index
    %c1_296 = arith.constant 1 : index
    %c0_297 = arith.constant 0 : index
    %582 = vector.load %arg10[%581, %c0_295, %c1_296, %c0_297] : memref<18x2x9x32xf32, #tpu.memory_space<vmem>>, vector<1x1x8x32xf32>
    %583 = vector.shape_cast %582 : vector<1x1x8x32xf32> to vector<8x32xf32>
    %584 = vector.shape_cast %36 : vector<32xf32> to vector<1x32xf32>
    %585 = vector.broadcast %584 : vector<1x32xf32> to vector<8x32xf32>
    %586 = arith.mulf %583, %585 : vector<8x32xf32>
    %587 = arith.addf %580, %586 : vector<8x32xf32>
    %588 = vector.broadcast %16 : vector<1x32xf32> to vector<8x32xf32>
    %589 = arith.addf %587, %588 : vector<8x32xf32>
    %cst_298 = arith.constant 0.000000e+00 : f32
    %590 = vector.broadcast %cst_298 : f32 to vector<8x32xf32>
    %591 = arith.maximumf %589, %590 : vector<8x32xf32>
    %c7_i32 = arith.constant 7 : i32
    %592 = arith.addi %66, %c7_i32 : i32
    %c2_i32_299 = arith.constant 2 : i32
    %593 = arith.muli %c2_i32_299, %592 : i32
    %c0_i32_300 = arith.constant 0 : i32
    %594 = arith.addi %593, %c0_i32_300 : i32
    %595 = arith.index_cast %594 : i32 to index
    %c0_301 = arith.constant 0 : index
    %c0_302 = arith.constant 0 : index
    %c0_303 = arith.constant 0 : index
    %596 = vector.load %arg10[%595, %c0_301, %c0_302, %c0_303] : memref<18x2x9x32xf32, #tpu.memory_space<vmem>>, vector<1x1x8x32xf32>
    %597 = vector.shape_cast %596 : vector<1x1x8x32xf32> to vector<8x32xf32>
    %598 = vector.shape_cast %20 : vector<32xf32> to vector<1x32xf32>
    %599 = vector.broadcast %598 : vector<1x32xf32> to vector<8x32xf32>
    %600 = arith.mulf %597, %599 : vector<8x32xf32>
    %601 = arith.index_cast %594 : i32 to index
    %c1_304 = arith.constant 1 : index
    %c0_305 = arith.constant 0 : index
    %c0_306 = arith.constant 0 : index
    %602 = vector.load %arg10[%601, %c1_304, %c0_305, %c0_306] : memref<18x2x9x32xf32, #tpu.memory_space<vmem>>, vector<1x1x8x32xf32>
    %603 = vector.shape_cast %602 : vector<1x1x8x32xf32> to vector<8x32xf32>
    %604 = vector.shape_cast %22 : vector<32xf32> to vector<1x32xf32>
    %605 = vector.broadcast %604 : vector<1x32xf32> to vector<8x32xf32>
    %606 = arith.mulf %603, %605 : vector<8x32xf32>
    %607 = arith.addf %600, %606 : vector<8x32xf32>
    %608 = arith.index_cast %594 : i32 to index
    %c0_307 = arith.constant 0 : index
    %c1_308 = arith.constant 1 : index
    %c0_309 = arith.constant 0 : index
    %609 = vector.load %arg10[%608, %c0_307, %c1_308, %c0_309] : memref<18x2x9x32xf32, #tpu.memory_space<vmem>>, vector<1x1x8x32xf32>
    %610 = vector.shape_cast %609 : vector<1x1x8x32xf32> to vector<8x32xf32>
    %611 = vector.shape_cast %24 : vector<32xf32> to vector<1x32xf32>
    %612 = vector.broadcast %611 : vector<1x32xf32> to vector<8x32xf32>
    %613 = arith.mulf %610, %612 : vector<8x32xf32>
    %614 = arith.addf %607, %613 : vector<8x32xf32>
    %c7_i32_310 = arith.constant 7 : i32
    %615 = arith.addi %66, %c7_i32_310 : i32
    %c2_i32_311 = arith.constant 2 : i32
    %616 = arith.muli %c2_i32_311, %615 : i32
    %c1_i32_312 = arith.constant 1 : i32
    %617 = arith.addi %616, %c1_i32_312 : i32
    %618 = arith.index_cast %617 : i32 to index
    %c0_313 = arith.constant 0 : index
    %c0_314 = arith.constant 0 : index
    %c0_315 = arith.constant 0 : index
    %619 = vector.load %arg10[%618, %c0_313, %c0_314, %c0_315] : memref<18x2x9x32xf32, #tpu.memory_space<vmem>>, vector<1x1x8x32xf32>
    %620 = vector.shape_cast %619 : vector<1x1x8x32xf32> to vector<8x32xf32>
    %621 = vector.shape_cast %26 : vector<32xf32> to vector<1x32xf32>
    %622 = vector.broadcast %621 : vector<1x32xf32> to vector<8x32xf32>
    %623 = arith.mulf %620, %622 : vector<8x32xf32>
    %624 = arith.addf %614, %623 : vector<8x32xf32>
    %625 = arith.index_cast %617 : i32 to index
    %c1_316 = arith.constant 1 : index
    %c0_317 = arith.constant 0 : index
    %c0_318 = arith.constant 0 : index
    %626 = vector.load %arg10[%625, %c1_316, %c0_317, %c0_318] : memref<18x2x9x32xf32, #tpu.memory_space<vmem>>, vector<1x1x8x32xf32>
    %627 = vector.shape_cast %626 : vector<1x1x8x32xf32> to vector<8x32xf32>
    %628 = vector.shape_cast %28 : vector<32xf32> to vector<1x32xf32>
    %629 = vector.broadcast %628 : vector<1x32xf32> to vector<8x32xf32>
    %630 = arith.mulf %627, %629 : vector<8x32xf32>
    %631 = arith.addf %624, %630 : vector<8x32xf32>
    %632 = arith.index_cast %617 : i32 to index
    %c0_319 = arith.constant 0 : index
    %c1_320 = arith.constant 1 : index
    %c0_321 = arith.constant 0 : index
    %633 = vector.load %arg10[%632, %c0_319, %c1_320, %c0_321] : memref<18x2x9x32xf32, #tpu.memory_space<vmem>>, vector<1x1x8x32xf32>
    %634 = vector.shape_cast %633 : vector<1x1x8x32xf32> to vector<8x32xf32>
    %635 = vector.shape_cast %30 : vector<32xf32> to vector<1x32xf32>
    %636 = vector.broadcast %635 : vector<1x32xf32> to vector<8x32xf32>
    %637 = arith.mulf %634, %636 : vector<8x32xf32>
    %638 = arith.addf %631, %637 : vector<8x32xf32>
    %c7_i32_322 = arith.constant 7 : i32
    %639 = arith.addi %66, %c7_i32_322 : i32
    %c2_i32_323 = arith.constant 2 : i32
    %640 = arith.muli %c2_i32_323, %639 : i32
    %c2_i32_324 = arith.constant 2 : i32
    %641 = arith.addi %640, %c2_i32_324 : i32
    %642 = arith.index_cast %641 : i32 to index
    %c0_325 = arith.constant 0 : index
    %c0_326 = arith.constant 0 : index
    %c0_327 = arith.constant 0 : index
    %643 = vector.load %arg10[%642, %c0_325, %c0_326, %c0_327] : memref<18x2x9x32xf32, #tpu.memory_space<vmem>>, vector<1x1x8x32xf32>
    %644 = vector.shape_cast %643 : vector<1x1x8x32xf32> to vector<8x32xf32>
    %645 = vector.shape_cast %32 : vector<32xf32> to vector<1x32xf32>
    %646 = vector.broadcast %645 : vector<1x32xf32> to vector<8x32xf32>
    %647 = arith.mulf %644, %646 : vector<8x32xf32>
    %648 = arith.addf %638, %647 : vector<8x32xf32>
    %649 = arith.index_cast %641 : i32 to index
    %c1_328 = arith.constant 1 : index
    %c0_329 = arith.constant 0 : index
    %c0_330 = arith.constant 0 : index
    %650 = vector.load %arg10[%649, %c1_328, %c0_329, %c0_330] : memref<18x2x9x32xf32, #tpu.memory_space<vmem>>, vector<1x1x8x32xf32>
    %651 = vector.shape_cast %650 : vector<1x1x8x32xf32> to vector<8x32xf32>
    %652 = vector.shape_cast %34 : vector<32xf32> to vector<1x32xf32>
    %653 = vector.broadcast %652 : vector<1x32xf32> to vector<8x32xf32>
    %654 = arith.mulf %651, %653 : vector<8x32xf32>
    %655 = arith.addf %648, %654 : vector<8x32xf32>
    %656 = arith.index_cast %641 : i32 to index
    %c0_331 = arith.constant 0 : index
    %c1_332 = arith.constant 1 : index
    %c0_333 = arith.constant 0 : index
    %657 = vector.load %arg10[%656, %c0_331, %c1_332, %c0_333] : memref<18x2x9x32xf32, #tpu.memory_space<vmem>>, vector<1x1x8x32xf32>
    %658 = vector.shape_cast %657 : vector<1x1x8x32xf32> to vector<8x32xf32>
    %659 = vector.shape_cast %36 : vector<32xf32> to vector<1x32xf32>
    %660 = vector.broadcast %659 : vector<1x32xf32> to vector<8x32xf32>
    %661 = arith.mulf %658, %660 : vector<8x32xf32>
    %662 = arith.addf %655, %661 : vector<8x32xf32>
    %663 = vector.broadcast %16 : vector<1x32xf32> to vector<8x32xf32>
    %664 = arith.addf %662, %663 : vector<8x32xf32>
    %cst_334 = arith.constant 0.000000e+00 : f32
    %665 = vector.broadcast %cst_334 : f32 to vector<8x32xf32>
    %666 = arith.maximumf %664, %665 : vector<8x32xf32>
    %667 = tpu.concatenate %141, %216, %291, %366, %441, %516, %591, %666 in 0 : vector<8x32xf32>, vector<8x32xf32>, vector<8x32xf32>, vector<8x32xf32>, vector<8x32xf32>, vector<8x32xf32>, vector<8x32xf32>, vector<8x32xf32> -> vector<64x32xf32>
    %cst_335 = arith.constant dense<0.000000e+00> : vector<64x16xf32>
    %668 = tpu.matmul %667, %15, %cst_335 {dimension_numbers = #tpu.dot_dimension_numbers<[1], [0], [0], [1], [0, 0, 1, 1], [], []>} : vector<64x32xf32>, vector<32x16xf32>, vector<64x16xf32> -> vector<64x16xf32>
    %669 = vector.broadcast %17 : vector<1x16xf32> to vector<64x16xf32>
    %670 = arith.addf %668, %669 : vector<64x16xf32>
    %671 = vector.shape_cast %670 : vector<64x16xf32> to vector<8x8x16xf32>
    %c0_336 = arith.constant 0 : index
    %672 = arith.index_cast %66 : i32 to index
    %c0_337 = arith.constant 0 : index
    %c0_338 = arith.constant 0 : index
    %673 = vector.load %arg9[%c0_336, %672, %c0_337, %c0_338] : memref<1x8x8x16xf32, #tpu.memory_space<vmem>>, vector<1x8x8x16xf32>
    %674 = vector.shape_cast %673 : vector<1x8x8x16xf32> to vector<8x8x16xf32>
    %675 = vector.shape_cast %671 : vector<8x8x16xf32> to vector<1x8x8x16xf32>
    tpu.vector_store %arg9[%c0_336, %672, %c0_337, %c0_338], %675 {strides = array<i32>} : memref<1x8x8x16xf32, #tpu.memory_space<vmem>>, vector<1x8x8x16xf32>,
    %c1_i32_339 = arith.constant 1 : i32
    return
  }
  func.func @transform_0(%arg0: i32) -> (i32, i32, i32, i32) {
    %c0_i32 = arith.constant 0 : i32
    %c0_i32_0 = arith.constant 0 : i32
    %c0_i32_1 = arith.constant 0 : i32
    %c0_i32_2 = arith.constant 0 : i32
    return %arg0, %c0_i32, %c0_i32_0, %c0_i32_1 : i32, i32, i32, i32
  }
  func.func @transform_1(%arg0: i32) -> (i32, i32) {
    %c0_i32 = arith.constant 0 : i32
    %c0_i32_0 = arith.constant 0 : i32
    %c0_i32_1 = arith.constant 0 : i32
    return %c0_i32, %c0_i32_0 : i32, i32
  }
  func.func @transform_2(%arg0: i32) -> (i32, i32) {
    %c0_i32 = arith.constant 0 : i32
    %c0_i32_0 = arith.constant 0 : i32
    %c0_i32_1 = arith.constant 0 : i32
    return %c0_i32, %c0_i32_0 : i32, i32
  }
  func.func @transform_3(%arg0: i32) -> (i32, i32) {
    %c0_i32 = arith.constant 0 : i32
    %c0_i32_0 = arith.constant 0 : i32
    %c0_i32_1 = arith.constant 0 : i32
    return %c0_i32, %c0_i32_0 : i32, i32
  }
  func.func @transform_4(%arg0: i32) -> (i32, i32) {
    %c0_i32 = arith.constant 0 : i32
    %c0_i32_0 = arith.constant 0 : i32
    %c0_i32_1 = arith.constant 0 : i32
    return %c0_i32, %c0_i32_0 : i32, i32
  }
  func.func @transform_5(%arg0: i32) -> (i32, i32) {
    %c0_i32 = arith.constant 0 : i32
    %c0_i32_0 = arith.constant 0 : i32
    %c0_i32_1 = arith.constant 0 : i32
    return %c0_i32, %c0_i32_0 : i32, i32
  }
  func.func @transform_6(%arg0: i32) -> (i32, i32) {
    %c0_i32 = arith.constant 0 : i32
    %c0_i32_0 = arith.constant 0 : i32
    %c0_i32_1 = arith.constant 0 : i32
    return %c0_i32, %c0_i32_0 : i32, i32
  }
  func.func @transform_7(%arg0: i32) -> (i32, i32) {
    %c0_i32 = arith.constant 0 : i32
    %c0_i32_0 = arith.constant 0 : i32
    %c0_i32_1 = arith.constant 0 : i32
    return %c0_i32, %c0_i32_0 : i32, i32
  }
  func.func @transform_8(%arg0: i32) -> (i32, i32, i32, i32) {
    %c0_i32 = arith.constant 0 : i32
    %c0_i32_0 = arith.constant 0 : i32
    %c0_i32_1 = arith.constant 0 : i32
    %c0_i32_2 = arith.constant 0 : i32
    return %arg0, %c0_i32, %c0_i32_0, %c0_i32_1 : i32, i32, i32, i32
  }
}

</mosaic_0001>

<bundles_post_ra>
// kernel: inverted_residual_forward.5
= control target key start
LH: loop header
LB: loop body
LE: loop exit
PB: predicated region body
PF: predicated region fallthrough
CT: control target
= control target key end

     0   :  { %12 = vsyncpa [#allocation4], 0  ;;  %s1566_s0 = inlined_call_operand.vmem [shape: f32[2,8,8,16], index: 0, kind: input, shape index: {}]   ;;  %s1567_s1 = inlined_call_operand.vmem [shape: f32[16,32], index: 1, kind: input, shape index: {}]   ;;  %s1568_s2 = inlined_call_operand.vmem [shape: f32[1,32], index: 2, kind: input, shape index: {}]   ;;  %s1569_s3 = inlined_call_operand.vmem [shape: f32[9,32], index: 3, kind: input, shape index: {}]   ;;  %s1570_s4 = inlined_call_operand.vmem [shape: f32[1,32], index: 4, kind: input, shape index: {}]   ;;  %s1571_s5 = inlined_call_operand.vmem [shape: f32[32,16], index: 5, kind: input, shape index: {}]   ;;  %s1572_s6 = inlined_call_operand.vmem [shape: f32[1,16], index: 6, kind: input, shape index: {}]   ;;  %s1573_s7 = inlined_call_operand.hbm [shape: f32[2,8,8,16], index: 7, kind: output, shape index: {}]  }
   0x1   :  { %14 = vsyncpa [#allocation4 + $0x1], 0  ;;  %s1230_s24 = smov 0   ;;  %s1232_s25 = smov 0  }
   0x2   :  { %s1234_s26 = smov 0   ;;  %s1236_s27 = smov 0  }
   0x3 LB: > { %s1251_s28 = sadd.s32 4294967295, %s1184_s27   ;;  %s990_s29 = sadd.s32 4294967294, %s1184_s27   ;;  %s1184_s27 = sphi %s1236_s27, %s1579_s27   ;;  %s1180_s26 = sphi %s1234_s26, %s1578_s26   ;;  %s1176_s25 = sphi %s1232_s25, %s1577_s25   ;;  %s1172_s24 = sphi %s1230_s24, %s1576_s24  }
   0x4   : > { %s1255_s30 = sadd.s32 1, %s1184_s27   ;;  %s179_s8 = sadd.s32 1, %s1180_s26 }
   0x5   : > { %s176_s9 = ssub.s32 %s1184_s27, %s1255_s30  ;;  %p189_p0 = scmp.ne.s32.totalorder %s1180_s26, %s1176_s25 }
   0x6   : > { %p177_p1 = scmp.eq.s32.totalorder %s176_s9, 0  ;;  %p190_p2 = scmp.eq.s32.totalorder %s1251_s28, 1 }
   0x7   : > { %p195_p3 = scmp.ne.s32.totalorder %s1176_s25, %s1172_s24  ;;  %p196_p4 = scmp.eq.s32.totalorder %s990_s29, 1 }
   0x8   : > { %s1266_s10 = scalar_select %p177_p1, %s1180_s26, %s179_s8  }
   0x9   : > { %p1268_p5 = por %p190_p2, %p189_p0  ;;  %p1272_p6 = por %p196_p4, %p195_p3 }
   0xa   : > { %p993_p7 = scmp.ge.s32.totalorder %s1184_s27, 1  ;;  %p240_p8 = scmp.lt.s32.totalorder %s1184_s27, 3 }
   0xc   : > { %p241_p9 = pnand %p993_p7, %p240_p8 }
   0xd   : > { %p272_p10 = scmp.lt.s32.totalorder (!%p241_p9), %s1251_s28, 1  ;;  %s269_s29 = sand.u32 (!%p241_p9), 1, %s1176_s25  }
   0xe   : > { %244 = sbr.rel (%p241_p9) target bundleno = 492 (0x1ec), region = 48  ;;  %s994_s13 = sshll.u32 (!%p241_p9), %s269_s29, 6 }
   0xf   : > { %s1490_s14 = scalar_lea.vmem (!%p241_p9), [#allocation3], %s994_s13  ;;  %s1023_s15 = sshll.u32 (!%p241_p9), %s1251_s28, 10 }
  0x10   : > { %s926_s16 = sshll.u32 (!%p241_p9), %s1490_s14, 4  ;;  %s1515_s19 = scalar_lea.hbm (!%p241_p9), %s1573_s7, %s1023_s15  ;;  %s1517_s16 = int_to_ptr.vmem [resolvable:$true] %s926_s16 }
  0x11   : > { %s1124_s20 = scalar_lea.vmem (!%p241_p9), %s1517_s16, 1024 }
  0x12   : > { %p1125_p11 = scmp.ne.s32.totalorder (!%p241_p9), %s1517_s16, %s1124_s20 }
  0x13   : > { %v306_v0 = vld [vmem:[%s1567_s1 + $0x8] sm:$0xff]  ;;  %v305_v1 = vld [vmem:[%s1567_s1] sm:$0xff]  ;;  %s273_s17 = scalar_select %p272_p10, %s1251_s28, 1  ;;  %vm332_vm0 = vcmask 130048   ;;  %vm277_vm1 = vcmask 261120   ;;  %v1186_v10 = vmov 0.0   ;;  %v491_v15 = vlaneseq }
  0x14   : > { %1046 = vmatprep.subr.mxu0 %v306_v0  ;;  %278 = vst.msk [vmem:[#allocation2] sm:$0xff] %vm277_vm1, %v1186_v10  ;;  %vm279_vm2 = vcmask 254976   ;;  %vm284_vm3 = vcmask 253952   ;;  %282 = vst.msk [vmem:[#allocation2 + $0x90] sm:$0xff] %vm277_vm1, %v1186_v10  ;;  %v311_v11 = vld [vmem:[%s1571_s5 + $0x18] sm:$0xff]  ;;  %v310_v12 = vld [vmem:[%s1571_s5 + $0x10] sm:$0xff]  ;;  %p1126_p12 = pnand %p1125_p11, %p1268_p5 }
  0x15   : > { %1047 = vmatpush3.msra.mxu0 %v306_v0  ;;  %s1022_s18 = sshll.u32 %s273_s17, 6  ;;  %280 = vst.msk [vmem:[#allocation2 + $0x8] sm:$0x3] %vm279_vm2, %v1186_v10  ;;  %283 = vst.msk [vmem:[#allocation2 + $0x98] sm:$0x3] %vm279_vm2, %v1186_v10  ;;  %1062 = vmatprep.subr.mxu1 %v311_v11  ;;  %v309_v13 = vld [vmem:[%s1571_s5 + $0x8] sm:$0xff] }
  0x16   : > { %1048 = vmatprep.subr.mxu0 %v305_v1  ;;  %s276_s21 = scalar_lea.vmem %s1566_s0, %s1022_s18  ;;  %285 = vst.msk [vmem:[#allocation2] sm:$0x1] %vm284_vm3, %v1186_v10  ;;  %286 = vst.msk [vmem:[#allocation2 + $0x10] sm:$0x1] %vm284_vm3, %v1186_v10  ;;  %1063 = vmatpush3.msra.mxu1 %v311_v11  ;;  %v308_v14 = vld [vmem:[%s1571_s5] sm:$0xff]  ;;  %v492_v16 = vshrl.u32 %v491_v15, 7  ;;  %p1127_p13 = pneg %p1126_p12 }
  0x17   : > { %1049 = vmatpush3.msra.mxu0 %v305_v1  ;;  %v1289_v2 = vld [vmem:[%s276_s21] sm:$0xff]  ;;  %v1291_v3 = vld [vmem:[%s276_s21 + $0x8] sm:$0xff]  ;;  %v1293_v4 = vld [vmem:[%s276_s21 + $0x10] sm:$0xff]  ;;  %287 = vst.msk [vmem:[#allocation2 + $0x20] sm:$0x1] %vm284_vm3, %v1186_v10  ;;  %1064 = vmatprep.subr.mxu1 %v310_v12  ;;  %s1526_s28 = scalar_lea.sflag [#allocation4], %s269_s29 }
  0x18   : > { %1050 = vmatprep.mubr.msk.f32.mxu0 %vm332_vm0, %v1289_v2  ;;  %v1301_v5 = vld [vmem:[%s276_s21 + $0x18] sm:$0xff]  ;;  %v1303_v6 = vld [vmem:[%s276_s21 + $0x20] sm:$0xff]  ;;  %v1309_v7 = vld [vmem:[%s276_s21 + $0x28] sm:$0xff]  ;;  %296 = vst.msk [vmem:[#allocation2 + $0x19] sm:$0x1] %vm284_vm3, %v1186_v10  ;;  %1065 = vmatpush3.msra.mxu1 %v310_v12  ;;  %v493_v17 = vsub.s32 0, %v492_v16 }
  0x19   : > { %1051 = vmatmul.mubr.msk.f32.vlgmr.msra.gmra.mxu0 %vm332_vm0, %v1291_v3  ;;  %v1311_v8 = vld [vmem:[%s276_s21 + $0x30] sm:$0xff]  ;;  %v1317_v9 = vld [vmem:[%s276_s21 + $0x38] sm:$0xff]  ;;  %297 = vst.msk [vmem:[#allocation2 + $0x29] sm:$0x1] %vm284_vm3, %v1186_v10  ;;  %288 = vst.msk [vmem:[#allocation2 + $0x30] sm:$0x1] %vm284_vm3, %v1186_v10  ;;  %1066 = vmatprep.subr.mxu1 %v309_v13 }
  0x1a   : > { %1053 = vmatprep.mubr.msk.f32.mxu0 %vm332_vm0, %v1293_v4  ;;  %289 = vst.msk [vmem:[#allocation2 + $0x40] sm:$0x1] %vm284_vm3, %v1186_v10  ;;  %290 = vst.msk [vmem:[#allocation2 + $0x50] sm:$0x1] %vm284_vm3, %v1186_v10  ;;  %1067 = vmatpush3.msra.mxu1 %v309_v13  ;;  %v314_v18 = vld [vmem:[%s1569_s3] sm:$0xff]  ;;  %v513_v19 = vsub.s32 1, %v492_v16 }
  0x1b   : > { %291 = vst.msk [vmem:[#allocation2 + $0x60] sm:$0x1] %vm284_vm3, %v1186_v10  ;;  %292 = vst.msk [vmem:[#allocation2 + $0x70] sm:$0x1] %vm284_vm3, %v1186_v10  ;;  %1068 = vmatprep.subr.mxu1 %v308_v14  ;;  %v997_v20 = vld [vmem:[%s1568_s2] ss:$0 sm:$0xff]  ;;  %v1361_v22 = vrot.slane %v314_v18, %v493_v17 }
  0x1c   : > { %293 = vst.msk [vmem:[#allocation2 + $0x80] sm:$0x1] %vm284_vm3, %v1186_v10  ;;  %298 = vst.msk [vmem:[#allocation2 + $0x39] sm:$0x1] %vm284_vm3, %v1186_v10  ;;  %1069 = vmatpush3.msra.mxu1 %v308_v14  ;;  %v1363_v25 = vrot.slane %v314_v18, %v513_v19  ;;  %v541_v26 = vsub.s32 2, %v492_v16  ;;  %v503_v28 = vld [vmem:[#allocation2 + $0x1] sm:$0xff] }
  0x1d   : > { %1054 = vmatmul.mubr.msk.f32.gmra.mxu0 %vm332_vm0, %v1301_v5  ;;  %299 = vst.msk [vmem:[#allocation2 + $0x49] sm:$0x1] %vm284_vm3, %v1186_v10  ;;  %300 = vst.msk [vmem:[#allocation2 + $0x59] sm:$0x1] %vm284_vm3, %v1186_v10  ;;  %v483_v24 = vld [vmem:[#allocation2] sm:$0xff]  ;;  %v656_v39 = vsub.s32 6, %v492_v16 }
  0x1e   : > { %1056 = vmatprep.mubr.msk.f32.mxu0 %vm332_vm0, %v1303_v6  ;;  %301 = vst.msk [vmem:[#allocation2 + $0x69] sm:$0x1] %vm284_vm3, %v1186_v10  ;;  %302 = vst.msk [vmem:[#allocation2 + $0x79] sm:$0x1] %vm284_vm3, %v1186_v10  ;;  %v495_v32 = vmul.f32 %v1361_v22, %v483_v24  ;;  %v515_v35 = vmul.f32 %v1363_v25, %v503_v28  ;;  %v1368_v36 = vrot.slane %v314_v18, %v541_v26  ;;  %v1382_v61 = vld [vmem:[%s1569_s3 + $0x8] ss:$0 sm:$0xff] }
  0x1f   : > { %303 = vst.msk [vmem:[#allocation2 + $0x89] sm:$0x1] %vm284_vm3, %v1186_v10  ;;  %294 = vst.msk [vmem:[#allocation2 + $0x90] sm:$0x1] %vm284_vm3, %v1186_v10  ;;  %v684_v42 = vsub.s32 7, %v492_v16  ;;  %v569_v44 = vsub.s32 3, %v492_v16  ;;  %v1373_v52 = vrot.slane %v314_v18, %v656_v39 }
  0x20   : > { %295 = vst.msk [vmem:[#allocation2 + $0x9] sm:$0x1] %vm284_vm3, %v1186_v10  ;;  %304 = vst.msk [vmem:[#allocation2 + $0x99] sm:$0x1] %vm284_vm3, %v1186_v10  ;;  %v523_v47 = vadd.f32 %v515_v35, %v495_v32  ;;  %v597_v50 = vsub.s32 4, %v492_v16  ;;  %v625_v51 = vsub.s32 5, %v492_v16 }
  0x21   : > { %1057 = vmatmul.mubr.msk.f32.gmra.mxu0 %vm332_vm0, %v1309_v7  ;;  %v1376_v55 = vrot.slane %v314_v18, %v684_v42  ;;  %v1384_v63 = vrot.slane %v314_v18, %v569_v44  ;;  %s1187_s21 = smov [#allocation3]  }
  0x22   : > { %1059 = vmatprep.mubr.msk.f32.mxu0 %vm332_vm0, %v1311_v8  ;;  %v1386_v12 = vrot.slane %v314_v18, %v597_v50  ;;  %v1388_v13 = vrot.slane %v314_v18, %v625_v51  ;;  %s1128_s22 = sshll.u32 %s1187_s21, 4  ;;  %s1129_s22 = int_to_ptr.vmem [resolvable:$false] %s1128_s22 }
  0x23   : > { %s1130_s23 = scalar_lea.vmem %s1129_s22, 2048  ;;  %p1131_p0 = scmp.lt.s32.totalorder %s1517_s16, %s1129_s22 }
  0x24   : > { %p1132_p1 = scmp.lt.s32.totalorder %s1130_s23, %s1124_s20 }
  0x25   : > { %1060 = vmatmul.mubr.msk.f32.gmra.mxu0 %vm332_vm0, %v1317_v9 }
  0x26   : > { %p1133_p2 = por %p1132_p1, %p1131_p0 }
  0x27   : > { %v531_v38 = vld [vmem:[#allocation2 + $0x2] sm:$0xff] }
  0x28   : > { %v543_v48 = vmul.f32 %v1368_v36, %v531_v38  ;;  %p1134_p3 = pnand %p1133_p2, %p1127_p13 }
  0x2a   : > { %v551_v62 = vadd.f32 %v543_v48, %v523_v47 }
  0xd9   : > { %v1052_v21 = vpop.f32.mrf.mxu0 }
  0xda   : > { %v429_v23 = vadd.f32 %v1052_v21, %v997_v20 }
  0xdb   : > { %v423_v27 = vpop.f32.mrf.mxu0 }
  0xdc   : > { %v463_v29 = vmax.f32 %v429_v23, 0.0  ;;  %v424_v30 = vadd.f32 %v997_v20, %v423_v27 }
  0xdd   : > { %v1055_v31 = vpop.f32.mrf.mxu0 }
  0xde   : > { %474 = vst.msk [vmem:[#allocation2 + $0x21] sm:$0xff] %vm277_vm1, %v463_v29  ;;  %v462_v33 = vmax.f32 %v424_v30, 0.0  ;;  %v439_v34 = vadd.f32 %v1055_v31, %v997_v20 }
  0xdf   : > { %v433_v37 = vpop.f32.mrf.mxu0 }
  0xe0   : > { %473 = vst.msk [vmem:[#allocation2 + $0x11] sm:$0xff] %vm277_vm1, %v462_v33  ;;  %v465_v40 = vmax.f32 %v439_v34, 0.0  ;;  %v434_v41 = vadd.f32 %v997_v20, %v433_v37 }
  0xe1   : > { %v1058_v43 = vpop.f32.mrf.mxu0 }
  0xe2   : > { %476 = vst.msk [vmem:[#allocation2 + $0x41] sm:$0xff] %vm277_vm1, %v465_v40  ;;  %v464_v45 = vmax.f32 %v434_v41, 0.0  ;;  %v449_v46 = vadd.f32 %v1058_v43, %v997_v20 }
  0xe3   : > { %v443_v49 = vpop.f32.mrf.mxu0 }
  0xe4   : > { %475 = vst.msk [vmem:[#allocation2 + $0x31] sm:$0xff] %vm277_vm1, %v464_v45  ;;  %v467_v53 = vmax.f32 %v449_v46, 0.0  ;;  %v444_v54 = vadd.f32 %v997_v20, %v443_v49 }
  0xe5   : > { %v1061_v56 = vpop.f32.mrf.mxu0  ;;  %v646_v57 = vld [vmem:[#allocation2 + $0x20] sm:$0xff] }
  0xe6   : > { %v674_v58 = vld [vmem:[#allocation2 + $0x21] sm:$0xff]  ;;  %478 = vst.msk [vmem:[#allocation2 + $0x61] sm:$0xff] %vm277_vm1, %v467_v53  ;;  %v466_v59 = vmax.f32 %v444_v54, 0.0  ;;  %v459_v60 = vadd.f32 %v1061_v56, %v997_v20  ;;  %v658_v14 = vmul.f32 %v1373_v52, %v646_v57  ;;  %v497_v29 = vmul.f32 %v646_v57, %v1361_v22 }
  0xe7   : > { %v702_v0 = vld [vmem:[#allocation2 + $0x22] sm:$0xff]  ;;  %v453_v1 = vpop.f32.mrf.mxu0  ;;  %v559_v10 = vld [vmem:[#allocation2 + $0x10] sm:$0xff]  ;;  %v686_v21 = vmul.f32 %v1376_v55, %v674_v58  ;;  %v572_v33 = vmul.f32 %v646_v57, %v1384_v63  ;;  %v600_v34 = vmul.f32 %v674_v58, %v1386_v12 }
  0xe8   : > { %v587_v11 = vld [vmem:[#allocation2 + $0x11] sm:$0xff]  ;;  %477 = vst.msk [vmem:[#allocation2 + $0x51] sm:$0xff] %vm277_vm1, %v466_v59  ;;  %v469_v15 = vmax.f32 %v459_v60, 0.0  ;;  %v454_v16 = vadd.f32 %v997_v20, %v453_v1  ;;  %v571_v17 = vmul.f32 %v1384_v63, %v559_v10  ;;  %v714_v24 = vmul.f32 %v1382_v61, %v702_v0 }
  0xe9   : > { %v615_v19 = vld [vmem:[#allocation2 + $0x12] sm:$0xff]  ;;  %v599_v23 = vmul.f32 %v1386_v12, %v587_v11  ;;  %v496_v26 = vmul.f32 %v559_v10, %v1361_v22  ;;  %v516_v18 = vmul.f32 %v587_v11, %v1363_v25  ;;  %v517_v20 = vmul.f32 %v674_v58, %v1363_v25  ;;  %v648_v30 = vld [vmem:[#allocation2 + $0x40] sm:$0xff] }
  0xea   : > { %480 = vst.msk [vmem:[#allocation2 + $0x81] sm:$0xff] %vm277_vm1, %v469_v15  ;;  %v468_v27 = vmax.f32 %v454_v16, 0.0  ;;  %v579_v28 = vadd.f32 %v571_v17, %v551_v62  ;;  %v544_v32 = vmul.f32 %v615_v19, %v1368_v36  ;;  %v676_v37 = vld [vmem:[#allocation2 + $0x41] sm:$0xff]  ;;  %v627_v39 = vmul.f32 %v1388_v13, %v615_v19 }
  0xeb   : > { %v524_v31 = vadd.f32 %v516_v18, %v496_v26  ;;  %v647_v35 = vld [vmem:[#allocation2 + $0x30] sm:$0xff]  ;;  %v628_v40 = vmul.f32 %v702_v0, %v1388_v13  ;;  %v545_v42 = vmul.f32 %v702_v0, %v1368_v36  ;;  %v525_v45 = vadd.f32 %v517_v20, %v497_v29  ;;  %v704_v57 = vld [vmem:[#allocation2 + $0x42] sm:$0xff] }
  0xec   : > { %479 = vst.msk [vmem:[#allocation2 + $0x71] sm:$0xff] %vm277_vm1, %v468_v27  ;;  %v607_v38 = vadd.f32 %v599_v23, %v579_v28  ;;  %v675_v41 = vld [vmem:[#allocation2 + $0x31] sm:$0xff]  ;;  %v573_v46 = vmul.f32 %v647_v35, %v1384_v63  ;;  %v660_v47 = vmul.f32 %v1373_v52, %v648_v30  ;;  %v659_v49 = vmul.f32 %v1373_v52, %v647_v35 }
  0xed   : > { %v552_v43 = vadd.f32 %v544_v32, %v524_v31  ;;  %v703_v44 = vld [vmem:[#allocation2 + $0x32] sm:$0xff]  ;;  %v688_v50 = vmul.f32 %v1376_v55, %v676_v37  ;;  %v498_v51 = vmul.f32 %v647_v35, %v1361_v22  ;;  %v687_v54 = vmul.f32 %v1376_v55, %v675_v41 }
  0xee   : > { %v635_v48 = vadd.f32 %v627_v39, %v607_v38  ;;  %v553_v56 = vadd.f32 %v545_v42, %v525_v45  ;;  %v518_v58 = vmul.f32 %v675_v41, %v1363_v25  ;;  %v715_v60 = vmul.f32 %v1382_v61, %v703_v44 }
  0xef   : > { %v580_v53 = vadd.f32 %v572_v33, %v552_v43  ;;  %v601_v62 = vmul.f32 %v675_v41, %v1386_v12  ;;  %v629_v0 = vmul.f32 %v703_v44, %v1388_v13  ;;  %v546_v15 = vmul.f32 %v703_v44, %v1368_v36  ;;  %v649_v16 = vld [vmem:[#allocation2 + $0x50] sm:$0xff] }
  0xf0   : > { %v666_v59 = vadd.f32 %v658_v14, %v635_v48  ;;  %v581_v10 = vadd.f32 %v573_v46, %v553_v56  ;;  %v526_v11 = vadd.f32 %v518_v58, %v498_v51  ;;  %v716_v19 = vmul.f32 %v1382_v61, %v704_v57  ;;  %v1425_v14 = vld [vmem:[%s1570_s4] ss:$0 sm:$0xff]  ;;  %v677_v29 = vld [vmem:[#allocation2 + $0x51] sm:$0xff] }
  0xf1   : > { %v608_v1 = vadd.f32 %v600_v34, %v580_v53  ;;  %v574_v23 = vmul.f32 %v648_v30, %v1384_v63  ;;  %v499_v26 = vmul.f32 %v648_v30, %v1361_v22  ;;  %v519_v20 = vmul.f32 %v676_v37, %v1363_v25 }
  0xf2   : > { %v694_v17 = vadd.f32 %v686_v21, %v666_v59  ;;  %v609_v27 = vadd.f32 %v601_v62, %v581_v10  ;;  %v554_v28 = vadd.f32 %v546_v15, %v526_v11  ;;  %v602_v21 = vmul.f32 %v676_v37, %v1386_v12  ;;  %v705_v37 = vld [vmem:[#allocation2 + $0x52] sm:$0xff]  ;;  %v650_v59 = vld [vmem:[#allocation2 + $0x60] sm:$0xff] }
  0xf3   : > { %v636_v18 = vadd.f32 %v628_v40, %v608_v1  ;;  %v547_v32 = vmul.f32 %v704_v57, %v1368_v36  ;;  %v575_v33 = vmul.f32 %v649_v16, %v1384_v63  ;;  %v527_v38 = vadd.f32 %v519_v20, %v499_v26  ;;  %v678_v62 = vld [vmem:[#allocation2 + $0x61] sm:$0xff]  ;;  %v651_v20 = vld [vmem:[#allocation2 + $0x70] sm:$0xff] }
  0xf4   : > { %v722_v31 = vadd.f32 %v714_v24, %v694_v17  ;;  %v637_v30 = vadd.f32 %v629_v0, %v609_v27  ;;  %v582_v35 = vadd.f32 %v574_v23, %v554_v28  ;;  %v630_v40 = vmul.f32 %v704_v57, %v1388_v13  ;;  %v706_v17 = vld [vmem:[#allocation2 + $0x62] sm:$0xff] }
  0xf5   : > { %v667_v34 = vadd.f32 %v659_v49, %v636_v18  ;;  %v661_v41 = vmul.f32 %v1373_v52, %v649_v16  ;;  %v689_v42 = vmul.f32 %v1376_v55, %v677_v29  ;;  %v555_v45 = vadd.f32 %v547_v32, %v527_v38 }
  0xf6   : > { %v736_v39 = vadd.f32 %v1425_v14, %v722_v31  ;;  %v668_v24 = vadd.f32 %v660_v47, %v637_v30  ;;  %v610_v44 = vadd.f32 %v602_v21, %v582_v35  ;;  %v603_v48 = vmul.f32 %v677_v29, %v1386_v12 }
  0xf7   : > { %v695_v43 = vadd.f32 %v687_v54, %v667_v34  ;;  %v500_v49 = vmul.f32 %v649_v16, %v1361_v22  ;;  %v520_v51 = vmul.f32 %v677_v29, %v1363_v25  ;;  %v583_v57 = vadd.f32 %v575_v33, %v555_v45 }
  0xf8   : > { %v744_v46 = vmax.f32 %v736_v39, 0.0  ;;  %v696_v56 = vadd.f32 %v688_v50, %v668_v24  ;;  %v638_v58 = vadd.f32 %v630_v40, %v610_v44  ;;  %v717_v47 = vmul.f32 %v1382_v61, %v705_v37  ;;  %v679_v39 = vld [vmem:[#allocation2 + $0x71] sm:$0xff] }
  0xf9   : > { %v723_v53 = vadd.f32 %v715_v60, %v695_v43  ;;  %v631_v54 = vmul.f32 %v705_v37, %v1388_v13  ;;  %v528_v0 = vadd.f32 %v520_v51, %v500_v49  ;;  %v548_v1 = vmul.f32 %v705_v37, %v1368_v36 }
  0xfa   : > { %1070 = vmatprep.mubr.msk.f32.mxu1 %vm277_vm1, %v744_v46  ;;  %v724_v11 = vadd.f32 %v716_v19, %v696_v56  ;;  %v669_v15 = vadd.f32 %v661_v41, %v638_v58  ;;  %v611_v16 = vadd.f32 %v603_v48, %v583_v57  ;;  %v662_v50 = vmul.f32 %v1373_v52, %v650_v59  ;;  %v707_v46 = vld [vmem:[#allocation2 + $0x72] sm:$0xff] }
  0xfb   : > { %v737_v10 = vadd.f32 %v1425_v14, %v723_v53  ;;  %v690_v60 = vmul.f32 %v1376_v55, %v678_v62  ;;  %v556_v23 = vadd.f32 %v548_v1, %v528_v0  ;;  %v576_v26 = vmul.f32 %v650_v59, %v1384_v63 }
  0xfc   : > { %v738_v27 = vadd.f32 %v1425_v14, %v724_v11  ;;  %v697_v28 = vadd.f32 %v689_v42, %v669_v15  ;;  %v639_v29 = vadd.f32 %v631_v54, %v611_v16  ;;  %v604_v21 = vmul.f32 %v678_v62, %v1386_v12  ;;  %v680_v15 = vld [vmem:[#allocation2 + $0x81] sm:$0xff] }
  0xfd   : > { %v745_v18 = vmax.f32 %v737_v10, 0.0  ;;  %v584_v31 = vadd.f32 %v576_v26, %v556_v23  ;;  %v501_v19 = vmul.f32 %v650_v59, %v1361_v22  ;;  %v521_v32 = vmul.f32 %v678_v62, %v1363_v25 }
  0xfe   : > { %v746_v33 = vmax.f32 %v738_v27, 0.0  ;;  %v725_v34 = vadd.f32 %v717_v47, %v697_v28  ;;  %v670_v30 = vadd.f32 %v662_v50, %v639_v29  ;;  %v632_v35 = vmul.f32 %v706_v17, %v1388_v13  ;;  %v652_v47 = vld [vmem:[#allocation2 + $0x80] sm:$0xff]  ;;  %v653_v27 = vld [vmem:[#allocation2 + $0x90] sm:$0xff] }
  0xff   : > { %1071 = vmatmul.mubr.msk.f32.vlgmr.msra.gmra.mxu1 %vm277_vm1, %v745_v18  ;;  %v612_v38 = vadd.f32 %v604_v21, %v584_v31  ;;  %v529_v40 = vadd.f32 %v521_v32, %v501_v19  ;;  %v549_v41 = vmul.f32 %v706_v17, %v1368_v36  ;;  %v577_v42 = vmul.f32 %v651_v20, %v1384_v63  ;;  %v708_v18 = vld [vmem:[#allocation2 + $0x82] sm:$0xff]  ;;  %v681_v21 = vld [vmem:[#allocation2 + $0x91] sm:$0xff] }
 0x100   : > { %1073 = vmatprep.mubr.msk.f32.mxu1 %vm277_vm1, %v746_v33  ;;  %v739_v43 = vadd.f32 %v1425_v14, %v725_v34  ;;  %v698_v24 = vadd.f32 %v690_v60, %v670_v30  ;;  %v718_v44 = vmul.f32 %v1382_v61, %v706_v17  ;;  %v663_v45 = vmul.f32 %v1373_v52, %v651_v20 }
 0x101   : > { %v640_v37 = vadd.f32 %v632_v35, %v612_v38  ;;  %v557_v48 = vadd.f32 %v549_v41, %v529_v40  ;;  %v502_v53 = vmul.f32 %v651_v20, %v1361_v22  ;;  %v522_v56 = vmul.f32 %v679_v39, %v1363_v25  ;;  %v709_v35 = vld [vmem:[#allocation2 + $0x92] sm:$0xff] }
 0x102   : > { %v747_v49 = vmax.f32 %v739_v43, 0.0  ;;  %v726_v51 = vadd.f32 %v718_v44, %v698_v24  ;;  %v691_v57 = vmul.f32 %v1376_v55, %v679_v39  ;;  %v605_v62 = vmul.f32 %v679_v39, %v1386_v12 }
 0x103   : > { %v671_v58 = vadd.f32 %v663_v45, %v640_v37  ;;  %v585_v59 = vadd.f32 %v577_v42, %v557_v48  ;;  %v530_v0 = vadd.f32 %v522_v56, %v502_v53  ;;  %v550_v1 = vmul.f32 %v707_v46, %v1368_v36 }
 0x104   : > { %1074 = vmatmul.mubr.msk.f32.gmra.mxu1 %vm277_vm1, %v747_v49  ;;  %v740_v54 = vadd.f32 %v1425_v14, %v726_v51  ;;  %v719_v11 = vmul.f32 %v1382_v61, %v707_v46  ;;  %v633_v25 = vmul.f32 %v707_v46, %v1388_v13  ;;  %v578_v60 = vmul.f32 %v652_v47, %v1384_v63 }
 0x105   : > { %v699_v10 = vadd.f32 %v691_v57, %v671_v58  ;;  %v613_v22 = vadd.f32 %v605_v62, %v585_v59  ;;  %v558_v50 = vadd.f32 %v550_v1, %v530_v0  ;;  %v664_v26 = vmul.f32 %v1373_v52, %v652_v47 }
 0x106   : > { %v748_v16 = vmax.f32 %v740_v54, 0.0  ;;  %v606_v28 = vmul.f32 %v680_v15, %v1386_v12  ;;  %v692_v31 = vmul.f32 %v1376_v55, %v680_v15  ;;  %v634_v63 = vmul.f32 %v708_v18, %v1388_v13 }
 0x107   : > { %v727_v17 = vadd.f32 %v719_v11, %v699_v10  ;;  %v641_v23 = vadd.f32 %v633_v25, %v613_v22  ;;  %v586_v36 = vadd.f32 %v578_v60, %v558_v50  ;;  %v665_v32 = vmul.f32 %v1373_v52, %v653_v27 }
 0x108   : > { %1076 = vmatprep.mubr.msk.f32.mxu1 %vm277_vm1, %v748_v16  ;;  %v720_v30 = vmul.f32 %v1382_v61, %v708_v18  ;;  %v693_v12 = vmul.f32 %v1376_v55, %v681_v21  ;;  %v721_v41 = vmul.f32 %v1382_v61, %v709_v35  ;;  %v1008_v55 = vld [vmem:[%s1572_s6] ss:$0 sm:$0xff] }
 0x109   : > { %v741_v29 = vadd.f32 %v1425_v14, %v727_v17  ;;  %v672_v20 = vadd.f32 %v664_v26, %v641_v23  ;;  %v614_v19 = vadd.f32 %v606_v28, %v586_v36 }
 0x10b   : > { %v749_v33 = vmax.f32 %v741_v29, 0.0  ;;  %v700_v34 = vadd.f32 %v692_v31, %v672_v20  ;;  %v642_v38 = vadd.f32 %v634_v63, %v614_v19 }
 0x10d   : > { %1077 = vmatmul.mubr.msk.f32.gmra.mxu1 %vm277_vm1, %v749_v33  ;;  %v728_v39 = vadd.f32 %v720_v30, %v700_v34  ;;  %v673_v40 = vadd.f32 %v665_v32, %v642_v38 }
 0x10f   : > { %v742_v13 = vadd.f32 %v1425_v14, %v728_v39  ;;  %v701_v42 = vadd.f32 %v693_v12, %v673_v40 }
 0x111   : > { %v750_v52 = vmax.f32 %v742_v13, 0.0  ;;  %v729_v43 = vadd.f32 %v721_v41, %v701_v42 }
 0x113   : > { %1079 = vmatprep.mubr.msk.f32.mxu1 %vm277_vm1, %v750_v52  ;;  %v743_v24 = vadd.f32 %v1425_v14, %v729_v43 }
 0x115   : > { %v751_v44 = vmax.f32 %v743_v24, 0.0 }
 0x117   : > { %1080 = vmatmul.mubr.msk.f32.gmra.mxu1 %vm277_vm1, %v751_v44 }
 0x1bf   : > { %v1072_v61 = vpop.f32.mrf.mxu1 }
 0x1c0   : > { %v854_v37 = vadd.f32 %v1072_v61, %v1008_v55 }
 0x1c1   : > { %v848_v45 = vpop.f32.mrf.mxu1 }
 0x1c2   : > { %v896_v46 = vadd.f32 %v854_v37, %v1291_v3  ;;  %v849_v48 = vadd.f32 %v1008_v55, %v848_v45 }
 0x1c4   : > { %905 = vst.msk [vmem:[%s1490_s14 + $0x8] sm:$0xff] %vm332_vm0, %v896_v46  ;;  %v895_v14 = vadd.f32 %v849_v48, %v1289_v2  ;;  %v1075_v49 = vpop.f32.mrf.mxu1 }
 0x1c5   : > { %v864_v51 = vadd.f32 %v1075_v49, %v1008_v55 }
 0x1c6   : > { %904 = vst.msk [vmem:[%s1490_s14] sm:$0xff] %vm332_vm0, %v895_v14  ;;  %v858_v53 = vpop.f32.mrf.mxu1 }
 0x1c7   : > { %v898_v3 = vadd.f32 %v864_v51, %v1301_v5  ;;  %v859_v56 = vadd.f32 %v1008_v55, %v858_v53 }
 0x1c9   : > { %907 = vst.msk [vmem:[%s1490_s14 + $0x18] sm:$0xff] %vm332_vm0, %v898_v3  ;;  %v897_v58 = vadd.f32 %v859_v56, %v1293_v4 }
 0x1cb   : > { %906 = vst.msk [vmem:[%s1490_s14 + $0x10] sm:$0xff] %vm332_vm0, %v897_v58 }
 0x1cd   : > { %v1078_v57 = vpop.f32.mrf.mxu1 }
 0x1ce   : > { %v874_v59 = vadd.f32 %v1078_v57, %v1008_v55 }
 0x1cf   : > { %v868_v2 = vpop.f32.mrf.mxu1 }
 0x1d0   : > { %v900_v62 = vadd.f32 %v874_v59, %v1309_v7  ;;  %v869_v47 = vadd.f32 %v1008_v55, %v868_v2 }
 0x1d2   : > { %909 = vst.msk [vmem:[%s1490_s14 + $0x28] sm:$0xff] %vm332_vm0, %v900_v62  ;;  %v899_v5 = vadd.f32 %v869_v47, %v1303_v6 }
 0x1d4   : > { %908 = vst.msk [vmem:[%s1490_s14 + $0x20] sm:$0xff] %vm332_vm0, %v899_v5 }
 0x1d7   : > { %v1081_v54 = vpop.f32.mrf.mxu1 }
 0x1d8   : > { %v884_v4 = vadd.f32 %v1081_v54, %v1008_v55 }
 0x1d9   : > { %v878_v0 = vpop.f32.mrf.mxu1 }
 0x1da   : > { %v902_v1 = vadd.f32 %v884_v4, %v1317_v9  ;;  %v879_v10 = vadd.f32 %v1008_v55, %v878_v0 }
 0x1dc   : > { %911 = vst.msk [vmem:[%s1490_s14 + $0x38] sm:$0xff] %vm332_vm0, %v902_v1  ;;  %v901_v6 = vadd.f32 %v879_v10, %v1311_v8 }
 0x1de   : > { %910 = vst.msk [vmem:[%s1490_s14 + $0x30] sm:$0xff] %vm332_vm0, %v901_v6 }
 0x1df   : > { %1137 = shalt.err (!%p1134_p3)
}
 0x1e0   : > { %s1138_s29 = scalar_lea.hbm %s1515_s19, 1024  ;;  %s1142_s13 = scalar_lea.hbm %s1573_s7, 2048 }
 0x1e1   : > { %p1139_p4 = scmp.ne.s32.totalorder %s1515_s19, %s1138_s29  ;;  %p1143_p9 = scmp.lt.s32.totalorder %s1515_s19, %s1573_s7 }
 0x1e2   : > { %p1144_p10 = scmp.lt.s32.totalorder %s1142_s13, %s1138_s29 }
 0x1e3   : > { %p1140_p7 = pnand %p1139_p4, %p1268_p5 }
 0x1e4   : > { %p1145_p11 = por %p1144_p10, %p1143_p9 }
 0x1e5   : > { %p1141_p8 = pneg %p1140_p7 }
 0x1e7   : > { %p1146_p12 = pnand %p1145_p11, %p1141_p8 }
 0x1e9   : > { %1149 = shalt.err (!%p1146_p12)
}
 0x1ea   : > { %s1188_s17 = smov 128   ;;  %s1189_s18 = smov 8  }
 0x1eb   : > { %1082 = dma.vmem_to_hbm [thread:$0]  (%p1268_p5), %s1517_s16, 1024, %s1515_s19, %s1526_s28, %s1188_s17, %s1188_s17, %s1189_s18  }
 0x1ec PF: > { %p1088_p13 = scmp.ge.s32.totalorder %s1184_s27, 2  ;;  %s941_s20 = sand.u32 1, %s1172_s24  }
 0x1ed   : > { %s942_s21 = scalar_lea.sflag [#allocation4], %s941_s20 }
 0x1ee   : > { %p1085_p0 = pnand %p1088_p13, %p1272_p6 }
 0x1f0   : > { %p1086_p1 = pneg %p1085_p0 }
 0x1f2   : > { %1167 = dma.done.wait (%p1086_p1), %s942_s21, 1024  }
 0x1f3   : > { %1169 = vsyncadd (%p1086_p1), %s942_s21, 4294966272  ;;  %p17_p2 = scmp.ge.s32.totalorder %s1255_s30, 4   ;;  %s1576_s24 = smov %s1176_s25 }
 0x1f4   : > { %s1577_s25 = smov %s1180_s26  ;;  %s1578_s26 = smov %s1266_s10 }
 0x1f5   : > { %s1579_s27 = smov %s1255_s30  ;;  %19 = sbr.rel (!%p17_p2) target bundleno = 3 (0x3), region = 89 }
 0x1fa   :  { %947 = vsyncpa [#allocation4], 1 }
 0x1fb   :  { %949 = vsyncpa [#allocation4 + $0x1], 1 }

// kernel: inverted_residual_forward.4
= control target key start
LH: loop header
LB: loop body
LE: loop exit
PB: predicated region body
PF: predicated region fallthrough
CT: control target
= control target key end

     0   :  { %s1120_s24 = smov 0   ;;  %s1363_s0 = inlined_call_operand.vmem [shape: f32[2,8,8,16], index: 0, kind: input, shape index: {}]   ;;  %s1364_s1 = inlined_call_operand.vmem [shape: f32[16,32], index: 1, kind: input, shape index: {}]   ;;  %s1365_s2 = inlined_call_operand.vmem [shape: f32[1,32], index: 2, kind: input, shape index: {}]   ;;  %s1366_s3 = inlined_call_operand.vmem [shape: f32[9,32], index: 3, kind: input, shape index: {}]   ;;  %s1367_s4 = inlined_call_operand.vmem [shape: f32[1,32], index: 4, kind: input, shape index: {}]   ;;  %s1368_s5 = inlined_call_operand.vmem [shape: f32[32,16], index: 5, kind: input, shape index: {}]   ;;  %s1369_s6 = inlined_call_operand.vmem [shape: f32[1,16], index: 6, kind: input, shape index: {}]   ;;  %s1370_s7 = inlined_call_operand.vmem [shape: f32[2,8,8,16], index: 7, kind: output, shape index: {}]  }
   0x1 LB: > { %s971_s25 = sadd.s32 4294967295, %s1077_s24   ;;  %p975_p0 = scmp.ge.s32.totalorder %s1077_s24, 1  ;;  %s1077_s24 = sphi %s1120_s24, %s17_s24  }
   0x2   : > { %p237_p1 = scmp.lt.s32.totalorder %s1077_s24, 3 }
   0x4   : > { %p238_p2 = pnand %p975_p0, %p237_p1 }
   0x5   : > { %p269_p3 = scmp.lt.s32.totalorder (!%p238_p2), %s971_s25, 1 }
   0x6   : > { %241 = sbr.rel (%p238_p2) target bundleno = 470 (0x1d6), region = 48 }
   0xb   : > { %v308_v0 = vld [vmem:[%s1364_s1 + $0x8] sm:$0xff]  ;;  %v307_v1 = vld [vmem:[%s1364_s1] sm:$0xff]  ;;  %s1372_s25 = smov (!%p269_p3, %s971_s25), 1  ;;  %vm334_vm0 = vcmask 130048   ;;  %vm279_vm1 = vcmask 261120   ;;  %v1079_v10 = vmov 0.0   ;;  %v493_v15 = vlaneseq }
   0xc   : > { %1026 = vmatprep.subr.mxu0 %v308_v0  ;;  %s1002_s30 = sshll.u32 %s1372_s25, 6  ;;  %280 = vst.msk [vmem:[#allocation2] sm:$0xff] %vm279_vm1, %v1079_v10  ;;  %vm281_vm2 = vcmask 254976   ;;  %vm286_vm3 = vcmask 253952   ;;  %284 = vst.msk [vmem:[#allocation2 + $0x90] sm:$0xff] %vm279_vm1, %v1079_v10  ;;  %v313_v11 = vld [vmem:[%s1368_s5 + $0x18] sm:$0xff] }
   0xd   : > { %1027 = vmatpush3.msra.mxu0 %v308_v0  ;;  %s273_s10 = scalar_lea.vmem %s1363_s0, %s1002_s30  ;;  %282 = vst.msk [vmem:[#allocation2 + $0x8] sm:$0x3] %vm281_vm2, %v1079_v10  ;;  %285 = vst.msk [vmem:[#allocation2 + $0x98] sm:$0x3] %vm281_vm2, %v1079_v10  ;;  %v312_v12 = vld [vmem:[%s1368_s5 + $0x10] sm:$0xff]  ;;  %1042 = vmatprep.subr.mxu1 %v313_v11  ;;  %v311_v13 = vld [vmem:[%s1368_s5 + $0x8] sm:$0xff]  ;;  %s278_s11 = scalar_lea.vmem %s1370_s7, %s1002_s30 }
   0xe   : > { %1028 = vmatprep.subr.mxu0 %v307_v1  ;;  %v1142_v2 = vld [vmem:[%s273_s10] sm:$0xff]  ;;  %v1144_v3 = vld [vmem:[%s273_s10 + $0x8] sm:$0xff]  ;;  %v1146_v4 = vld [vmem:[%s273_s10 + $0x10] sm:$0xff]  ;;  %287 = vst.msk [vmem:[#allocation2] sm:$0x1] %vm286_vm3, %v1079_v10  ;;  %1043 = vmatpush3.msra.mxu1 %v313_v11  ;;  %v494_v16 = vshrl.u32 %v493_v15, 7 }
   0xf   : > { %1029 = vmatpush3.msra.mxu0 %v307_v1  ;;  %1030 = vmatprep.mubr.msk.f32.mxu0 %vm334_vm0, %v1142_v2  ;;  %v1154_v5 = vld [vmem:[%s273_s10 + $0x18] sm:$0xff]  ;;  %v1156_v6 = vld [vmem:[%s273_s10 + $0x20] sm:$0xff]  ;;  %v1162_v7 = vld [vmem:[%s273_s10 + $0x28] sm:$0xff]  ;;  %288 = vst.msk [vmem:[#allocation2 + $0x10] sm:$0x1] %vm286_vm3, %v1079_v10 }
  0x10   : > { %1031 = vmatmul.mubr.msk.f32.vlgmr.msra.gmra.mxu0 %vm334_vm0, %v1144_v3  ;;  %v1164_v8 = vld [vmem:[%s273_s10 + $0x30] sm:$0xff]  ;;  %v1170_v9 = vld [vmem:[%s273_s10 + $0x38] sm:$0xff]  ;;  %289 = vst.msk [vmem:[#allocation2 + $0x20] sm:$0x1] %vm286_vm3, %v1079_v10  ;;  %298 = vst.msk [vmem:[#allocation2 + $0x19] sm:$0x1] %vm286_vm3, %v1079_v10  ;;  %1044 = vmatprep.subr.mxu1 %v312_v12 }
  0x11   : > { %1033 = vmatprep.mubr.msk.f32.mxu0 %vm334_vm0, %v1146_v4  ;;  %299 = vst.msk [vmem:[#allocation2 + $0x29] sm:$0x1] %vm286_vm3, %v1079_v10  ;;  %290 = vst.msk [vmem:[#allocation2 + $0x30] sm:$0x1] %vm286_vm3, %v1079_v10  ;;  %1045 = vmatpush3.msra.mxu1 %v312_v12  ;;  %v310_v14 = vld [vmem:[%s1368_s5] sm:$0xff]  ;;  %v495_v17 = vsub.s32 0, %v494_v16 }
  0x12   : > { %291 = vst.msk [vmem:[#allocation2 + $0x40] sm:$0x1] %vm286_vm3, %v1079_v10  ;;  %292 = vst.msk [vmem:[#allocation2 + $0x50] sm:$0x1] %vm286_vm3, %v1079_v10  ;;  %1046 = vmatprep.subr.mxu1 %v311_v13  ;;  %v316_v18 = vld [vmem:[%s1366_s3] sm:$0xff]  ;;  %v515_v19 = vsub.s32 1, %v494_v16 }
  0x13   : > { %293 = vst.msk [vmem:[#allocation2 + $0x60] sm:$0x1] %vm286_vm3, %v1079_v10  ;;  %294 = vst.msk [vmem:[#allocation2 + $0x70] sm:$0x1] %vm286_vm3, %v1079_v10  ;;  %1047 = vmatpush3.msra.mxu1 %v311_v13  ;;  %v980_v20 = vld [vmem:[%s1365_s2] ss:$0 sm:$0xff]  ;;  %v1214_v22 = vrot.slane %v316_v18, %v495_v17 }
  0x14   : > { %1034 = vmatmul.mubr.msk.f32.gmra.mxu0 %vm334_vm0, %v1154_v5  ;;  %295 = vst.msk [vmem:[#allocation2 + $0x80] sm:$0x1] %vm286_vm3, %v1079_v10  ;;  %300 = vst.msk [vmem:[#allocation2 + $0x39] sm:$0x1] %vm286_vm3, %v1079_v10  ;;  %1048 = vmatprep.subr.mxu1 %v310_v14  ;;  %v1216_v25 = vrot.slane %v316_v18, %v515_v19  ;;  %v543_v26 = vsub.s32 2, %v494_v16  ;;  %v505_v28 = vld [vmem:[#allocation2 + $0x1] sm:$0xff] }
  0x15   : > { %1036 = vmatprep.mubr.msk.f32.mxu0 %vm334_vm0, %v1156_v6  ;;  %301 = vst.msk [vmem:[#allocation2 + $0x49] sm:$0x1] %vm286_vm3, %v1079_v10  ;;  %302 = vst.msk [vmem:[#allocation2 + $0x59] sm:$0x1] %vm286_vm3, %v1079_v10  ;;  %1049 = vmatpush3.msra.mxu1 %v310_v14  ;;  %v485_v24 = vld [vmem:[#allocation2] sm:$0xff]  ;;  %v658_v39 = vsub.s32 6, %v494_v16 }
  0x16   : > { %303 = vst.msk [vmem:[#allocation2 + $0x69] sm:$0x1] %vm286_vm3, %v1079_v10  ;;  %304 = vst.msk [vmem:[#allocation2 + $0x79] sm:$0x1] %vm286_vm3, %v1079_v10  ;;  %v497_v32 = vmul.f32 %v1214_v22, %v485_v24  ;;  %v517_v35 = vmul.f32 %v1216_v25, %v505_v28  ;;  %v1221_v36 = vrot.slane %v316_v18, %v543_v26  ;;  %v686_v42 = vsub.s32 7, %v494_v16 }
  0x17   : > { %305 = vst.msk [vmem:[#allocation2 + $0x89] sm:$0x1] %vm286_vm3, %v1079_v10  ;;  %296 = vst.msk [vmem:[#allocation2 + $0x90] sm:$0x1] %vm286_vm3, %v1079_v10  ;;  %v571_v44 = vsub.s32 3, %v494_v16  ;;  %v599_v50 = vsub.s32 4, %v494_v16  ;;  %v1226_v52 = vrot.slane %v316_v18, %v658_v39 }
  0x18   : > { %1037 = vmatmul.mubr.msk.f32.gmra.mxu0 %vm334_vm0, %v1162_v7  ;;  %297 = vst.msk [vmem:[#allocation2 + $0x9] sm:$0x1] %vm286_vm3, %v1079_v10  ;;  %306 = vst.msk [vmem:[#allocation2 + $0x99] sm:$0x1] %vm286_vm3, %v1079_v10  ;;  %v525_v47 = vadd.f32 %v517_v35, %v497_v32  ;;  %v627_v51 = vsub.s32 5, %v494_v16  ;;  %v1229_v55 = vrot.slane %v316_v18, %v686_v42 }
  0x19   : > { %1039 = vmatprep.mubr.msk.f32.mxu0 %vm334_vm0, %v1164_v8  ;;  %v1235_v61 = vld [vmem:[%s1366_s3 + $0x8] ss:$0 sm:$0xff]  ;;  %v1237_v63 = vrot.slane %v316_v18, %v571_v44  ;;  %v1239_v12 = vrot.slane %v316_v18, %v599_v50 }
  0x1a   : > { %v1241_v13 = vrot.slane %v316_v18, %v627_v51 }
  0x1c   : > { %1040 = vmatmul.mubr.msk.f32.gmra.mxu0 %vm334_vm0, %v1170_v9 }
  0x1f   : > { %v533_v38 = vld [vmem:[#allocation2 + $0x2] sm:$0xff] }
  0x20   : > { %v545_v48 = vmul.f32 %v1221_v36, %v533_v38 }
  0x22   : > { %v553_v62 = vadd.f32 %v545_v48, %v525_v47 }
  0xd0   : > { %v1032_v21 = vpop.f32.mrf.mxu0 }
  0xd1   : > { %v431_v23 = vadd.f32 %v1032_v21, %v980_v20 }
  0xd2   : > { %v425_v27 = vpop.f32.mrf.mxu0 }
  0xd3   : > { %v465_v29 = vmax.f32 %v431_v23, 0.0  ;;  %v426_v30 = vadd.f32 %v980_v20, %v425_v27 }
  0xd4   : > { %v1035_v31 = vpop.f32.mrf.mxu0 }
  0xd5   : > { %476 = vst.msk [vmem:[#allocation2 + $0x21] sm:$0xff] %vm279_vm1, %v465_v29  ;;  %v464_v33 = vmax.f32 %v426_v30, 0.0  ;;  %v441_v34 = vadd.f32 %v1035_v31, %v980_v20 }
  0xd6   : > { %v435_v37 = vpop.f32.mrf.mxu0 }
  0xd7   : > { %475 = vst.msk [vmem:[#allocation2 + $0x11] sm:$0xff] %vm279_vm1, %v464_v33  ;;  %v467_v40 = vmax.f32 %v441_v34, 0.0  ;;  %v436_v41 = vadd.f32 %v980_v20, %v435_v37 }
  0xd8   : > { %v1038_v43 = vpop.f32.mrf.mxu0 }
  0xd9   : > { %478 = vst.msk [vmem:[#allocation2 + $0x41] sm:$0xff] %vm279_vm1, %v467_v40  ;;  %v466_v45 = vmax.f32 %v436_v41, 0.0  ;;  %v451_v46 = vadd.f32 %v1038_v43, %v980_v20 }
  0xda   : > { %v445_v49 = vpop.f32.mrf.mxu0 }
  0xdb   : > { %477 = vst.msk [vmem:[#allocation2 + $0x31] sm:$0xff] %vm279_vm1, %v466_v45  ;;  %v469_v53 = vmax.f32 %v451_v46, 0.0  ;;  %v446_v54 = vadd.f32 %v980_v20, %v445_v49 }
  0xdc   : > { %v1041_v56 = vpop.f32.mrf.mxu0  ;;  %v648_v57 = vld [vmem:[#allocation2 + $0x20] sm:$0xff] }
  0xdd   : > { %v676_v58 = vld [vmem:[#allocation2 + $0x21] sm:$0xff]  ;;  %480 = vst.msk [vmem:[#allocation2 + $0x61] sm:$0xff] %vm279_vm1, %v469_v53  ;;  %v468_v59 = vmax.f32 %v446_v54, 0.0  ;;  %v461_v60 = vadd.f32 %v1041_v56, %v980_v20  ;;  %v660_v14 = vmul.f32 %v1226_v52, %v648_v57  ;;  %v499_v29 = vmul.f32 %v648_v57, %v1214_v22 }
  0xde   : > { %v704_v0 = vld [vmem:[#allocation2 + $0x22] sm:$0xff]  ;;  %v455_v1 = vpop.f32.mrf.mxu0  ;;  %v561_v10 = vld [vmem:[#allocation2 + $0x10] sm:$0xff]  ;;  %v688_v21 = vmul.f32 %v1229_v55, %v676_v58  ;;  %v574_v33 = vmul.f32 %v648_v57, %v1237_v63  ;;  %v602_v34 = vmul.f32 %v676_v58, %v1239_v12 }
  0xdf   : > { %v589_v11 = vld [vmem:[#allocation2 + $0x11] sm:$0xff]  ;;  %479 = vst.msk [vmem:[#allocation2 + $0x51] sm:$0xff] %vm279_vm1, %v468_v59  ;;  %v471_v15 = vmax.f32 %v461_v60, 0.0  ;;  %v456_v16 = vadd.f32 %v980_v20, %v455_v1  ;;  %v573_v17 = vmul.f32 %v1237_v63, %v561_v10  ;;  %v716_v24 = vmul.f32 %v1235_v61, %v704_v0 }
  0xe0   : > { %v617_v19 = vld [vmem:[#allocation2 + $0x12] sm:$0xff]  ;;  %v601_v23 = vmul.f32 %v1239_v12, %v589_v11  ;;  %v498_v26 = vmul.f32 %v561_v10, %v1214_v22  ;;  %v518_v18 = vmul.f32 %v589_v11, %v1216_v25  ;;  %v519_v20 = vmul.f32 %v676_v58, %v1216_v25  ;;  %v650_v30 = vld [vmem:[#allocation2 + $0x40] sm:$0xff] }
  0xe1   : > { %482 = vst.msk [vmem:[#allocation2 + $0x81] sm:$0xff] %vm279_vm1, %v471_v15  ;;  %v470_v27 = vmax.f32 %v456_v16, 0.0  ;;  %v581_v28 = vadd.f32 %v573_v17, %v553_v62  ;;  %v546_v32 = vmul.f32 %v617_v19, %v1221_v36  ;;  %v678_v37 = vld [vmem:[#allocation2 + $0x41] sm:$0xff]  ;;  %v629_v39 = vmul.f32 %v1241_v13, %v617_v19 }
  0xe2   : > { %v526_v31 = vadd.f32 %v518_v18, %v498_v26  ;;  %v649_v35 = vld [vmem:[#allocation2 + $0x30] sm:$0xff]  ;;  %v630_v40 = vmul.f32 %v704_v0, %v1241_v13  ;;  %v547_v42 = vmul.f32 %v704_v0, %v1221_v36  ;;  %v527_v45 = vadd.f32 %v519_v20, %v499_v29  ;;  %v706_v57 = vld [vmem:[#allocation2 + $0x42] sm:$0xff] }
  0xe3   : > { %481 = vst.msk [vmem:[#allocation2 + $0x71] sm:$0xff] %vm279_vm1, %v470_v27  ;;  %v609_v38 = vadd.f32 %v601_v23, %v581_v28  ;;  %v677_v41 = vld [vmem:[#allocation2 + $0x31] sm:$0xff]  ;;  %v575_v46 = vmul.f32 %v649_v35, %v1237_v63  ;;  %v662_v47 = vmul.f32 %v1226_v52, %v650_v30  ;;  %v661_v49 = vmul.f32 %v1226_v52, %v649_v35 }
  0xe4   : > { %v554_v43 = vadd.f32 %v546_v32, %v526_v31  ;;  %v705_v44 = vld [vmem:[#allocation2 + $0x32] sm:$0xff]  ;;  %v690_v50 = vmul.f32 %v1229_v55, %v678_v37  ;;  %v500_v51 = vmul.f32 %v649_v35, %v1214_v22  ;;  %v689_v54 = vmul.f32 %v1229_v55, %v677_v41 }
  0xe5   : > { %v637_v48 = vadd.f32 %v629_v39, %v609_v38  ;;  %v555_v56 = vadd.f32 %v547_v42, %v527_v45  ;;  %v520_v58 = vmul.f32 %v677_v41, %v1216_v25  ;;  %v717_v60 = vmul.f32 %v1235_v61, %v705_v44 }
  0xe6   : > { %v582_v53 = vadd.f32 %v574_v33, %v554_v43  ;;  %v603_v62 = vmul.f32 %v677_v41, %v1239_v12  ;;  %v631_v0 = vmul.f32 %v705_v44, %v1241_v13  ;;  %v548_v15 = vmul.f32 %v705_v44, %v1221_v36  ;;  %v651_v16 = vld [vmem:[#allocation2 + $0x50] sm:$0xff] }
  0xe7   : > { %v668_v59 = vadd.f32 %v660_v14, %v637_v48  ;;  %v583_v10 = vadd.f32 %v575_v46, %v555_v56  ;;  %v528_v11 = vadd.f32 %v520_v58, %v500_v51  ;;  %v718_v19 = vmul.f32 %v1235_v61, %v706_v57  ;;  %v1278_v14 = vld [vmem:[%s1367_s4] ss:$0 sm:$0xff]  ;;  %v679_v29 = vld [vmem:[#allocation2 + $0x51] sm:$0xff] }
  0xe8   : > { %v610_v1 = vadd.f32 %v602_v34, %v582_v53  ;;  %v576_v23 = vmul.f32 %v650_v30, %v1237_v63  ;;  %v501_v26 = vmul.f32 %v650_v30, %v1214_v22  ;;  %v521_v20 = vmul.f32 %v678_v37, %v1216_v25 }
  0xe9   : > { %v696_v17 = vadd.f32 %v688_v21, %v668_v59  ;;  %v611_v27 = vadd.f32 %v603_v62, %v583_v10  ;;  %v556_v28 = vadd.f32 %v548_v15, %v528_v11  ;;  %v604_v21 = vmul.f32 %v678_v37, %v1239_v12  ;;  %v707_v37 = vld [vmem:[#allocation2 + $0x52] sm:$0xff]  ;;  %v652_v59 = vld [vmem:[#allocation2 + $0x60] sm:$0xff] }
  0xea   : > { %v638_v18 = vadd.f32 %v630_v40, %v610_v1  ;;  %v549_v32 = vmul.f32 %v706_v57, %v1221_v36  ;;  %v577_v33 = vmul.f32 %v651_v16, %v1237_v63  ;;  %v529_v38 = vadd.f32 %v521_v20, %v501_v26  ;;  %v680_v62 = vld [vmem:[#allocation2 + $0x61] sm:$0xff]  ;;  %v653_v20 = vld [vmem:[#allocation2 + $0x70] sm:$0xff] }
  0xeb   : > { %v724_v31 = vadd.f32 %v716_v24, %v696_v17  ;;  %v639_v30 = vadd.f32 %v631_v0, %v611_v27  ;;  %v584_v35 = vadd.f32 %v576_v23, %v556_v28  ;;  %v632_v40 = vmul.f32 %v706_v57, %v1241_v13  ;;  %v708_v17 = vld [vmem:[#allocation2 + $0x62] sm:$0xff] }
  0xec   : > { %v669_v34 = vadd.f32 %v661_v49, %v638_v18  ;;  %v663_v41 = vmul.f32 %v1226_v52, %v651_v16  ;;  %v691_v42 = vmul.f32 %v1229_v55, %v679_v29  ;;  %v557_v45 = vadd.f32 %v549_v32, %v529_v38 }
  0xed   : > { %v738_v39 = vadd.f32 %v1278_v14, %v724_v31  ;;  %v670_v24 = vadd.f32 %v662_v47, %v639_v30  ;;  %v612_v44 = vadd.f32 %v604_v21, %v584_v35  ;;  %v605_v48 = vmul.f32 %v679_v29, %v1239_v12 }
  0xee   : > { %v697_v43 = vadd.f32 %v689_v54, %v669_v34  ;;  %v502_v49 = vmul.f32 %v651_v16, %v1214_v22  ;;  %v522_v51 = vmul.f32 %v679_v29, %v1216_v25  ;;  %v585_v57 = vadd.f32 %v577_v33, %v557_v45 }
  0xef   : > { %v746_v46 = vmax.f32 %v738_v39, 0.0  ;;  %v698_v56 = vadd.f32 %v690_v50, %v670_v24  ;;  %v640_v58 = vadd.f32 %v632_v40, %v612_v44  ;;  %v719_v47 = vmul.f32 %v1235_v61, %v707_v37  ;;  %v681_v39 = vld [vmem:[#allocation2 + $0x71] sm:$0xff] }
  0xf0   : > { %v725_v53 = vadd.f32 %v717_v60, %v697_v43  ;;  %v633_v54 = vmul.f32 %v707_v37, %v1241_v13  ;;  %v530_v0 = vadd.f32 %v522_v51, %v502_v49  ;;  %v550_v1 = vmul.f32 %v707_v37, %v1221_v36 }
  0xf1   : > { %1050 = vmatprep.mubr.msk.f32.mxu1 %vm279_vm1, %v746_v46  ;;  %v726_v11 = vadd.f32 %v718_v19, %v698_v56  ;;  %v671_v15 = vadd.f32 %v663_v41, %v640_v58  ;;  %v613_v16 = vadd.f32 %v605_v48, %v585_v57  ;;  %v664_v50 = vmul.f32 %v1226_v52, %v652_v59  ;;  %v709_v46 = vld [vmem:[#allocation2 + $0x72] sm:$0xff] }
  0xf2   : > { %v739_v10 = vadd.f32 %v1278_v14, %v725_v53  ;;  %v692_v60 = vmul.f32 %v1229_v55, %v680_v62  ;;  %v558_v23 = vadd.f32 %v550_v1, %v530_v0  ;;  %v578_v26 = vmul.f32 %v652_v59, %v1237_v63 }
  0xf3   : > { %v740_v27 = vadd.f32 %v1278_v14, %v726_v11  ;;  %v699_v28 = vadd.f32 %v691_v42, %v671_v15  ;;  %v641_v29 = vadd.f32 %v633_v54, %v613_v16  ;;  %v606_v21 = vmul.f32 %v680_v62, %v1239_v12  ;;  %v682_v15 = vld [vmem:[#allocation2 + $0x81] sm:$0xff] }
  0xf4   : > { %v747_v18 = vmax.f32 %v739_v10, 0.0  ;;  %v586_v31 = vadd.f32 %v578_v26, %v558_v23  ;;  %v503_v19 = vmul.f32 %v652_v59, %v1214_v22  ;;  %v523_v32 = vmul.f32 %v680_v62, %v1216_v25 }
  0xf5   : > { %v748_v33 = vmax.f32 %v740_v27, 0.0  ;;  %v727_v34 = vadd.f32 %v719_v47, %v699_v28  ;;  %v672_v30 = vadd.f32 %v664_v50, %v641_v29  ;;  %v634_v35 = vmul.f32 %v708_v17, %v1241_v13  ;;  %v654_v47 = vld [vmem:[#allocation2 + $0x80] sm:$0xff]  ;;  %v655_v27 = vld [vmem:[#allocation2 + $0x90] sm:$0xff] }
  0xf6   : > { %1051 = vmatmul.mubr.msk.f32.vlgmr.msra.gmra.mxu1 %vm279_vm1, %v747_v18  ;;  %v614_v38 = vadd.f32 %v606_v21, %v586_v31  ;;  %v531_v40 = vadd.f32 %v523_v32, %v503_v19  ;;  %v551_v41 = vmul.f32 %v708_v17, %v1221_v36  ;;  %v579_v42 = vmul.f32 %v653_v20, %v1237_v63  ;;  %v710_v18 = vld [vmem:[#allocation2 + $0x82] sm:$0xff]  ;;  %v683_v21 = vld [vmem:[#allocation2 + $0x91] sm:$0xff] }
  0xf7   : > { %1053 = vmatprep.mubr.msk.f32.mxu1 %vm279_vm1, %v748_v33  ;;  %v741_v43 = vadd.f32 %v1278_v14, %v727_v34  ;;  %v700_v24 = vadd.f32 %v692_v60, %v672_v30  ;;  %v720_v44 = vmul.f32 %v1235_v61, %v708_v17  ;;  %v665_v45 = vmul.f32 %v1226_v52, %v653_v20 }
  0xf8   : > { %v642_v37 = vadd.f32 %v634_v35, %v614_v38  ;;  %v559_v48 = vadd.f32 %v551_v41, %v531_v40  ;;  %v504_v53 = vmul.f32 %v653_v20, %v1214_v22  ;;  %v524_v56 = vmul.f32 %v681_v39, %v1216_v25  ;;  %v711_v35 = vld [vmem:[#allocation2 + $0x92] sm:$0xff] }
  0xf9   : > { %v749_v49 = vmax.f32 %v741_v43, 0.0  ;;  %v728_v51 = vadd.f32 %v720_v44, %v700_v24  ;;  %v693_v57 = vmul.f32 %v1229_v55, %v681_v39  ;;  %v607_v62 = vmul.f32 %v681_v39, %v1239_v12 }
  0xfa   : > { %v673_v58 = vadd.f32 %v665_v45, %v642_v37  ;;  %v587_v59 = vadd.f32 %v579_v42, %v559_v48  ;;  %v532_v0 = vadd.f32 %v524_v56, %v504_v53  ;;  %v552_v1 = vmul.f32 %v709_v46, %v1221_v36 }
  0xfb   : > { %1054 = vmatmul.mubr.msk.f32.gmra.mxu1 %vm279_vm1, %v749_v49  ;;  %v742_v54 = vadd.f32 %v1278_v14, %v728_v51  ;;  %v721_v11 = vmul.f32 %v1235_v61, %v709_v46  ;;  %v635_v25 = vmul.f32 %v709_v46, %v1241_v13  ;;  %v580_v60 = vmul.f32 %v654_v47, %v1237_v63 }
  0xfc   : > { %v701_v10 = vadd.f32 %v693_v57, %v673_v58  ;;  %v615_v22 = vadd.f32 %v607_v62, %v587_v59  ;;  %v560_v50 = vadd.f32 %v552_v1, %v532_v0  ;;  %v666_v26 = vmul.f32 %v1226_v52, %v654_v47 }
  0xfd   : > { %v750_v16 = vmax.f32 %v742_v54, 0.0  ;;  %v608_v28 = vmul.f32 %v682_v15, %v1239_v12  ;;  %v694_v31 = vmul.f32 %v1229_v55, %v682_v15  ;;  %v636_v63 = vmul.f32 %v710_v18, %v1241_v13 }
  0xfe   : > { %v729_v17 = vadd.f32 %v721_v11, %v701_v10  ;;  %v643_v23 = vadd.f32 %v635_v25, %v615_v22  ;;  %v588_v36 = vadd.f32 %v580_v60, %v560_v50  ;;  %v667_v32 = vmul.f32 %v1226_v52, %v655_v27 }
  0xff   : > { %1056 = vmatprep.mubr.msk.f32.mxu1 %vm279_vm1, %v750_v16  ;;  %v722_v30 = vmul.f32 %v1235_v61, %v710_v18  ;;  %v695_v39 = vmul.f32 %v1229_v55, %v683_v21  ;;  %v723_v41 = vmul.f32 %v1235_v61, %v711_v35  ;;  %v991_v55 = vld [vmem:[%s1369_s6] ss:$0 sm:$0xff] }
 0x100   : > { %v743_v29 = vadd.f32 %v1278_v14, %v729_v17  ;;  %v674_v20 = vadd.f32 %v666_v26, %v643_v23  ;;  %v616_v19 = vadd.f32 %v608_v28, %v588_v36 }
 0x102   : > { %v751_v33 = vmax.f32 %v743_v29, 0.0  ;;  %v702_v34 = vadd.f32 %v694_v31, %v674_v20  ;;  %v644_v38 = vadd.f32 %v636_v63, %v616_v19 }
 0x104   : > { %1057 = vmatmul.mubr.msk.f32.gmra.mxu1 %vm279_vm1, %v751_v33  ;;  %v730_v12 = vadd.f32 %v722_v30, %v702_v34  ;;  %v675_v40 = vadd.f32 %v667_v32, %v644_v38 }
 0x106   : > { %v744_v42 = vadd.f32 %v1278_v14, %v730_v12  ;;  %v703_v13 = vadd.f32 %v695_v39, %v675_v40 }
 0x108   : > { %v752_v43 = vmax.f32 %v744_v42, 0.0  ;;  %v731_v52 = vadd.f32 %v723_v41, %v703_v13 }
 0x10a   : > { %1059 = vmatprep.mubr.msk.f32.mxu1 %vm279_vm1, %v752_v43  ;;  %v745_v24 = vadd.f32 %v1278_v14, %v731_v52 }
 0x10c   : > { %v753_v44 = vmax.f32 %v745_v24, 0.0 }
 0x10e   : > { %1060 = vmatmul.mubr.msk.f32.gmra.mxu1 %vm279_vm1, %v753_v44 }
 0x1b6   : > { %v1052_v37 = vpop.f32.mrf.mxu1 }
 0x1b7   : > { %v856_v45 = vadd.f32 %v1052_v37, %v991_v55 }
 0x1b8   : > { %v850_v61 = vpop.f32.mrf.mxu1 }
 0x1b9   : > { %v898_v46 = vadd.f32 %v856_v45, %v1144_v3  ;;  %v851_v48 = vadd.f32 %v991_v55, %v850_v61 }
 0x1bb   : > { %907 = vst.msk [vmem:[%s278_s11 + $0x8] sm:$0xff] %vm334_vm0, %v898_v46  ;;  %v897_v14 = vadd.f32 %v851_v48, %v1142_v2  ;;  %v1055_v49 = vpop.f32.mrf.mxu1 }
 0x1bc   : > { %v866_v51 = vadd.f32 %v1055_v49, %v991_v55 }
 0x1bd   : > { %906 = vst.msk [vmem:[%s278_s11] sm:$0xff] %vm334_vm0, %v897_v14  ;;  %v860_v53 = vpop.f32.mrf.mxu1 }
 0x1be   : > { %v900_v56 = vadd.f32 %v866_v51, %v1154_v5  ;;  %v861_v58 = vadd.f32 %v991_v55, %v860_v53 }
 0x1c0   : > { %909 = vst.msk [vmem:[%s278_s11 + $0x18] sm:$0xff] %vm334_vm0, %v900_v56  ;;  %v899_v57 = vadd.f32 %v861_v58, %v1146_v4 }
 0x1c2   : > { %908 = vst.msk [vmem:[%s278_s11 + $0x10] sm:$0xff] %vm334_vm0, %v899_v57 }
 0x1c4   : > { %v1058_v3 = vpop.f32.mrf.mxu1 }
 0x1c5   : > { %v876_v59 = vadd.f32 %v1058_v3, %v991_v55 }
 0x1c6   : > { %v870_v62 = vpop.f32.mrf.mxu1 }
 0x1c7   : > { %v902_v47 = vadd.f32 %v876_v59, %v1162_v7  ;;  %v871_v2 = vadd.f32 %v991_v55, %v870_v62 }
 0x1c9   : > { %911 = vst.msk [vmem:[%s278_s11 + $0x28] sm:$0xff] %vm334_vm0, %v902_v47  ;;  %v901_v54 = vadd.f32 %v871_v2, %v1156_v6 }
 0x1cb   : > { %910 = vst.msk [vmem:[%s278_s11 + $0x20] sm:$0xff] %vm334_vm0, %v901_v54 }
 0x1ce   : > { %v1061_v5 = vpop.f32.mrf.mxu1 }
 0x1cf   : > { %v886_v0 = vadd.f32 %v1061_v5, %v991_v55 }
 0x1d0   : > { %v880_v1 = vpop.f32.mrf.mxu1 }
 0x1d1   : > { %v904_v10 = vadd.f32 %v886_v0, %v1170_v9  ;;  %v881_v4 = vadd.f32 %v991_v55, %v880_v1 }
 0x1d3   : > { %913 = vst.msk [vmem:[%s278_s11 + $0x38] sm:$0xff] %vm334_vm0, %v904_v10  ;;  %v903_v11 = vadd.f32 %v881_v4, %v1164_v8 }
 0x1d5   : > { %912 = vst.msk [vmem:[%s278_s11 + $0x30] sm:$0xff] %vm334_vm0, %v903_v11 }
 0x1d6 PF: > { %s17_s24 = sadd.s32 1, %s1077_s24  }
 0x1d7   : > { %p14_p4 = scmp.ge.s32.totalorder %s17_s24, 4  }
 0x1d9   :  { %16 = sbr.rel (!%p14_p4) target bundleno = 1 (0x1), region = 84 }

// kernel: inverted_residual_forward.3
= control target key start
LH: loop header
LB: loop body
LE: loop exit
PB: predicated region body
PF: predicated region fallthrough
CT: control target
= control target key end

     0   :  { %s1689_s27 = smov 0   ;;  %s2031_s0 = inlined_call_operand.vmem [shape: f32[2,16,8,16], index: 0, kind: input, shape index: {}]   ;;  %s2032_s1 = inlined_call_operand.vmem [shape: f32[16,32], index: 1, kind: input, shape index: {}]   ;;  %s2033_s2 = inlined_call_operand.vmem [shape: f32[16,32], index: 2, kind: input, shape index: {}]   ;;  %s2034_s3 = inlined_call_operand.vmem [shape: f32[1,32], index: 3, kind: input, shape index: {}]   ;;  %s2035_s4 = inlined_call_operand.vmem [shape: f32[9,32], index: 4, kind: input, shape index: {}]   ;;  %s2036_s5 = inlined_call_operand.vmem [shape: f32[1,32], index: 5, kind: input, shape index: {}]   ;;  %s2037_s6 = inlined_call_operand.vmem [shape: f32[32,16], index: 6, kind: input, shape index: {}]   ;;  %s2038_s7 = inlined_call_operand.vmem [shape: f32[1,16], index: 7, kind: input, shape index: {}]   ;;  %s2039_s8 = inlined_call_operand.vmem [shape: f32[2,8,8,16], index: 8, kind: output, shape index: {}]  }
   0x1 LB: > { %s1441_s28 = sadd.s32 4294967295, %s1641_s27   ;;  %p1445_p0 = scmp.ge.s32.totalorder %s1641_s27, 1  ;;  %s1641_s27 = sphi %s1689_s27, %s18_s27  }
   0x2   : > { %p262_p1 = scmp.lt.s32.totalorder %s1641_s27, 3 }
   0x4   : > { %p263_p2 = pnand %p1445_p0, %p262_p1 }
   0x5   : > { %p296_p3 = scmp.lt.s32.totalorder (!%p263_p2), %s1441_s28, 1 }
   0x6   : > { %266 = sbr.rel (%p263_p2) target bundleno = 480 (0x1e0), region = 52 }
   0xb   : > { %v355_v0 = vld [vmem:[%s2032_s1 + $0x8] sm:$0xff]  ;;  %v354_v1 = vld [vmem:[%s2032_s1] sm:$0xff]  ;;  %s2041_s28 = smov (!%p296_p3, %s1441_s28), 1  ;;  %vm391_vm0 = vcmask 130048   ;;  %vm306_vm1 = vcmask 261120   ;;  %vm308_vm2 = vcmask 253952   ;;  %v803_v26 = vlaneseq }
   0xc   : > { %1622 = vmatprep.subr.mxu1 %v355_v0  ;;  %1546 = vmatprep.subr.mxu0 %v355_v0  ;;  %v357_v2 = vld [vmem:[%s2033_s2 + $0x8] sm:$0xff]  ;;  %s1496_s13 = sshll.u32 %s2041_s28, 7  ;;  %v356_v6 = vld [vmem:[%s2033_s2] sm:$0xff]  ;;  %v1643_v20 = vmov 0.0   ;;  %v362_v21 = vld [vmem:[%s2037_s6 + $0x18] sm:$0xff]  ;;  %s1497_s15 = sshll.u32 %s2041_s28, 6 }
   0xd   : > { %1624 = vmatpush3.msra.mxu1 %v355_v0  ;;  %1547 = vmatpush3.msra.mxu0 %v355_v0  ;;  %s1712_s16 = scalar_lea.vmem %s2031_s0, %s1496_s13  ;;  %307 = vst.msk [vmem:[#allocation2] sm:$0xff] %vm306_vm1, %v1643_v20  ;;  %310 = vst.msk [vmem:[#allocation2 + $0x10] sm:$0xff] %vm306_vm1, %v1643_v20  ;;  %v361_v22 = vld [vmem:[%s2037_s6 + $0x10] sm:$0xff]  ;;  %v360_v23 = vld [vmem:[%s2037_s6 + $0x8] sm:$0xff]  ;;  %v1803_v31 = vshrl.u32 %v803_v26, 7  ;;  %s305_s20 = scalar_lea.vmem %s2039_s8, %s1497_s15 }
   0xe   : > { %1623 = vmatprep.subr.mxu1 %v354_v1  ;;  %1548 = vmatprep.subr.mxu0 %v354_v1  ;;  %v381_v3 = vld [vmem:[%s1712_s16 + $0x60] sm:$0xff]  ;;  %v382_v4 = vld [vmem:[%s1712_s16 + $0x68] sm:$0xff]  ;;  %v383_v5 = vld [vmem:[%s1712_s16 + $0x70] sm:$0xff]  ;;  %319 = vst.msk [vmem:[#allocation2 + $0x40] sm:$0x1] %vm308_vm2, %v1643_v20 }
   0xf   : > { %1625 = vmatpush3.msra.mxu1 %v354_v1  ;;  %1549 = vmatpush3.msra.mxu0 %v354_v1  ;;  %v369_v7 = vld [vmem:[%s1712_s16] sm:$0xff]  ;;  %v370_v8 = vld [vmem:[%s1712_s16 + $0x8] sm:$0xff]  ;;  %v371_v9 = vld [vmem:[%s1712_s16 + $0x10] sm:$0xff]  ;;  %309 = vst.msk [vmem:[#allocation2 + $0x8] sm:$0x1] %vm308_vm2, %v1643_v20  ;;  %v805_v37 = vsub.s32 0, %v1803_v31 }
  0x10   : > { %1574 = vmatprep.subr.mxu1 %v357_v2  ;;  %1568 = vmatprep.mubr.msk.f32.mxu1 %vm391_vm0, %v381_v3  ;;  %v384_v10 = vld [vmem:[%s1712_s16 + $0x78] sm:$0xff]  ;;  %v373_v12 = vld [vmem:[%s1712_s16 + $0x20] sm:$0xff]  ;;  %v374_v13 = vld [vmem:[%s1712_s16 + $0x28] sm:$0xff]  ;;  %318 = vst.msk [vmem:[#allocation2 + $0x20] sm:$0x1] %vm308_vm2, %v1643_v20  ;;  %v813_v44 = vsub.s32 1, %v1803_v31 }
  0x11   : > { %1569 = vmatmul.mubr.msk.f32.vlgmr.msra.gmra.mxu1 %vm391_vm0, %v382_v4  ;;  %1550 = vmatprep.mubr.msk.f32.mxu0 %vm391_vm0, %v369_v7  ;;  %v372_v11 = vld [vmem:[%s1712_s16 + $0x18] sm:$0xff]  ;;  %v375_v14 = vld [vmem:[%s1712_s16 + $0x30] sm:$0xff]  ;;  %v377_v16 = vld [vmem:[%s1712_s16 + $0x40] sm:$0xff]  ;;  %320 = vst.msk [vmem:[#allocation2 + $0x60] sm:$0x1] %vm308_vm2, %v1643_v20  ;;  %v820_v53 = vsub.s32 2, %v1803_v31 }
  0x12   : > { %1575 = vmatpush3.msra.mxu1 %v357_v2  ;;  %1571 = vmatprep.mubr.msk.f32.mxu1 %vm391_vm0, %v383_v5  ;;  %v376_v15 = vld [vmem:[%s1712_s16 + $0x38] sm:$0xff]  ;;  %v378_v17 = vld [vmem:[%s1712_s16 + $0x48] sm:$0xff]  ;;  %v379_v18 = vld [vmem:[%s1712_s16 + $0x50] sm:$0xff]  ;;  %321 = vst.msk [vmem:[#allocation2 + $0x80] sm:$0x1] %vm308_vm2, %v1643_v20 }
  0x13   : > { %1576 = vmatprep.subr.mxu1 %v356_v6  ;;  %1551 = vmatmul.mubr.msk.f32.vlgmr.msra.gmra.mxu0 %vm391_vm0, %v370_v8  ;;  %v380_v19 = vld [vmem:[%s1712_s16 + $0x58] sm:$0xff]  ;;  %322 = vst.msk [vmem:[#allocation2 + $0xa0] sm:$0x1] %vm308_vm2, %v1643_v20  ;;  %323 = vst.msk [vmem:[#allocation2 + $0xc0] sm:$0x1] %vm308_vm2, %v1643_v20  ;;  %v359_v24 = vld [vmem:[%s2037_s6] sm:$0xff] }
  0x14   : > { %1577 = vmatpush3.msra.mxu1 %v356_v6  ;;  %1553 = vmatprep.mubr.msk.f32.mxu0 %vm391_vm0, %v371_v9  ;;  %324 = vst.msk [vmem:[#allocation2 + $0xe0] sm:$0x1] %vm308_vm2, %v1643_v20  ;;  %325 = vst.msk [vmem:[#allocation2 + $0x100] sm:$0x1] %vm308_vm2, %v1643_v20  ;;  %v1800_v25 = vld [vmem:[%s2034_s3] ss:$0 sm:$0xff] }
  0x15   : > { %1572 = vmatmul.mubr.msk.f32.gmra.mxu1 %vm391_vm0, %v384_v10  ;;  %326 = vst.msk [vmem:[#allocation2 + $0x120] sm:$0x1] %vm308_vm2, %v1643_v20  ;;  %327 = vst.msk [vmem:[#allocation2 + $0x140] sm:$0x1] %vm308_vm2, %v1643_v20  ;;  %1602 = vmatprep.subr.mxu0 %v362_v21  ;;  %v1819_v49 = vld [vmem:[%s2035_s4] sm:$0xff]  ;;  %v810_v59 = vld [vmem:[#allocation2 + $0x10] sm:$0xff] }
  0x16   : > { %1578 = vmatprep.mubr.msk.f32.mxu1 %vm391_vm0, %v369_v7  ;;  %328 = vst.msk [vmem:[#allocation2 + $0x160] sm:$0x1] %vm308_vm2, %v1643_v20  ;;  %329 = vst.msk [vmem:[#allocation2 + $0x180] sm:$0x1] %vm308_vm2, %v1643_v20  ;;  %1603 = vmatpush3.msra.mxu0 %v362_v21  ;;  %v1822_v52 = vrot.slane %v1819_v49, %v805_v37  ;;  %v1830_v62 = vrot.slane %v1819_v49, %v813_v44 }
  0x17   : > { %1554 = vmatmul.mubr.msk.f32.gmra.mxu0 %vm391_vm0, %v372_v11  ;;  %330 = vst.msk [vmem:[#allocation2 + $0x1a0] sm:$0x1] %vm308_vm2, %v1643_v20  ;;  %331 = vst.msk [vmem:[#allocation2 + $0x1c0] sm:$0x1] %vm308_vm2, %v1643_v20  ;;  %1604 = vmatprep.subr.mxu0 %v361_v22  ;;  %v1839_v7 = vrot.slane %v1819_v49, %v820_v53 }
  0x18   : > { %1556 = vmatprep.mubr.msk.f32.mxu0 %vm391_vm0, %v373_v12  ;;  %332 = vst.msk [vmem:[#allocation2 + $0x1e0] sm:$0x1] %vm308_vm2, %v1643_v20  ;;  %333 = vst.msk [vmem:[#allocation2 + $0x200] sm:$0x1] %vm308_vm2, %v1643_v20  ;;  %1605 = vmatpush3.msra.mxu0 %v361_v22  ;;  %v815_v6 = vmul.f32 %v1830_v62, %v810_v59 }
  0x19   : > { %1579 = vmatmul.mubr.msk.f32.vlgmr.msra.gmra.mxu1 %vm391_vm0, %v370_v8  ;;  %317 = vst.msk [vmem:[#allocation2] sm:$0x1] %vm308_vm2, %v1643_v20  ;;  %1606 = vmatprep.subr.mxu0 %v360_v23 }
  0x1a   : > { %1581 = vmatprep.mubr.msk.f32.mxu1 %vm391_vm0, %v371_v9  ;;  %1607 = vmatpush3.msra.mxu0 %v360_v23 }
  0x1b   : > { %1557 = vmatmul.mubr.msk.f32.gmra.mxu0 %vm391_vm0, %v374_v13  ;;  %1608 = vmatprep.subr.mxu0 %v359_v24 }
  0x1c   : > { %1559 = vmatprep.mubr.msk.f32.mxu0 %vm391_vm0, %v375_v14  ;;  %1609 = vmatpush3.msra.mxu0 %v359_v24 }
  0x1d   : > { %1582 = vmatmul.mubr.msk.f32.gmra.mxu1 %vm391_vm0, %v372_v11 }
  0x1e   : > { %1584 = vmatprep.mubr.msk.f32.mxu1 %vm391_vm0, %v373_v12  ;;  %v817_v12 = vld [vmem:[#allocation2 + $0x1] sm:$0xff] }
  0x1f   : > { %1560 = vmatmul.mubr.msk.f32.gmra.mxu0 %vm391_vm0, %v376_v15  ;;  %v822_v26 = vmul.f32 %v1839_v7, %v817_v12 }
  0x20   : > { %1562 = vmatprep.mubr.msk.f32.mxu0 %vm391_vm0, %v377_v16  ;;  %v802_v58 = vld [vmem:[#allocation2] sm:$0xff] }
  0x21   : > { %1585 = vmatmul.mubr.msk.f32.gmra.mxu1 %vm391_vm0, %v374_v13 }
  0x22   : > { %1587 = vmatprep.mubr.msk.f32.mxu1 %vm391_vm0, %v375_v14 }
  0x23   : > { %1563 = vmatmul.mubr.msk.f32.gmra.mxu0 %vm391_vm0, %v378_v17 }
  0x24   : > { %1565 = vmatprep.mubr.msk.f32.mxu0 %vm391_vm0, %v379_v18 }
  0x25   : > { %1588 = vmatmul.mubr.msk.f32.gmra.mxu1 %vm391_vm0, %v376_v15  ;;  %v839_v15 = vsub.s32 4, %v1803_v31 }
  0x26   : > { %1590 = vmatprep.mubr.msk.f32.mxu1 %vm391_vm0, %v377_v16  ;;  %v856_v16 = vsub.s32 6, %v1803_v31 }
  0x27   : > { %1566 = vmatmul.mubr.msk.f32.gmra.mxu0 %vm391_vm0, %v380_v19  ;;  %v1860_v37 = vrot.slane %v1819_v49, %v839_v15 }
  0x29   : > { %1591 = vmatmul.mubr.msk.f32.gmra.mxu1 %vm391_vm0, %v378_v17  ;;  %v865_v17 = vsub.s32 7, %v1803_v31 }
  0x2a   : > { %1593 = vmatprep.mubr.msk.f32.mxu1 %vm391_vm0, %v379_v18 }
  0x2d   : > { %1594 = vmatmul.mubr.msk.f32.gmra.mxu1 %vm391_vm0, %v380_v19 }
  0x2e   : > { %1596 = vmatprep.mubr.msk.f32.mxu1 %vm391_vm0, %v381_v3 }
  0x31   : > { %1597 = vmatmul.mubr.msk.f32.gmra.mxu1 %vm391_vm0, %v382_v4 }
  0x32   : > { %1599 = vmatprep.mubr.msk.f32.mxu1 %vm391_vm0, %v383_v5  ;;  %v807_v5 = vmul.f32 %v1822_v52, %v802_v58 }
  0x34   : > { %v816_v24 = vadd.f32 %v815_v6, %v807_v5 }
  0x35   : > { %1600 = vmatmul.mubr.msk.f32.gmra.mxu1 %vm391_vm0, %v384_v10 }
  0xd1   : > { %v1570_v27 = vpop.f32.mrf.mxu1 }
  0xd2   : > { %v572_v28 = vadd.f32 %v1570_v27, %v1800_v25  ;;  %v830_v27 = vsub.s32 3, %v1803_v31 }
  0xd3   : > { %v566_v29 = vpop.f32.mrf.mxu1  ;;  %v1552_v30 = vpop.f32.mrf.mxu0 }
  0xd4   : > { %v598_v32 = vmax.f32 %v572_v28, 0.0  ;;  %v567_v33 = vadd.f32 %v1800_v25, %v566_v29  ;;  %v512_v34 = vadd.f32 %v1552_v30, %v1800_v25  ;;  %v846_v28 = vsub.s32 5, %v1803_v31 }
  0xd5   : > { %v1573_v35 = vpop.f32.mrf.mxu1  ;;  %v506_v36 = vpop.f32.mrf.mxu0  ;;  %v1866_v31 = vrot.slane %v1819_v49, %v865_v17 }
  0xd6   : > { %779 = vst.msk [vmem:[#allocation2 + $0x1d0] sm:$0xff] %vm306_vm1, %v598_v32  ;;  %v597_v38 = vmax.f32 %v567_v33, 0.0  ;;  %v582_v39 = vadd.f32 %v1573_v35, %v1800_v25  ;;  %v586_v40 = vmax.f32 %v512_v34, 0.0  ;;  %v507_v41 = vadd.f32 %v1800_v25, %v506_v36 }
  0xd7   : > { %v576_v42 = vpop.f32.mrf.mxu1  ;;  %v1555_v43 = vpop.f32.mrf.mxu0 }
  0xd8   : > { %778 = vst.msk [vmem:[#allocation2 + $0x1b0] sm:$0xff] %vm306_vm1, %v597_v38  ;;  %v600_v45 = vmax.f32 %v582_v39, 0.0  ;;  %v577_v46 = vadd.f32 %v1800_v25, %v576_v42  ;;  %767 = vst.msk [vmem:[#allocation2 + $0x50] sm:$0xff] %vm306_vm1, %v586_v40  ;;  %v585_v47 = vmax.f32 %v507_v41, 0.0  ;;  %v522_v48 = vadd.f32 %v1555_v43, %v1800_v25 }
  0xd9   : > { %v1580_v50 = vpop.f32.mrf.mxu1  ;;  %v516_v51 = vpop.f32.mrf.mxu0  ;;  %v1863_v38 = vrot.slane %v1819_v49, %v856_v16 }
  0xda   : > { %781 = vst.msk [vmem:[#allocation2 + $0x210] sm:$0xff] %vm306_vm1, %v600_v45  ;;  %v599_v54 = vmax.f32 %v577_v46, 0.0  ;;  %v673_v55 = vadd.f32 %v1580_v50, %v1800_v25  ;;  %766 = vst.msk [vmem:[#allocation2 + $0x30] sm:$0xff] %vm306_vm1, %v585_v47  ;;  %v588_v56 = vmax.f32 %v522_v48, 0.0  ;;  %v517_v57 = vadd.f32 %v1800_v25, %v516_v51 }
  0xdb   : > { %v667_v60 = vpop.f32.mrf.mxu1  ;;  %v1558_v61 = vpop.f32.mrf.mxu0  ;;  %v823_v47 = vadd.f32 %v822_v26, %v816_v24  ;;  %v1873_v48 = vrot.slane %v1819_v49, %v830_v27  ;;  %v1876_v50 = vrot.slane %v1819_v49, %v846_v28 }
  0xdc   : > { %780 = vst.msk [vmem:[#allocation2 + $0x1f0] sm:$0xff] %vm306_vm1, %v599_v54  ;;  %v747_v63 = vmax.f32 %v673_v55, 0.0  ;;  %v668_v0 = vadd.f32 %v1800_v25, %v667_v60  ;;  %769 = vst.msk [vmem:[#allocation2 + $0x90] sm:$0xff] %vm306_vm1, %v588_v56  ;;  %v587_v1 = vmax.f32 %v517_v57, 0.0  ;;  %v532_v2 = vadd.f32 %v1558_v61, %v1800_v25 }
  0xdd   : > { %v1583_v3 = vpop.f32.mrf.mxu1  ;;  %v526_v4 = vpop.f32.mrf.mxu0 }
  0xde   : > { %784 = vst.msk [vmem:[#allocation2 + $0x41] sm:$0xff] %vm306_vm1, %v747_v63  ;;  %v746_v8 = vmax.f32 %v668_v0, 0.0  ;;  %v683_v9 = vadd.f32 %v1583_v3, %v1800_v25  ;;  %768 = vst.msk [vmem:[#allocation2 + $0x70] sm:$0xff] %vm306_vm1, %v587_v1  ;;  %v590_v10 = vmax.f32 %v532_v2, 0.0  ;;  %v527_v11 = vadd.f32 %v1800_v25, %v526_v4 }
  0xdf   : > { %v677_v13 = vpop.f32.mrf.mxu1  ;;  %v1561_v14 = vpop.f32.mrf.mxu0  ;;  %v892_v29 = vld [vmem:[#allocation2 + $0x50] sm:$0xff] }
  0xe0   : > { %783 = vst.msk [vmem:[#allocation2 + $0x21] sm:$0xff] %vm306_vm1, %v746_v8  ;;  %v749_v18 = vmax.f32 %v683_v9, 0.0  ;;  %v678_v19 = vadd.f32 %v1800_v25, %v677_v13  ;;  %771 = vst.msk [vmem:[#allocation2 + $0xd0] sm:$0xff] %vm306_vm1, %v590_v10  ;;  %v589_v20 = vmax.f32 %v527_v11, 0.0  ;;  %v542_v21 = vadd.f32 %v1561_v14, %v1800_v25 }
  0xe1   : > { %v1586_v22 = vpop.f32.mrf.mxu1  ;;  %v536_v23 = vpop.f32.mrf.mxu0  ;;  %v836_v43 = vld [vmem:[#allocation2 + $0x30] sm:$0xff]  ;;  %v893_v51 = vmul.f32 %v892_v29, %v1830_v62  ;;  %v1885_v63 = vmul.f32 %v892_v29, %v1866_v31 }
  0xe2   : > { %786 = vst.msk [vmem:[#allocation2 + $0x81] sm:$0xff] %vm306_vm1, %v749_v18  ;;  %v748_v30 = vmax.f32 %v678_v19, 0.0  ;;  %v693_v32 = vadd.f32 %v1586_v22, %v1800_v25  ;;  %770 = vst.msk [vmem:[#allocation2 + $0xb0] sm:$0xff] %vm306_vm1, %v589_v20  ;;  %v592_v33 = vmax.f32 %v542_v21, 0.0  ;;  %v537_v34 = vadd.f32 %v1800_v25, %v536_v23  ;;  %v1905_v18 = vld [vmem:[%s2035_s4 + $0x8] ss:$0 sm:$0xff] }
  0xe3   : > { %v687_v35 = vpop.f32.mrf.mxu1  ;;  %v1564_v36 = vpop.f32.mrf.mxu0  ;;  %v920_v58 = vld [vmem:[#allocation2 + $0x90] sm:$0xff]  ;;  %v841_v49 = vmul.f32 %v1860_v37, %v836_v43 }
  0xe4   : > { %785 = vst.msk [vmem:[#allocation2 + $0x61] sm:$0xff] %vm306_vm1, %v748_v30  ;;  %v751_v39 = vmax.f32 %v693_v32, 0.0  ;;  %v688_v40 = vadd.f32 %v1800_v25, %v687_v35  ;;  %773 = vst.msk [vmem:[#allocation2 + $0x110] sm:$0xff] %vm306_vm1, %v592_v33  ;;  %v591_v41 = vmax.f32 %v537_v34, 0.0  ;;  %v552_v42 = vadd.f32 %v1564_v36, %v1800_v25 }
  0xe5   : > { %v888_v44 = vld [vmem:[#allocation2 + $0x40] sm:$0xff]  ;;  %v1589_v45 = vpop.f32.mrf.mxu1  ;;  %v546_v46 = vpop.f32.mrf.mxu0  ;;  %v1889_v1 = vmul.f32 %v920_v58, %v1866_v31  ;;  %v906_v6 = vld [vmem:[#allocation2 + $0x70] sm:$0xff]  ;;  %v937_v13 = vmul.f32 %v920_v58, %v1830_v62 }
  0xe6   : > { %788 = vst.msk [vmem:[#allocation2 + $0xc1] sm:$0xff] %vm306_vm1, %v751_v39  ;;  %v750_v53 = vmax.f32 %v688_v40, 0.0  ;;  %v703_v54 = vadd.f32 %v1589_v45, %v1800_v25  ;;  %772 = vst.msk [vmem:[#allocation2 + $0xf0] sm:$0xff] %vm306_vm1, %v591_v41  ;;  %v594_v55 = vmax.f32 %v552_v42, 0.0  ;;  %v547_v56 = vadd.f32 %v1800_v25, %v546_v46  ;;  %v869_v57 = vld [vmem:[#allocation2 + $0x41] sm:$0xff] }
  0xe7   : > { %v697_v59 = vpop.f32.mrf.mxu1  ;;  %v1567_v60 = vpop.f32.mrf.mxu0  ;;  %v827_v61 = vld [vmem:[#allocation2 + $0x20] sm:$0xff]  ;;  %v889_v0 = vmul.f32 %v888_v44, %v1822_v52  ;;  %v896_v12 = vmul.f32 %v869_v57, %v1839_v7  ;;  %v858_v23 = vmul.f32 %v888_v44, %v1863_v38  ;;  %v907_v27 = vmul.f32 %v906_v6, %v1860_v37 }
  0xe8   : > { %787 = vst.msk [vmem:[#allocation2 + $0xa1] sm:$0xff] %vm306_vm1, %v750_v53  ;;  %v753_v2 = vmax.f32 %v703_v54, 0.0  ;;  %v698_v3 = vadd.f32 %v1800_v25, %v697_v59  ;;  %775 = vst.msk [vmem:[#allocation2 + $0x150] sm:$0xff] %vm306_vm1, %v594_v55  ;;  %v593_v4 = vmax.f32 %v547_v56, 0.0  ;;  %v562_v5 = vadd.f32 %v1567_v60, %v1800_v25  ;;  %v843_v19 = vld [vmem:[#allocation2 + $0x21] sm:$0xff] }
  0xe9   : > { %v1592_v8 = vpop.f32.mrf.mxu1  ;;  %v556_v9 = vpop.f32.mrf.mxu0  ;;  %v832_v10 = vmul.f32 %v1873_v48, %v827_v61  ;;  %v894_v11 = vadd.f32 %v893_v51, %v889_v0  ;;  %v915_v20 = vld [vmem:[#allocation2 + $0x80] sm:$0xff]  ;;  %v848_v39 = vmul.f32 %v1876_v50, %v843_v19  ;;  %v874_v40 = vmul.f32 %v1905_v18, %v869_v57  ;;  %v950_v46 = vld [vmem:[#allocation2 + $0xb0] sm:$0xff] }
  0xea   : > { %790 = vst.msk [vmem:[#allocation2 + $0x101] sm:$0xff] %vm306_vm1, %v753_v2  ;;  %v752_v14 = vmax.f32 %v698_v3, 0.0  ;;  %v713_v15 = vadd.f32 %v1592_v8, %v1800_v25  ;;  %774 = vst.msk [vmem:[#allocation2 + $0x130] sm:$0xff] %vm306_vm1, %v593_v4  ;;  %v596_v16 = vmax.f32 %v562_v5, 0.0  ;;  %v557_v17 = vadd.f32 %v1800_v25, %v556_v9  ;;  %v923_v34 = vld [vmem:[#allocation2 + $0x81] sm:$0xff]  ;;  %v964_v0 = vld [vmem:[#allocation2 + $0xd0] sm:$0xff] }
  0xeb   : > { %v707_v21 = vpop.f32.mrf.mxu1  ;;  %v833_v22 = vadd.f32 %v832_v10, %v823_v47  ;;  %v897_v24 = vadd.f32 %v896_v12, %v894_v11  ;;  %v901_v26 = vld [vmem:[#allocation2 + $0x60] sm:$0xff]  ;;  %v933_v41 = vmul.f32 %v915_v20, %v1822_v52  ;;  %v916_v45 = vmul.f32 %v915_v20, %v1863_v38 }
  0xec   : > { %789 = vst.msk [vmem:[#allocation2 + $0xe1] sm:$0xff] %vm306_vm1, %v752_v14  ;;  %v755_v28 = vmax.f32 %v713_v15, 0.0  ;;  %v708_v29 = vadd.f32 %v1800_v25, %v707_v21  ;;  %777 = vst.msk [vmem:[#allocation2 + $0x190] sm:$0xff] %vm306_vm1, %v596_v16  ;;  %v595_v30 = vmax.f32 %v557_v17, 0.0  ;;  %v902_v32 = vmul.f32 %v901_v26, %v1873_v48  ;;  %v909_v33 = vld [vmem:[#allocation2 + $0x61] sm:$0xff] }
  0xed   : > { %v1595_v35 = vpop.f32.mrf.mxu1  ;;  %v842_v36 = vadd.f32 %v841_v49, %v833_v22  ;;  %v910_v53 = vmul.f32 %v909_v33, %v1876_v50  ;;  %v938_v54 = vadd.f32 %v937_v13, %v933_v41  ;;  %v940_v55 = vmul.f32 %v923_v34, %v1839_v7  ;;  %v959_v57 = vld [vmem:[#allocation2 + $0xc0] sm:$0xff] }
  0xee   : > { %792 = vst.msk [vmem:[#allocation2 + $0x141] sm:$0xff] %vm306_vm1, %v755_v28  ;;  %v754_v42 = vmax.f32 %v708_v29, 0.0  ;;  %v723_v43 = vadd.f32 %v1595_v35, %v1800_v25  ;;  %776 = vst.msk [vmem:[#allocation2 + $0x170] sm:$0xff] %vm306_vm1, %v595_v30  ;;  %v903_v44 = vadd.f32 %v902_v32, %v897_v24  ;;  %v924_v4 = vmul.f32 %v1905_v18, %v923_v34  ;;  %v967_v8 = vld [vmem:[#allocation2 + $0xc1] sm:$0xff]  ;;  %v1938_v22 = vld [vmem:[%s2036_s5] ss:$0 sm:$0xff] }
  0xef   : > { %v717_v47 = vpop.f32.mrf.mxu1  ;;  %v849_v51 = vadd.f32 %v848_v39, %v842_v36  ;;  %v945_v56 = vld [vmem:[#allocation2 + $0xa0] sm:$0xff]  ;;  %v941_v5 = vadd.f32 %v940_v55, %v938_v54  ;;  %v951_v6 = vmul.f32 %v950_v46, %v1860_v37  ;;  %v977_v12 = vmul.f32 %v959_v57, %v1822_v52 }
  0xf0   : > { %791 = vst.msk [vmem:[#allocation2 + $0x121] sm:$0xff] %vm306_vm1, %v754_v42  ;;  %v757_v58 = vmax.f32 %v723_v43, 0.0  ;;  %v718_v59 = vadd.f32 %v1800_v25, %v717_v47  ;;  %v908_v60 = vadd.f32 %v907_v27, %v903_v44  ;;  %v946_v61 = vmul.f32 %v945_v56, %v1873_v48  ;;  %v953_v49 = vld [vmem:[#allocation2 + $0xa1] sm:$0xff]  ;;  %v1008_v44 = vld [vmem:[#allocation2 + $0x110] sm:$0xff] }
  0xf1   : > { %v1598_v2 = vpop.f32.mrf.mxu1  ;;  %v859_v3 = vadd.f32 %v858_v23, %v849_v51  ;;  %v954_v16 = vmul.f32 %v953_v49, %v1876_v50  ;;  %v981_v17 = vmul.f32 %v964_v0, %v1830_v62  ;;  %v984_v24 = vmul.f32 %v967_v8, %v1839_v7  ;;  %v1003_v43 = vld [vmem:[#allocation2 + $0x100] sm:$0xff] }
  0xf2   : > { %794 = vst.msk [vmem:[#allocation2 + $0x181] sm:$0xff] %vm306_vm1, %v757_v58  ;;  %v756_v9 = vmax.f32 %v718_v59, 0.0  ;;  %v733_v10 = vadd.f32 %v1598_v2, %v1800_v25  ;;  %v911_v11 = vadd.f32 %v910_v53, %v908_v60  ;;  %v947_v15 = vadd.f32 %v946_v61, %v941_v5  ;;  %v1011_v56 = vld [vmem:[#allocation2 + $0x101] sm:$0xff]  ;;  %v1052_v5 = vld [vmem:[#allocation2 + $0x150] sm:$0xff] }
  0xf3   : > { %v727_v13 = vpop.f32.mrf.mxu1  ;;  %v868_v14 = vadd.f32 %v1885_v63, %v859_v3  ;;  %v989_v19 = vld [vmem:[#allocation2 + $0xe0] sm:$0xff]  ;;  %v994_v63 = vld [vmem:[#allocation2 + $0xf0] sm:$0xff]  ;;  %v982_v29 = vadd.f32 %v981_v17, %v977_v12  ;;  %v960_v35 = vmul.f32 %v959_v57, %v1863_v38  ;;  %v965_v54 = vmul.f32 %v964_v0, %v1866_v31 }
  0xf4   : > { %793 = vst.msk [vmem:[#allocation2 + $0x161] sm:$0xff] %vm306_vm1, %v756_v9  ;;  %v759_v20 = vmax.f32 %v733_v10, 0.0  ;;  %v728_v21 = vadd.f32 %v1800_v25, %v727_v13  ;;  %v917_v23 = vadd.f32 %v916_v45, %v911_v11  ;;  %v952_v28 = vadd.f32 %v951_v6, %v947_v15  ;;  %v997_v51 = vld [vmem:[#allocation2 + $0xe1] sm:$0xff]  ;;  %v1038_v3 = vld [vmem:[#allocation2 + $0x130] sm:$0xff] }
  0xf5   : > { %v1601_v26 = vpop.f32.mrf.mxu1  ;;  %v875_v27 = vadd.f32 %v874_v40, %v868_v14  ;;  %v990_v30 = vmul.f32 %v989_v19, %v1873_v48  ;;  %v985_v42 = vadd.f32 %v984_v24, %v982_v29  ;;  %v995_v40 = vmul.f32 %v994_v63, %v1860_v37  ;;  %v1055_v15 = vld [vmem:[#allocation2 + $0x141] sm:$0xff] }
  0xf6   : > { %796 = vst.msk [vmem:[#allocation2 + $0x1c1] sm:$0xff] %vm306_vm1, %v759_v20  ;;  %v758_v32 = vmax.f32 %v728_v21, 0.0  ;;  %v743_v33 = vadd.f32 %v1601_v26, %v1800_v25  ;;  %v922_v34 = vadd.f32 %v1889_v1, %v917_v23  ;;  %v955_v41 = vadd.f32 %v954_v16, %v952_v28  ;;  %v1082_v26 = vld [vmem:[#allocation2 + $0x170] sm:$0xff] }
  0xf7   : > { %v737_v36 = vpop.f32.mrf.mxu1  ;;  %v882_v39 = vadd.f32 %v1938_v22, %v875_v27  ;;  %v991_v55 = vadd.f32 %v990_v30, %v985_v42  ;;  %v1033_v57 = vld [vmem:[#allocation2 + $0x120] sm:$0xff]  ;;  %v1021_v60 = vmul.f32 %v1003_v43, %v1822_v52  ;;  %v1025_v61 = vmul.f32 %v1008_v44, %v1830_v62 }
  0xf8   : > { %795 = vst.msk [vmem:[#allocation2 + $0x1a1] sm:$0xff] %vm306_vm1, %v758_v32  ;;  %v761_v45 = vmax.f32 %v743_v33, 0.0  ;;  %v738_v46 = vadd.f32 %v1800_v25, %v737_v36  ;;  %v925_v47 = vadd.f32 %v924_v4, %v922_v34  ;;  %v961_v1 = vadd.f32 %v960_v35, %v955_v41  ;;  %v1047_v4 = vld [vmem:[#allocation2 + $0x140] sm:$0xff]  ;;  %v1096_v33 = vld [vmem:[#allocation2 + $0x190] sm:$0xff] }
  0xf9   : > { %v883_v53 = vmax.f32 %v882_v39, 0.0  ;;  %v968_v49 = vmul.f32 %v1905_v18, %v967_v8  ;;  %v996_v2 = vadd.f32 %v995_v40, %v991_v55  ;;  %v998_v0 = vmul.f32 %v997_v51, %v1876_v50  ;;  %v1041_v19 = vld [vmem:[#allocation2 + $0x121] sm:$0xff]  ;;  %v1970_v34 = vld [vmem:[#allocation2 + $0x1d0] sm:$0xff] }
  0xfa   : > { %798 = vst.msk [vmem:[#allocation2 + $0x201] sm:$0xff] %vm306_vm1, %v761_v45  ;;  %v760_v58 = vmax.f32 %v738_v46, 0.0  ;;  %v926_v59 = vadd.f32 %v1938_v22, %v925_v47  ;;  %v966_v25 = vadd.f32 %v965_v54, %v961_v1  ;;  %v1026_v9 = vadd.f32 %v1025_v61, %v1021_v60  ;;  %v1091_v27 = vld [vmem:[#allocation2 + $0x180] sm:$0xff] }
  0xfb   : > { %1610 = vmatprep.mubr.msk.f32.mxu0 %vm306_vm1, %v883_v53  ;;  %v1028_v10 = vmul.f32 %v1011_v56, %v1839_v7  ;;  %v1034_v11 = vmul.f32 %v1033_v57, %v1873_v48  ;;  %v999_v13 = vadd.f32 %v998_v0, %v996_v2  ;;  %v1004_v14 = vmul.f32 %v1003_v43, %v1863_v38  ;;  %v1077_v8 = vld [vmem:[#allocation2 + $0x160] sm:$0xff] }
  0xfc   : > { %797 = vst.msk [vmem:[#allocation2 + $0x1e1] sm:$0xff] %vm306_vm1, %v760_v58  ;;  %v927_v6 = vmax.f32 %v926_v59, 0.0  ;;  %v969_v12 = vadd.f32 %v968_v49, %v966_v25  ;;  %v1039_v17 = vmul.f32 %v1038_v3, %v1860_v37  ;;  %v1065_v20 = vmul.f32 %v1047_v4, %v1822_v52  ;;  %v1099_v42 = vld [vmem:[#allocation2 + $0x181] sm:$0xff] }
  0xfd   : > { %v1029_v16 = vadd.f32 %v1028_v10, %v1026_v9  ;;  %v1069_v21 = vmul.f32 %v1052_v5, %v1830_v62  ;;  %v1005_v24 = vadd.f32 %v1004_v14, %v999_v13  ;;  %v1009_v63 = vmul.f32 %v1008_v44, %v1866_v31  ;;  %v1135_v47 = vld [vmem:[#allocation2 + $0x1c0] sm:$0xff]  ;;  %v1126_v9 = vld [vmem:[#allocation2 + $0x1b0] sm:$0xff] }
  0xfe   : > { %1611 = vmatmul.mubr.msk.f32.vlgmr.msra.gmra.mxu0 %vm306_vm1, %v927_v6  ;;  %v970_v23 = vadd.f32 %v1938_v22, %v969_v12  ;;  %v1072_v30 = vmul.f32 %v1055_v15, %v1839_v7  ;;  %v1078_v32 = vmul.f32 %v1077_v8, %v1873_v48  ;;  %v1012_v39 = vmul.f32 %v1905_v18, %v1011_v56  ;;  %v1085_v1 = vld [vmem:[#allocation2 + $0x161] sm:$0xff] }
  0xff   : > { %v1035_v28 = vadd.f32 %v1034_v11, %v1029_v16  ;;  %v1070_v29 = vadd.f32 %v1069_v21, %v1065_v20  ;;  %v1010_v36 = vadd.f32 %v1009_v63, %v1005_v24  ;;  %v1042_v41 = vmul.f32 %v1041_v19, %v1876_v50  ;;  %v1121_v46 = vld [vmem:[#allocation2 + $0x1a0] sm:$0xff] }
 0x100   : > { %v971_v35 = vmax.f32 %v970_v23, 0.0  ;;  %v1083_v44 = vmul.f32 %v1082_v26, %v1860_v37  ;;  %v1109_v45 = vmul.f32 %v1091_v27, %v1822_v52  ;;  %v1048_v53 = vmul.f32 %v1047_v4, %v1863_v38  ;;  %v1143_v55 = vld [vmem:[#allocation2 + $0x1c1] sm:$0xff] }
 0x101   : > { %v1040_v40 = vadd.f32 %v1039_v17, %v1035_v28  ;;  %v1073_v43 = vadd.f32 %v1072_v30, %v1070_v29  ;;  %v1013_v51 = vadd.f32 %v1012_v39, %v1010_v36  ;;  %v1113_v54 = vmul.f32 %v1096_v33, %v1830_v62  ;;  %v1129_v17 = vld [vmem:[#allocation2 + $0x1a1] sm:$0xff] }
 0x102   : > { %1613 = vmatprep.mubr.msk.f32.mxu0 %vm306_vm1, %v971_v35  ;;  %v1157_v56 = vmul.f32 %v1970_v34, %v1830_v62  ;;  %v1053_v58 = vmul.f32 %v1052_v5, %v1866_v31  ;;  %v1116_v60 = vmul.f32 %v1099_v42, %v1839_v7  ;;  %v1122_v2 = vmul.f32 %v1121_v46, %v1873_v48 }
 0x103   : > { %v1043_v57 = vadd.f32 %v1042_v41, %v1040_v40  ;;  %v1079_v59 = vadd.f32 %v1078_v32, %v1073_v43  ;;  %v1165_v61 = vld [vmem:[#allocation2 + $0x1e0] sm:$0xff]  ;;  %v1014_v25 = vadd.f32 %v1938_v22, %v1013_v51  ;;  %v1114_v49 = vadd.f32 %v1113_v54, %v1109_v45  ;;  %v1184_v43 = vld [vmem:[#allocation2 + $0x210] sm:$0xff] }
 0x104   : > { %v1153_v0 = vmul.f32 %v1135_v47, %v1822_v52  ;;  %v1086_v6 = vmul.f32 %v1085_v1, %v1876_v50  ;;  %v1160_v62 = vmul.f32 %v1143_v55, %v1839_v7  ;;  %v1166_v12 = vmul.f32 %v1165_v61, %v1873_v48  ;;  %v1170_v52 = vld [vmem:[#allocation2 + $0x1f0] sm:$0xff]  ;;  %v1173_v63 = vld [vmem:[#allocation2 + $0x1e1] sm:$0xff] }
 0x105   : > { %v1049_v3 = vadd.f32 %v1048_v53, %v1043_v57  ;;  %v1084_v4 = vadd.f32 %v1083_v44, %v1079_v59  ;;  %v1015_v10 = vmax.f32 %v1014_v25, 0.0  ;;  %v1117_v5 = vadd.f32 %v1116_v60, %v1114_v49  ;;  %v1179_v32 = vld [vmem:[#allocation2 + $0x200] sm:$0xff] }
 0x106   : > { %v1158_v11 = vadd.f32 %v1157_v56, %v1153_v0  ;;  %v1056_v14 = vmul.f32 %v1905_v18, %v1055_v15  ;;  %v1092_v16 = vmul.f32 %v1091_v27, %v1863_v38  ;;  %v1127_v20 = vmul.f32 %v1126_v9, %v1860_v37  ;;  %v1187_v51 = vld [vmem:[#allocation2 + $0x201] sm:$0xff] }
 0x107   : > { %v1054_v13 = vadd.f32 %v1053_v58, %v1049_v3  ;;  %v1087_v8 = vadd.f32 %v1086_v6, %v1084_v4  ;;  %1614 = vmatmul.mubr.msk.f32.gmra.mxu0 %vm306_vm1, %v1015_v10  ;;  %v1123_v19 = vadd.f32 %v1122_v2, %v1117_v5  ;;  %v1097_v24 = vmul.f32 %v1096_v33, %v1866_v31 }
 0x108   : > { %v1161_v21 = vadd.f32 %v1160_v62, %v1158_v11  ;;  %v1130_v26 = vmul.f32 %v1129_v17, %v1876_v50  ;;  %v1171_v28 = vmul.f32 %v1170_v52, %v1860_v37  ;;  %v1100_v30 = vmul.f32 %v1905_v18, %v1099_v42 }
 0x109   : > { %v1057_v7 = vadd.f32 %v1056_v14, %v1054_v13  ;;  %v1093_v23 = vadd.f32 %v1092_v16, %v1087_v8  ;;  %v1128_v48 = vadd.f32 %v1127_v20, %v1123_v19  ;;  %v1136_v36 = vmul.f32 %v1135_v47, %v1863_v38 }
 0x10a   : > { %v1167_v15 = vadd.f32 %v1166_v12, %v1161_v21  ;;  %v1174_v41 = vmul.f32 %v1173_v63, %v1876_v50  ;;  %v1141_v45 = vmul.f32 %v1970_v34, %v1866_v31  ;;  %v1180_v46 = vmul.f32 %v1179_v32, %v1863_v38 }
 0x10b   : > { %v1058_v27 = vadd.f32 %v1938_v22, %v1057_v7  ;;  %v1098_v29 = vadd.f32 %v1097_v24, %v1093_v23  ;;  %v1131_v35 = vadd.f32 %v1130_v26, %v1128_v48  ;;  %v1144_v47 = vmul.f32 %v1905_v18, %v1143_v55 }
 0x10c   : > { %v1172_v39 = vadd.f32 %v1171_v28, %v1167_v15  ;;  %v1185_v1 = vmul.f32 %v1184_v43, %v1866_v31  ;;  %v1188_v34 = vmul.f32 %v1905_v18, %v1187_v51  ;;  %v1485_v31 = vld [vmem:[%s2038_s7] ss:$0 sm:$0xff] }
 0x10d   : > { %v1059_v33 = vmax.f32 %v1058_v27, 0.0  ;;  %v1101_v40 = vadd.f32 %v1100_v30, %v1098_v29  ;;  %v1137_v44 = vadd.f32 %v1136_v36, %v1131_v35 }
 0x10e   : > { %v1175_v37 = vadd.f32 %v1174_v41, %v1172_v39 }
 0x10f   : > { %1616 = vmatprep.mubr.msk.f32.mxu0 %vm306_vm1, %v1059_v33  ;;  %v1102_v42 = vadd.f32 %v1938_v22, %v1101_v40  ;;  %v1142_v53 = vadd.f32 %v1141_v45, %v1137_v44 }
 0x110   : > { %v1181_v50 = vadd.f32 %v1180_v46, %v1175_v37 }
 0x111   : > { %v1103_v54 = vmax.f32 %v1102_v42, 0.0  ;;  %v1145_v56 = vadd.f32 %v1144_v47, %v1142_v53 }
 0x112   : > { %v1186_v57 = vadd.f32 %v1185_v1, %v1181_v50 }
 0x113   : > { %1617 = vmatmul.mubr.msk.f32.gmra.mxu0 %vm306_vm1, %v1103_v54  ;;  %v1146_v38 = vadd.f32 %v1938_v22, %v1145_v56 }
 0x114   : > { %v1189_v58 = vadd.f32 %v1188_v34, %v1186_v57 }
 0x115   : > { %v1147_v59 = vmax.f32 %v1146_v38, 0.0 }
 0x116   : > { %v1190_v60 = vadd.f32 %v1938_v22, %v1189_v58 }
 0x117   : > { %1619 = vmatprep.mubr.msk.f32.mxu0 %vm306_vm1, %v1147_v59 }
 0x118   : > { %v1191_v61 = vmax.f32 %v1190_v60, 0.0 }
 0x11a   : > { %1620 = vmatmul.mubr.msk.f32.gmra.mxu0 %vm306_vm1, %v1191_v61 }
 0x1be   : > { %v1612_v18 = vpop.f32.mrf.mxu0 }
 0x1bf   : > { %v1294_v55 = vadd.f32 %v1612_v18, %v1485_v31 }
 0x1c0   : > { %v1288_v25 = vpop.f32.mrf.mxu0 }
 0x1c1   : > { %1330 = vst.msk [vmem:[%s305_s20 + $0x8] sm:$0xff] %vm391_vm0, %v1294_v55  ;;  %v1289_v22 = vadd.f32 %v1485_v31, %v1288_v25 }
 0x1c3   : > { %1329 = vst.msk [vmem:[%s305_s20] sm:$0xff] %vm391_vm0, %v1289_v22 }
 0x1c7   : > { %v1615_v49 = vpop.f32.mrf.mxu0 }
 0x1c8   : > { %v1304_v2 = vadd.f32 %v1615_v49, %v1485_v31 }
 0x1c9   : > { %v1298_v0 = vpop.f32.mrf.mxu0 }
 0x1ca   : > { %1332 = vst.msk [vmem:[%s305_s20 + $0x18] sm:$0xff] %vm391_vm0, %v1304_v2  ;;  %v1299_v3 = vadd.f32 %v1485_v31, %v1298_v0 }
 0x1cc   : > { %1331 = vst.msk [vmem:[%s305_s20 + $0x10] sm:$0xff] %vm391_vm0, %v1299_v3 }
 0x1d3   : > { %v1618_v4 = vpop.f32.mrf.mxu0 }
 0x1d4   : > { %v1314_v6 = vadd.f32 %v1618_v4, %v1485_v31 }
 0x1d5   : > { %v1308_v9 = vpop.f32.mrf.mxu0 }
 0x1d6   : > { %1334 = vst.msk [vmem:[%s305_s20 + $0x28] sm:$0xff] %vm391_vm0, %v1314_v6  ;;  %v1309_v62 = vadd.f32 %v1485_v31, %v1308_v9 }
 0x1d8   : > { %1333 = vst.msk [vmem:[%s305_s20 + $0x20] sm:$0xff] %vm391_vm0, %v1309_v62 }
 0x1da   : > { %v1621_v10 = vpop.f32.mrf.mxu0 }
 0x1db   : > { %v1324_v5 = vadd.f32 %v1621_v10, %v1485_v31 }
 0x1dc   : > { %v1318_v11 = vpop.f32.mrf.mxu0 }
 0x1dd   : > { %1336 = vst.msk [vmem:[%s305_s20 + $0x38] sm:$0xff] %vm391_vm0, %v1324_v5  ;;  %v1319_v12 = vadd.f32 %v1485_v31, %v1318_v11 }
 0x1df   : > { %1335 = vst.msk [vmem:[%s305_s20 + $0x30] sm:$0xff] %vm391_vm0, %v1319_v12 }
 0x1e0 PF: > { %s18_s27 = sadd.s32 1, %s1641_s27  }
 0x1e1   : > { %p15_p4 = scmp.ge.s32.totalorder %s18_s27, 4  }
 0x1e3   :  { %17 = sbr.rel (!%p15_p4) target bundleno = 1 (0x1), region = 136 }

</bundles_post_ra>
